<compile_context>
chip_gen: v6e
topology: v6e:2x2x1
jax: 0.10.0
libtpu: 0.0.40
codegen_flags: <defaults>
</compile_context>

<pallas_src>
import functools

import jax
import jax.numpy as jnp
from jax import lax
from jax.experimental import pallas as pl
from jax.experimental.pallas import tpu as pltpu


C1, C2, C3, C4 = 32, 32, 64, 25   # conv output channels
CIN_PAD = 8                       # conv1 input channels padded 7 -> 8


# ------------------------------ fused kernel -------------------------------

def _fused_kernel(x_ref, w1_ref, b1_ref, w2_ref, b2_ref, w3_ref, b3_ref,
                  w4_ref, b4_ref, f1w_ref, f1b_ref, f2w_ref, f2b_ref,
                  o_ref, a1_ref, a2_ref, *, H, W):
    # x_ref : (H*8, W)        input image, rows ordered (h, c)
    # wN_ref: (3, Cout, 3*Cin) conv weights, [kw, cout, kh*Cin + cin]
    # bN_ref: (Cout, 1)
    # w4_ref: (9, 64, 25)     conv4 weights, [kh*3+kw, cin, cout]
    # a1_ref: ((H-2)*32, W-2) conv1 output scratch   a2_ref: ((H-4)*32, W-4)
    H1, W1 = H - 2, W - 2
    H2, W2 = H - 4, W - 4
    H3, W3 = H - 6, W - 6
    H4, W4 = H - 8, W - 8            # conv4 output spatial size (192x192)
    inv_area = 1.0 / float(H4 * W4)

    def conv_row(src_ref, w_ref, b_ref, cin, h, wout, relu):
        # One output row: (Cout, wout) = sum_kw W_kw (Cout,3Cin) @ Xwin (3Cin,Win)
        start = pl.multiple_of(h * cin, cin)
        xwin = src_ref[pl.ds(start, 3 * cin), :]                   # (3Cin, Win)
        acc = jnp.dot(w_ref[0], xwin,
                      preferred_element_type=jnp.float32)[:, 0:wout]
        acc = acc + jnp.dot(w_ref[1], xwin,
                            preferred_element_type=jnp.float32)[:, 1:wout + 1]
        acc = acc + jnp.dot(w_ref[2], xwin,
                            preferred_element_type=jnp.float32)[:, 2:wout + 2]
        acc = acc + b_ref[...]
        if relu:
            acc = jnp.maximum(acc, 0.0)
        return acc                                                 # (Cout, wout)

    # ---- conv1 + BN + ReLU: x -> a1 ----
    def c1_body(h, carry):
        row = conv_row(x_ref, w1_ref, b1_ref, CIN_PAD, h, W1, True)
        a1_ref[pl.ds(pl.multiple_of(h * C1, C1), C1), :] = row
        return carry
    lax.fori_loop(0, H1, c1_body, 0)

    # ---- conv2 + BN + ReLU: a1 -> a2 ----
    def c2_body(h, carry):
        row = conv_row(a1_ref, w2_ref, b2_ref, C1, h, W2, True)
        a2_ref[pl.ds(pl.multiple_of(h * C2, C2), C2), :] = row
        return carry
    lax.fori_loop(0, H2, c2_body, 0)

    # ---- conv3 + BN + ReLU, accumulating the 9 windowed sums needed for
    #      conv4 + global average pooling (pool chain == global mean) ----
    def c3_body(h, carry):
        acc0, acc1, acc2 = carry
        row = conv_row(a2_ref, w3_ref, b3_ref, C2, h, W3, True)    # (64, W3)
        tot = jnp.sum(row, axis=1, keepdims=True)                  # (64, 1)
        e0 = row[:, 0:1]
        e1 = row[:, 1:2]
        eL = row[:, W3 - 2:W3 - 1]
        eR = row[:, W3 - 1:W3]
        t0 = tot - eL - eR          # sum over w in [0, W4)
        t1 = tot - e0 - eR          # sum over w in [1, W4+1)
        t2 = tot - e0 - e1          # sum over w in [2, W4+2)
        t3 = jnp.concatenate([t0, t1, t2], axis=1)                 # (64, 3)
        m0 = (h <= H4 - 1).astype(jnp.float32)
        m1 = jnp.logical_and(h >= 1, h <= H4).astype(jnp.float32)
        m2 = (h >= 2).astype(jnp.float32)
        return (acc0 + m0 * t3, acc1 + m1 * t3, acc2 + m2 * t3)

    zero = jnp.zeros((C3, 3), jnp.float32)
    accs = lax.fori_loop(0, H3, c3_body, (zero, zero, zero))

    # ---- conv4 folded into the pooling mean + Flatten + two Linear(25) ----
    s_acc = jnp.zeros((1, C4), jnp.float32)
    for kh in range(3):
        for kw in range(3):
            w4t = w4_ref[kh * 3 + kw]                  # (64, 25)
            col = accs[kh][:, kw:kw + 1]               # (64, 1) == S[kh, kw, :]
            s_acc = s_acc + jnp.sum(w4t * col, axis=0, keepdims=True)
    pooled = s_acc * inv_area + b4_ref[...]            # (1, 25)
    # TODO(synk): nn.Dropout(0.5) is identity in eval mode; training RNG mask not implemented.
    h1 = jnp.dot(pooled, f1w_ref[...],
                 preferred_element_type=jnp.float32) + f1b_ref[...]
    h2 = jnp.dot(h1, f2w_ref[...],
                 preferred_element_type=jnp.float32) + f2b_ref[...]
    o_ref[...] = h2


# ------------------------------ host wrapper -------------------------------

def _prep_conv_weight(w_oihw, cin_pad=None):
    # OIHW -> (kw, cout, kh*cin + cin), optionally zero-padding cin.
    co, ci, ksz_h, ksz_w = w_oihw.shape
    if cin_pad is not None and cin_pad > ci:
        w_oihw = jnp.pad(w_oihw, ((0, 0), (0, cin_pad - ci), (0, 0), (0, 0)))
        ci = cin_pad
    return jnp.transpose(w_oihw, (3, 0, 2, 1)).reshape(ksz_w, co, ksz_h * ci)


@jax.jit
def vitamon_phase2_pallas(x_nchw, p):
    N, C, H, W = x_nchw.shape
    # The pooling chain only ends at 1x1 (required by Flatten->Linear(25)) for
    # 200x200 inputs: (H-8)/4/4/4/3 must equal 1 exactly.
    assert C == 7 and H == 200 and W == 200, "Vitamon_phase2 requires 7x200x200 inputs"

    # NCHW -> (N, H*8, W), rows ordered (h, c); channels zero-padded 7 -> 8.
    x_pad = jnp.pad(x_nchw, ((0, 0), (0, CIN_PAD - C), (0, 0), (0, 0)))
    x_lay = jnp.transpose(x_pad, (0, 2, 1, 3)).reshape(N, H * CIN_PAD, W)

    w1 = _prep_conv_weight(p["conv1_oihw"], cin_pad=CIN_PAD)        # (3, 32, 24)
    w2 = _prep_conv_weight(p["conv2_oihw"])                         # (3, 32, 96)
    w3 = _prep_conv_weight(p["conv3_oihw"])                         # (3, 64, 96)
    w4 = jnp.transpose(p["conv4_oihw"], (2, 3, 1, 0)).reshape(9, C3, C4)

    b1 = p["conv1_b"][:, None]
    b2 = p["conv2_b"][:, None]
    b3 = p["conv3_b"][:, None]
    b4 = p["conv4_b"][None, :]
    f1w, f1b = p["fc1_w"].T, p["fc1_b"][None, :]
    f2w, f2b = p["fc2_w"].T, p["fc2_b"][None, :]

    kernel = functools.partial(_fused_kernel, H=H, W=W)
    out = pl.pallas_call(
        kernel,
        out_shape=jax.ShapeDtypeStruct((N, 1, C4), jnp.float32),
        grid=(N,),
        in_specs=[
            pl.BlockSpec((None, H * CIN_PAD, W), lambda n: (n, 0, 0)),
            pl.BlockSpec(w1.shape, lambda n: (0, 0, 0)),
            pl.BlockSpec(b1.shape, lambda n: (0, 0)),
            pl.BlockSpec(w2.shape, lambda n: (0, 0, 0)),
            pl.BlockSpec(b2.shape, lambda n: (0, 0)),
            pl.BlockSpec(w3.shape, lambda n: (0, 0, 0)),
            pl.BlockSpec(b3.shape, lambda n: (0, 0)),
            pl.BlockSpec(w4.shape, lambda n: (0, 0, 0)),
            pl.BlockSpec(b4.shape, lambda n: (0, 0)),
            pl.BlockSpec(f1w.shape, lambda n: (0, 0)),
            pl.BlockSpec(f1b.shape, lambda n: (0, 0)),
            pl.BlockSpec(f2w.shape, lambda n: (0, 0)),
            pl.BlockSpec(f2b.shape, lambda n: (0, 0)),
        ],
        out_specs=pl.BlockSpec((None, 1, C4), lambda n: (n, 0, 0)),
        scratch_shapes=[
            pltpu.VMEM(((H - 2) * C1, W - 2), jnp.float32),   # conv1 output
            pltpu.VMEM(((H - 4) * C2, W - 4), jnp.float32),   # conv2 output
        ],
        compiler_params=pltpu.CompilerParams(
            dimension_semantics=("parallel",),
            vmem_limit_bytes=32 * 1024 * 1024,
        ),
    )(x_lay, w1, b1, w2, b2, w3, b3, w4, b4, f1w, f1b, f2w, f2b)
    return out[:, 0, :]


# ------------------------- parameters (deterministic) ----------------------

def _fold_bn(w_oihw, b, gamma, beta, mean, var, eps=1e-5):
    scale = gamma / jnp.sqrt(var + eps)
    return w_oihw * scale[:, None, None, None], (b - mean) * scale + beta


def init_params(key):
    ks = iter(jax.random.split(key, 24))

    def conv_wb(cout, cin):
        w = jax.random.normal(next(ks), (cout, cin, 3, 3), jnp.float32) * 0.1
        b = jax.random.normal(next(ks), (cout,), jnp.float32) * 0.1
        return w, b

    def bn(c):
        gamma = 1.0 + 0.1 * jax.random.normal(next(ks), (c,), jnp.float32)
        beta = 0.1 * jax.random.normal(next(ks), (c,), jnp.float32)
        mean = 0.1 * jax.random.normal(next(ks), (c,), jnp.float32)
        var = jax.random.uniform(next(ks), (c,), jnp.float32, 0.5, 1.5)
        return gamma, beta, mean, var

    p = {}
    for i, (cin, cout) in enumerate([(7, 32), (32, 32), (32, 64)], start=1):
        w, b = conv_wb(cout, cin)
        wf, bf = _fold_bn(w, b, *bn(cout))
        p[f"conv{i}_oihw"] = wf
        p[f"conv{i}_b"] = bf
    w4, b4 = conv_wb(25, 64)
    p["conv4_oihw"], p["conv4_b"] = w4, b4
    for i in (1, 2):
        p[f"fc{i}_w"] = jax.random.normal(next(ks), (25, 25), jnp.float32) * 0.1
        p[f"fc{i}_b"] = jax.random.normal(next(ks), (25,), jnp.float32) * 0.1
    return p


# ------------------------------ JAX reference -------------------------------

@jax.jit
def vitamon_phase2_ref(x_nchw, p):
    # Pure-JAX reference matching the PyTorch forward (eval mode) in NCHW.
    def conv(x, w, b):
        y = lax.conv_general_dilated(x, w, (1, 1), "VALID",
                                     dimension_numbers=("NCHW", "OIHW", "NCHW"))
        return y + b[None, :, None, None]

    def avg_pool(x, k):
        N, C, H, W = x.shape
        return x.reshape(N, C, H // k, k, W // k, k).mean(axis=(3, 5))

    c = jnp.maximum(conv(x_nchw, p["conv1_oihw"], p["conv1_b"]), 0.0)
    c = jnp.maximum(conv(c, p["conv2_oihw"], p["conv2_b"]), 0.0)
    c = jnp.maximum(conv(c, p["conv3_oihw"], p["conv3_b"]), 0.0)
    c = conv(c, p["conv4_oihw"], p["conv4_b"])
    pth = avg_pool(avg_pool(avg_pool(avg_pool(c, 4), 4), 4), 3)
    f = pth.reshape(pth.shape[0], -1)                      # (N, 25)
    f = f @ p["fc1_w"].T + p["fc1_b"]
    f = f @ p["fc2_w"].T + p["fc2_b"]
    return f


# ----------------------------------- main -----------------------------------

if __name__ == "__main__":
    key = jax.random.PRNGKey(0)
    k_x, k_p = jax.random.split(key)
    params = init_params(k_p)

    # Minimum spatial size admitted by the architecture (Flatten -> Linear(25)).
    x = jax.random.normal(k_x, (2, 7, 200, 200), jnp.float32)

    out = jax.block_until_ready(vitamon_phase2_pallas(x, params))
    assert out.shape == (2, 25), out.shape

    ref = jax.block_until_ready(vitamon_phase2_ref(x, params))
    err = float(jnp.max(jnp.abs(out - ref)))
    scale = float(jnp.max(jnp.abs(ref)))
    assert err <= 1e-3 * (1.0 + scale), f"mismatch: max|diff|={err}, max|ref|={scale}"

    print("KERNEL_OK")
</pallas_src>

<mosaic_0001>
module attributes {stable_mosaic.version = 11 : i64} {
  func.func @_fused_kernel(%arg0: i32, %arg1: memref<1x1600x200xf32, #tpu.memory_space<vmem>>, %arg2: memref<3x32x24xf32, #tpu.memory_space<vmem>>, %arg3: memref<32x1xf32, #tpu.memory_space<vmem>>, %arg4: memref<3x32x96xf32, #tpu.memory_space<vmem>>, %arg5: memref<32x1xf32, #tpu.memory_space<vmem>>, %arg6: memref<3x64x96xf32, #tpu.memory_space<vmem>>, %arg7: memref<64x1xf32, #tpu.memory_space<vmem>>, %arg8: memref<9x64x25xf32, #tpu.memory_space<vmem>>, %arg9: memref<1x25xf32, #tpu.memory_space<vmem>>, %arg10: memref<25x25xf32, #tpu.memory_space<vmem>>, %arg11: memref<1x25xf32, #tpu.memory_space<vmem>>, %arg12: memref<25x25xf32, #tpu.memory_space<vmem>>, %arg13: memref<1x25xf32, #tpu.memory_space<vmem>>, %arg14: memref<1x1x25xf32, #tpu.memory_space<vmem>>, %arg15: memref<6336x198xf32, #tpu.memory_space<vmem>>, %arg16: memref<6272x196xf32, #tpu.memory_space<vmem>>) attributes {dimension_semantics = [#tpu.dimension_semantics<parallel>], iteration_bounds = array<i64: 2>, scalar_prefetch = 0 : i64, scratch_operands = 2 : i64, tpu.core_type = #tpu.core_type<tc>, window_params = [{transform_indices = @transform_0, window_bounds = array<i64: 1, 1600, 200>}, {pipeline_mode = #tpu.pipeline_mode<synchronous>, transform_indices = @transform_1, window_bounds = array<i64: 3, 32, 24>}, {pipeline_mode = #tpu.pipeline_mode<synchronous>, transform_indices = @transform_2, window_bounds = array<i64: 32, 1>}, {pipeline_mode = #tpu.pipeline_mode<synchronous>, transform_indices = @transform_3, window_bounds = array<i64: 3, 32, 96>}, {pipeline_mode = #tpu.pipeline_mode<synchronous>, transform_indices = @transform_4, window_bounds = array<i64: 32, 1>}, {pipeline_mode = #tpu.pipeline_mode<synchronous>, transform_indices = @transform_5, window_bounds = array<i64: 3, 64, 96>}, {pipeline_mode = #tpu.pipeline_mode<synchronous>, transform_indices = @transform_6, window_bounds = array<i64: 64, 1>}, {pipeline_mode = #tpu.pipeline_mode<synchronous>, transform_indices = @transform_7, window_bounds = array<i64: 9, 64, 25>}, {pipeline_mode = #tpu.pipeline_mode<synchronous>, transform_indices = @transform_8, window_bounds = array<i64: 1, 25>}, {pipeline_mode = #tpu.pipeline_mode<synchronous>, transform_indices = @transform_9, window_bounds = array<i64: 25, 25>}, {pipeline_mode = #tpu.pipeline_mode<synchronous>, transform_indices = @transform_10, window_bounds = array<i64: 1, 25>}, {pipeline_mode = #tpu.pipeline_mode<synchronous>, transform_indices = @transform_11, window_bounds = array<i64: 25, 25>}, {pipeline_mode = #tpu.pipeline_mode<synchronous>, transform_indices = @transform_12, window_bounds = array<i64: 1, 25>}, {transform_indices = @transform_13, window_bounds = array<i64: 1, 1, 25>}]} {
    %c0_i32 = arith.constant 0 : i32
    %c198_i32 = arith.constant 198 : i32
    %0 = arith.addi %c0_i32, %c198_i32 : i32
    %c1_i32 = arith.constant 1 : i32
    scf.for %arg17 = %c0_i32 to %0 step %c1_i32  : i32 {
      %c8_i32 = arith.constant 8 : i32
      %93 = arith.muli %arg17, %c8_i32 : i32
      %94 = tpu.assume_multiple %93, 8 : i32
      %c0_51 = arith.constant 0 : index
      %95 = arith.index_cast %94 : i32 to index
      %c0_52 = arith.constant 0 : index
      %96 = vector.load %arg1[%c0_51, %95, %c0_52] : memref<1x1600x200xf32, #tpu.memory_space<vmem>>, vector<1x24x200xf32>
      %97 = vector.shape_cast %96 : vector<1x24x200xf32> to vector<24x200xf32>
      %c0_53 = arith.constant 0 : index
      %c0_54 = arith.constant 0 : index
      %c0_55 = arith.constant 0 : index
      %98 = vector.load %arg2[%c0_53, %c0_54, %c0_55] : memref<3x32x24xf32, #tpu.memory_space<vmem>>, vector<1x32x24xf32>
      %99 = vector.shape_cast %98 : vector<1x32x24xf32> to vector<32x24xf32>
      %cst_56 = arith.constant dense<0.000000e+00> : vector<32x200xf32>
      %100 = tpu.matmul %99, %97, %cst_56 {dimension_numbers = #tpu.dot_dimension_numbers<[1], [0], [0], [1], [0, 0, 1, 1], [], []>} : vector<32x24xf32>, vector<24x200xf32>, vector<32x200xf32> -> vector<32x200xf32>
      %101 = vector.extract_strided_slice %100 {offsets = [0, 0], sizes = [32, 198], strides = [1, 1]} : vector<32x200xf32> to vector<32x198xf32>
      %c1_57 = arith.constant 1 : index
      %c0_58 = arith.constant 0 : index
      %c0_59 = arith.constant 0 : index
      %102 = vector.load %arg2[%c1_57, %c0_58, %c0_59] : memref<3x32x24xf32, #tpu.memory_space<vmem>>, vector<1x32x24xf32>
      %103 = vector.shape_cast %102 : vector<1x32x24xf32> to vector<32x24xf32>
      %cst_60 = arith.constant dense<0.000000e+00> : vector<32x200xf32>
      %104 = tpu.matmul %103, %97, %cst_60 {dimension_numbers = #tpu.dot_dimension_numbers<[1], [0], [0], [1], [0, 0, 1, 1], [], []>} : vector<32x24xf32>, vector<24x200xf32>, vector<32x200xf32> -> vector<32x200xf32>
      %105 = vector.extract_strided_slice %104 {offsets = [0, 1], sizes = [32, 198], strides = [1, 1]} : vector<32x200xf32> to vector<32x198xf32>
      %106 = arith.addf %101, %105 : vector<32x198xf32>
      %c2_61 = arith.constant 2 : index
      %c0_62 = arith.constant 0 : index
      %c0_63 = arith.constant 0 : index
      %107 = vector.load %arg2[%c2_61, %c0_62, %c0_63] : memref<3x32x24xf32, #tpu.memory_space<vmem>>, vector<1x32x24xf32>
      %108 = vector.shape_cast %107 : vector<1x32x24xf32> to vector<32x24xf32>
      %cst_64 = arith.constant dense<0.000000e+00> : vector<32x200xf32>
      %109 = tpu.matmul %108, %97, %cst_64 {dimension_numbers = #tpu.dot_dimension_numbers<[1], [0], [0], [1], [0, 0, 1, 1], [], []>} : vector<32x24xf32>, vector<24x200xf32>, vector<32x200xf32> -> vector<32x200xf32>
      %110 = vector.extract_strided_slice %109 {offsets = [0, 2], sizes = [32, 198], strides = [1, 1]} : vector<32x200xf32> to vector<32x198xf32>
      %111 = arith.addf %106, %110 : vector<32x198xf32>
      %c0_65 = arith.constant 0 : index
      %c0_66 = arith.constant 0 : index
      %112 = vector.load %arg3[%c0_65, %c0_66] : memref<32x1xf32, #tpu.memory_space<vmem>>, vector<32x1xf32>
      %113 = vector.broadcast %112 : vector<32x1xf32> to vector<32x198xf32>
      %114 = arith.addf %111, %113 : vector<32x198xf32>
      %cst_67 = arith.constant 0.000000e+00 : f32
      %115 = vector.broadcast %cst_67 : f32 to vector<32x198xf32>
      %116 = arith.maximumf %114, %115 : vector<32x198xf32>
      %c32_i32 = arith.constant 32 : i32
      %117 = arith.muli %arg17, %c32_i32 : i32
      %118 = tpu.assume_multiple %117, 32 : i32
      %119 = arith.index_cast %118 : i32 to index
      %c0_68 = arith.constant 0 : index
      %120 = vector.load %arg15[%119, %c0_68] : memref<6336x198xf32, #tpu.memory_space<vmem>>, vector<32x198xf32>
      tpu.vector_store %arg15[%119, %c0_68], %116 {strides = array<i32>} : memref<6336x198xf32, #tpu.memory_space<vmem>>, vector<32x198xf32>,
    }
    %c198_i32_0 = arith.constant 198 : i32
    %c0_i32_1 = arith.constant 0 : i32
    %c196_i32 = arith.constant 196 : i32
    %1 = arith.addi %c0_i32_1, %c196_i32 : i32
    %c1_i32_2 = arith.constant 1 : i32
    scf.for %arg17 = %c0_i32_1 to %1 step %c1_i32_2  : i32 {
      %c32_i32 = arith.constant 32 : i32
      %93 = arith.muli %arg17, %c32_i32 : i32
      %94 = tpu.assume_multiple %93, 32 : i32
      %95 = arith.index_cast %94 : i32 to index
      %c0_51 = arith.constant 0 : index
      %96 = vector.load %arg15[%95, %c0_51] : memref<6336x198xf32, #tpu.memory_space<vmem>>, vector<96x198xf32>
      %c0_52 = arith.constant 0 : index
      %c0_53 = arith.constant 0 : index
      %c0_54 = arith.constant 0 : index
      %97 = vector.load %arg4[%c0_52, %c0_53, %c0_54] : memref<3x32x96xf32, #tpu.memory_space<vmem>>, vector<1x32x96xf32>
      %98 = vector.shape_cast %97 : vector<1x32x96xf32> to vector<32x96xf32>
      %cst_55 = arith.constant dense<0.000000e+00> : vector<32x198xf32>
      %99 = tpu.matmul %98, %96, %cst_55 {dimension_numbers = #tpu.dot_dimension_numbers<[1], [0], [0], [1], [0, 0, 1, 1], [], []>} : vector<32x96xf32>, vector<96x198xf32>, vector<32x198xf32> -> vector<32x198xf32>
      %100 = vector.extract_strided_slice %99 {offsets = [0, 0], sizes = [32, 196], strides = [1, 1]} : vector<32x198xf32> to vector<32x196xf32>
      %c1_56 = arith.constant 1 : index
      %c0_57 = arith.constant 0 : index
      %c0_58 = arith.constant 0 : index
      %101 = vector.load %arg4[%c1_56, %c0_57, %c0_58] : memref<3x32x96xf32, #tpu.memory_space<vmem>>, vector<1x32x96xf32>
      %102 = vector.shape_cast %101 : vector<1x32x96xf32> to vector<32x96xf32>
      %cst_59 = arith.constant dense<0.000000e+00> : vector<32x198xf32>
      %103 = tpu.matmul %102, %96, %cst_59 {dimension_numbers = #tpu.dot_dimension_numbers<[1], [0], [0], [1], [0, 0, 1, 1], [], []>} : vector<32x96xf32>, vector<96x198xf32>, vector<32x198xf32> -> vector<32x198xf32>
      %104 = vector.extract_strided_slice %103 {offsets = [0, 1], sizes = [32, 196], strides = [1, 1]} : vector<32x198xf32> to vector<32x196xf32>
      %105 = arith.addf %100, %104 : vector<32x196xf32>
      %c2_60 = arith.constant 2 : index
      %c0_61 = arith.constant 0 : index
      %c0_62 = arith.constant 0 : index
      %106 = vector.load %arg4[%c2_60, %c0_61, %c0_62] : memref<3x32x96xf32, #tpu.memory_space<vmem>>, vector<1x32x96xf32>
      %107 = vector.shape_cast %106 : vector<1x32x96xf32> to vector<32x96xf32>
      %cst_63 = arith.constant dense<0.000000e+00> : vector<32x198xf32>
      %108 = tpu.matmul %107, %96, %cst_63 {dimension_numbers = #tpu.dot_dimension_numbers<[1], [0], [0], [1], [0, 0, 1, 1], [], []>} : vector<32x96xf32>, vector<96x198xf32>, vector<32x198xf32> -> vector<32x198xf32>
      %109 = vector.extract_strided_slice %108 {offsets = [0, 2], sizes = [32, 196], strides = [1, 1]} : vector<32x198xf32> to vector<32x196xf32>
      %110 = arith.addf %105, %109 : vector<32x196xf32>
      %c0_64 = arith.constant 0 : index
      %c0_65 = arith.constant 0 : index
      %111 = vector.load %arg5[%c0_64, %c0_65] : memref<32x1xf32, #tpu.memory_space<vmem>>, vector<32x1xf32>
      %112 = vector.broadcast %111 : vector<32x1xf32> to vector<32x196xf32>
      %113 = arith.addf %110, %112 : vector<32x196xf32>
      %cst_66 = arith.constant 0.000000e+00 : f32
      %114 = vector.broadcast %cst_66 : f32 to vector<32x196xf32>
      %115 = arith.maximumf %113, %114 : vector<32x196xf32>
      %c32_i32_67 = arith.constant 32 : i32
      %116 = arith.muli %arg17, %c32_i32_67 : i32
      %117 = tpu.assume_multiple %116, 32 : i32
      %118 = arith.index_cast %117 : i32 to index
      %c0_68 = arith.constant 0 : index
      %119 = vector.load %arg16[%118, %c0_68] : memref<6272x196xf32, #tpu.memory_space<vmem>>, vector<32x196xf32>
      tpu.vector_store %arg16[%118, %c0_68], %115 {strides = array<i32>} : memref<6272x196xf32, #tpu.memory_space<vmem>>, vector<32x196xf32>,
    }
    %c196_i32_3 = arith.constant 196 : i32
    %cst = arith.constant 0.000000e+00 : f32
    %2 = vector.broadcast %cst : f32 to vector<64x3xf32>
    %c0_i32_4 = arith.constant 0 : i32
    %c194_i32 = arith.constant 194 : i32
    %3 = arith.addi %c0_i32_4, %c194_i32 : i32
    %c1_i32_5 = arith.constant 1 : i32
    %4:3 = scf.for %arg17 = %c0_i32_4 to %3 step %c1_i32_5 iter_args(%arg18 = %2, %arg19 = %2, %arg20 = %2) -> (vector<64x3xf32>, vector<64x3xf32>, vector<64x3xf32>)  : i32 {
      %c32_i32 = arith.constant 32 : i32
      %93 = arith.muli %arg17, %c32_i32 : i32
      %94 = tpu.assume_multiple %93, 32 : i32
      %95 = arith.index_cast %94 : i32 to index
      %c0_51 = arith.constant 0 : index
      %96 = vector.load %arg16[%95, %c0_51] : memref<6272x196xf32, #tpu.memory_space<vmem>>, vector<96x196xf32>
      %c0_52 = arith.constant 0 : index
      %c0_53 = arith.constant 0 : index
      %c0_54 = arith.constant 0 : index
      %97 = vector.load %arg6[%c0_52, %c0_53, %c0_54] : memref<3x64x96xf32, #tpu.memory_space<vmem>>, vector<1x64x96xf32>
      %98 = vector.shape_cast %97 : vector<1x64x96xf32> to vector<64x96xf32>
      %cst_55 = arith.constant dense<0.000000e+00> : vector<64x196xf32>
      %99 = tpu.matmul %98, %96, %cst_55 {dimension_numbers = #tpu.dot_dimension_numbers<[1], [0], [0], [1], [0, 0, 1, 1], [], []>} : vector<64x96xf32>, vector<96x196xf32>, vector<64x196xf32> -> vector<64x196xf32>
      %100 = vector.extract_strided_slice %99 {offsets = [0, 0], sizes = [64, 194], strides = [1, 1]} : vector<64x196xf32> to vector<64x194xf32>
      %c1_56 = arith.constant 1 : index
      %c0_57 = arith.constant 0 : index
      %c0_58 = arith.constant 0 : index
      %101 = vector.load %arg6[%c1_56, %c0_57, %c0_58] : memref<3x64x96xf32, #tpu.memory_space<vmem>>, vector<1x64x96xf32>
      %102 = vector.shape_cast %101 : vector<1x64x96xf32> to vector<64x96xf32>
      %cst_59 = arith.constant dense<0.000000e+00> : vector<64x196xf32>
      %103 = tpu.matmul %102, %96, %cst_59 {dimension_numbers = #tpu.dot_dimension_numbers<[1], [0], [0], [1], [0, 0, 1, 1], [], []>} : vector<64x96xf32>, vector<96x196xf32>, vector<64x196xf32> -> vector<64x196xf32>
      %104 = vector.extract_strided_slice %103 {offsets = [0, 1], sizes = [64, 194], strides = [1, 1]} : vector<64x196xf32> to vector<64x194xf32>
      %105 = arith.addf %100, %104 : vector<64x194xf32>
      %c2_60 = arith.constant 2 : index
      %c0_61 = arith.constant 0 : index
      %c0_62 = arith.constant 0 : index
      %106 = vector.load %arg6[%c2_60, %c0_61, %c0_62] : memref<3x64x96xf32, #tpu.memory_space<vmem>>, vector<1x64x96xf32>
      %107 = vector.shape_cast %106 : vector<1x64x96xf32> to vector<64x96xf32>
      %cst_63 = arith.constant dense<0.000000e+00> : vector<64x196xf32>
      %108 = tpu.matmul %107, %96, %cst_63 {dimension_numbers = #tpu.dot_dimension_numbers<[1], [0], [0], [1], [0, 0, 1, 1], [], []>} : vector<64x96xf32>, vector<96x196xf32>, vector<64x196xf32> -> vector<64x196xf32>
      %109 = vector.extract_strided_slice %108 {offsets = [0, 2], sizes = [64, 194], strides = [1, 1]} : vector<64x196xf32> to vector<64x194xf32>
      %110 = arith.addf %105, %109 : vector<64x194xf32>
      %c0_64 = arith.constant 0 : index
      %c0_65 = arith.constant 0 : index
      %111 = vector.load %arg7[%c0_64, %c0_65] : memref<64x1xf32, #tpu.memory_space<vmem>>, vector<64x1xf32>
      %112 = vector.broadcast %111 : vector<64x1xf32> to vector<64x194xf32>
      %113 = arith.addf %110, %112 : vector<64x194xf32>
      %cst_66 = arith.constant 0.000000e+00 : f32
      %114 = vector.broadcast %cst_66 : f32 to vector<64x194xf32>
      %115 = arith.maximumf %113, %114 : vector<64x194xf32>
      %cst_67 = arith.constant dense<0.000000e+00> : vector<64xf32>
      %116 = vector.multi_reduction <add>, %115, %cst_67 [1] : vector<64x194xf32> to vector<64xf32>
      %117 = vector.shape_cast %116 : vector<64xf32> to vector<64x1xf32>
      %118 = vector.extract_strided_slice %115 {offsets = [0, 0], sizes = [64, 1], strides = [1, 1]} : vector<64x194xf32> to vector<64x1xf32>
      %119 = vector.extract_strided_slice %115 {offsets = [0, 1], sizes = [64, 1], strides = [1, 1]} : vector<64x194xf32> to vector<64x1xf32>
      %120 = vector.extract_strided_slice %115 {offsets = [0, 192], sizes = [64, 1], strides = [1, 1]} : vector<64x194xf32> to vector<64x1xf32>
      %121 = vector.extract_strided_slice %115 {offsets = [0, 193], sizes = [64, 1], strides = [1, 1]} : vector<64x194xf32> to vector<64x1xf32>
      %122 = arith.subf %117, %120 : vector<64x1xf32>
      %123 = arith.subf %122, %121 : vector<64x1xf32>
      %124 = arith.subf %117, %118 : vector<64x1xf32>
      %125 = arith.subf %124, %121 : vector<64x1xf32>
      %126 = arith.subf %117, %118 : vector<64x1xf32>
      %127 = arith.subf %126, %119 : vector<64x1xf32>
      %128 = tpu.concatenate %123, %125, %127 in 1 : vector<64x1xf32>, vector<64x1xf32>, vector<64x1xf32> -> vector<64x3xf32>
      %c191_i32 = arith.constant 191 : i32
      %129 = arith.cmpi sle, %arg17, %c191_i32 : i32
      %130 = arith.extui %129 : i1 to i32
      %131 = arith.sitofp %130 : i32 to f32
      %c1_i32_68 = arith.constant 1 : i32
      %132 = arith.cmpi sge, %arg17, %c1_i32_68 : i32
      %c192_i32 = arith.constant 192 : i32
      %133 = arith.cmpi sle, %arg17, %c192_i32 : i32
      %134 = arith.andi %132, %133 : i1
      %135 = arith.extui %134 : i1 to i32
      %136 = arith.sitofp %135 : i32 to f32
      %c2_i32 = arith.constant 2 : i32
      %137 = arith.cmpi sge, %arg17, %c2_i32 : i32
      %138 = arith.extui %137 : i1 to i32
      %139 = arith.sitofp %138 : i32 to f32
      %140 = vector.broadcast %131 : f32 to vector<64x3xf32>
      %141 = arith.mulf %140, %128 : vector<64x3xf32>
      %142 = arith.addf %arg18, %141 : vector<64x3xf32>
      %143 = vector.broadcast %136 : f32 to vector<64x3xf32>
      %144 = arith.mulf %143, %128 : vector<64x3xf32>
      %145 = arith.addf %arg19, %144 : vector<64x3xf32>
      %146 = vector.broadcast %139 : f32 to vector<64x3xf32>
      %147 = arith.mulf %146, %128 : vector<64x3xf32>
      %148 = arith.addf %arg20, %147 : vector<64x3xf32>
      scf.yield %142, %145, %148 : vector<64x3xf32>, vector<64x3xf32>, vector<64x3xf32>
    }
    %c194_i32_6 = arith.constant 194 : i32
    %cst_7 = arith.constant 0.000000e+00 : f32
    %5 = vector.broadcast %cst_7 : f32 to vector<1x25xf32>
    %c0 = arith.constant 0 : index
    %c0_8 = arith.constant 0 : index
    %c0_9 = arith.constant 0 : index
    %6 = vector.load %arg8[%c0, %c0_8, %c0_9] : memref<9x64x25xf32, #tpu.memory_space<vmem>>, vector<1x64x25xf32>
    %7 = vector.shape_cast %6 : vector<1x64x25xf32> to vector<64x25xf32>
    %8 = vector.extract_strided_slice %4#0 {offsets = [0, 0], sizes = [64, 1], strides = [1, 1]} : vector<64x3xf32> to vector<64x1xf32>
    %9 = vector.broadcast %8 : vector<64x1xf32> to vector<64x25xf32>
    %10 = arith.mulf %7, %9 : vector<64x25xf32>
    %cst_10 = arith.constant dense<0.000000e+00> : vector<25xf32>
    %11 = vector.multi_reduction <add>, %10, %cst_10 [0] : vector<64x25xf32> to vector<25xf32>
    %12 = vector.shape_cast %11 : vector<25xf32> to vector<1x25xf32>
    %13 = arith.addf %5, %12 : vector<1x25xf32>
    %c1 = arith.constant 1 : index
    %c0_11 = arith.constant 0 : index
    %c0_12 = arith.constant 0 : index
    %14 = vector.load %arg8[%c1, %c0_11, %c0_12] : memref<9x64x25xf32, #tpu.memory_space<vmem>>, vector<1x64x25xf32>
    %15 = vector.shape_cast %14 : vector<1x64x25xf32> to vector<64x25xf32>
    %16 = vector.extract_strided_slice %4#0 {offsets = [0, 1], sizes = [64, 1], strides = [1, 1]} : vector<64x3xf32> to vector<64x1xf32>
    %17 = vector.broadcast %16 : vector<64x1xf32> to vector<64x25xf32>
    %18 = arith.mulf %15, %17 : vector<64x25xf32>
    %cst_13 = arith.constant dense<0.000000e+00> : vector<25xf32>
    %19 = vector.multi_reduction <add>, %18, %cst_13 [0] : vector<64x25xf32> to vector<25xf32>
    %20 = vector.shape_cast %19 : vector<25xf32> to vector<1x25xf32>
    %21 = arith.addf %13, %20 : vector<1x25xf32>
    %c2 = arith.constant 2 : index
    %c0_14 = arith.constant 0 : index
    %c0_15 = arith.constant 0 : index
    %22 = vector.load %arg8[%c2, %c0_14, %c0_15] : memref<9x64x25xf32, #tpu.memory_space<vmem>>, vector<1x64x25xf32>
    %23 = vector.shape_cast %22 : vector<1x64x25xf32> to vector<64x25xf32>
    %24 = vector.extract_strided_slice %4#0 {offsets = [0, 2], sizes = [64, 1], strides = [1, 1]} : vector<64x3xf32> to vector<64x1xf32>
    %25 = vector.broadcast %24 : vector<64x1xf32> to vector<64x25xf32>
    %26 = arith.mulf %23, %25 : vector<64x25xf32>
    %cst_16 = arith.constant dense<0.000000e+00> : vector<25xf32>
    %27 = vector.multi_reduction <add>, %26, %cst_16 [0] : vector<64x25xf32> to vector<25xf32>
    %28 = vector.shape_cast %27 : vector<25xf32> to vector<1x25xf32>
    %29 = arith.addf %21, %28 : vector<1x25xf32>
    %c3 = arith.constant 3 : index
    %c0_17 = arith.constant 0 : index
    %c0_18 = arith.constant 0 : index
    %30 = vector.load %arg8[%c3, %c0_17, %c0_18] : memref<9x64x25xf32, #tpu.memory_space<vmem>>, vector<1x64x25xf32>
    %31 = vector.shape_cast %30 : vector<1x64x25xf32> to vector<64x25xf32>
    %32 = vector.extract_strided_slice %4#1 {offsets = [0, 0], sizes = [64, 1], strides = [1, 1]} : vector<64x3xf32> to vector<64x1xf32>
    %33 = vector.broadcast %32 : vector<64x1xf32> to vector<64x25xf32>
    %34 = arith.mulf %31, %33 : vector<64x25xf32>
    %cst_19 = arith.constant dense<0.000000e+00> : vector<25xf32>
    %35 = vector.multi_reduction <add>, %34, %cst_19 [0] : vector<64x25xf32> to vector<25xf32>
    %36 = vector.shape_cast %35 : vector<25xf32> to vector<1x25xf32>
    %37 = arith.addf %29, %36 : vector<1x25xf32>
    %c4 = arith.constant 4 : index
    %c0_20 = arith.constant 0 : index
    %c0_21 = arith.constant 0 : index
    %38 = vector.load %arg8[%c4, %c0_20, %c0_21] : memref<9x64x25xf32, #tpu.memory_space<vmem>>, vector<1x64x25xf32>
    %39 = vector.shape_cast %38 : vector<1x64x25xf32> to vector<64x25xf32>
    %40 = vector.extract_strided_slice %4#1 {offsets = [0, 1], sizes = [64, 1], strides = [1, 1]} : vector<64x3xf32> to vector<64x1xf32>
    %41 = vector.broadcast %40 : vector<64x1xf32> to vector<64x25xf32>
    %42 = arith.mulf %39, %41 : vector<64x25xf32>
    %cst_22 = arith.constant dense<0.000000e+00> : vector<25xf32>
    %43 = vector.multi_reduction <add>, %42, %cst_22 [0] : vector<64x25xf32> to vector<25xf32>
    %44 = vector.shape_cast %43 : vector<25xf32> to vector<1x25xf32>
    %45 = arith.addf %37, %44 : vector<1x25xf32>
    %c5 = arith.constant 5 : index
    %c0_23 = arith.constant 0 : index
    %c0_24 = arith.constant 0 : index
    %46 = vector.load %arg8[%c5, %c0_23, %c0_24] : memref<9x64x25xf32, #tpu.memory_space<vmem>>, vector<1x64x25xf32>
    %47 = vector.shape_cast %46 : vector<1x64x25xf32> to vector<64x25xf32>
    %48 = vector.extract_strided_slice %4#1 {offsets = [0, 2], sizes = [64, 1], strides = [1, 1]} : vector<64x3xf32> to vector<64x1xf32>
    %49 = vector.broadcast %48 : vector<64x1xf32> to vector<64x25xf32>
    %50 = arith.mulf %47, %49 : vector<64x25xf32>
    %cst_25 = arith.constant dense<0.000000e+00> : vector<25xf32>
    %51 = vector.multi_reduction <add>, %50, %cst_25 [0] : vector<64x25xf32> to vector<25xf32>
    %52 = vector.shape_cast %51 : vector<25xf32> to vector<1x25xf32>
    %53 = arith.addf %45, %52 : vector<1x25xf32>
    %c6 = arith.constant 6 : index
    %c0_26 = arith.constant 0 : index
    %c0_27 = arith.constant 0 : index
    %54 = vector.load %arg8[%c6, %c0_26, %c0_27] : memref<9x64x25xf32, #tpu.memory_space<vmem>>, vector<1x64x25xf32>
    %55 = vector.shape_cast %54 : vector<1x64x25xf32> to vector<64x25xf32>
    %56 = vector.extract_strided_slice %4#2 {offsets = [0, 0], sizes = [64, 1], strides = [1, 1]} : vector<64x3xf32> to vector<64x1xf32>
    %57 = vector.broadcast %56 : vector<64x1xf32> to vector<64x25xf32>
    %58 = arith.mulf %55, %57 : vector<64x25xf32>
    %cst_28 = arith.constant dense<0.000000e+00> : vector<25xf32>
    %59 = vector.multi_reduction <add>, %58, %cst_28 [0] : vector<64x25xf32> to vector<25xf32>
    %60 = vector.shape_cast %59 : vector<25xf32> to vector<1x25xf32>
    %61 = arith.addf %53, %60 : vector<1x25xf32>
    %c7 = arith.constant 7 : index
    %c0_29 = arith.constant 0 : index
    %c0_30 = arith.constant 0 : index
    %62 = vector.load %arg8[%c7, %c0_29, %c0_30] : memref<9x64x25xf32, #tpu.memory_space<vmem>>, vector<1x64x25xf32>
    %63 = vector.shape_cast %62 : vector<1x64x25xf32> to vector<64x25xf32>
    %64 = vector.extract_strided_slice %4#2 {offsets = [0, 1], sizes = [64, 1], strides = [1, 1]} : vector<64x3xf32> to vector<64x1xf32>
    %65 = vector.broadcast %64 : vector<64x1xf32> to vector<64x25xf32>
    %66 = arith.mulf %63, %65 : vector<64x25xf32>
    %cst_31 = arith.constant dense<0.000000e+00> : vector<25xf32>
    %67 = vector.multi_reduction <add>, %66, %cst_31 [0] : vector<64x25xf32> to vector<25xf32>
    %68 = vector.shape_cast %67 : vector<25xf32> to vector<1x25xf32>
    %69 = arith.addf %61, %68 : vector<1x25xf32>
    %c8 = arith.constant 8 : index
    %c0_32 = arith.constant 0 : index
    %c0_33 = arith.constant 0 : index
    %70 = vector.load %arg8[%c8, %c0_32, %c0_33] : memref<9x64x25xf32, #tpu.memory_space<vmem>>, vector<1x64x25xf32>
    %71 = vector.shape_cast %70 : vector<1x64x25xf32> to vector<64x25xf32>
    %72 = vector.extract_strided_slice %4#2 {offsets = [0, 2], sizes = [64, 1], strides = [1, 1]} : vector<64x3xf32> to vector<64x1xf32>
    %73 = vector.broadcast %72 : vector<64x1xf32> to vector<64x25xf32>
    %74 = arith.mulf %71, %73 : vector<64x25xf32>
    %cst_34 = arith.constant dense<0.000000e+00> : vector<25xf32>
    %75 = vector.multi_reduction <add>, %74, %cst_34 [0] : vector<64x25xf32> to vector<25xf32>
    %76 = vector.shape_cast %75 : vector<25xf32> to vector<1x25xf32>
    %77 = arith.addf %69, %76 : vector<1x25xf32>
    %cst_35 = arith.constant 2.71267363E-5 : f32
    %78 = vector.broadcast %cst_35 : f32 to vector<1x25xf32>
    %79 = arith.mulf %77, %78 : vector<1x25xf32>
    %c0_36 = arith.constant 0 : index
    %c0_37 = arith.constant 0 : index
    %80 = vector.load %arg9[%c0_36, %c0_37] : memref<1x25xf32, #tpu.memory_space<vmem>>, vector<1x25xf32>
    %81 = arith.addf %79, %80 : vector<1x25xf32>
    %c0_38 = arith.constant 0 : index
    %c0_39 = arith.constant 0 : index
    %82 = vector.load %arg10[%c0_38, %c0_39] : memref<25x25xf32, #tpu.memory_space<vmem>>, vector<25x25xf32>
    %cst_40 = arith.constant dense<0.000000e+00> : vector<1x25xf32>
    %83 = tpu.matmul %81, %82, %cst_40 {dimension_numbers = #tpu.dot_dimension_numbers<[1], [0], [0], [1], [0, 0, 1, 1], [], []>} : vector<1x25xf32>, vector<25x25xf32>, vector<1x25xf32> -> vector<1x25xf32>
    %c0_41 = arith.constant 0 : index
    %c0_42 = arith.constant 0 : index
    %84 = vector.load %arg11[%c0_41, %c0_42] : memref<1x25xf32, #tpu.memory_space<vmem>>, vector<1x25xf32>
    %85 = arith.addf %83, %84 : vector<1x25xf32>
    %c0_43 = arith.constant 0 : index
    %c0_44 = arith.constant 0 : index
    %86 = vector.load %arg12[%c0_43, %c0_44] : memref<25x25xf32, #tpu.memory_space<vmem>>, vector<25x25xf32>
    %cst_45 = arith.constant dense<0.000000e+00> : vector<1x25xf32>
    %87 = tpu.matmul %85, %86, %cst_45 {dimension_numbers = #tpu.dot_dimension_numbers<[1], [0], [0], [1], [0, 0, 1, 1], [], []>} : vector<1x25xf32>, vector<25x25xf32>, vector<1x25xf32> -> vector<1x25xf32>
    %c0_46 = arith.constant 0 : index
    %c0_47 = arith.constant 0 : index
    %88 = vector.load %arg13[%c0_46, %c0_47] : memref<1x25xf32, #tpu.memory_space<vmem>>, vector<1x25xf32>
    %89 = arith.addf %87, %88 : vector<1x25xf32>
    %c0_48 = arith.constant 0 : index
    %c0_49 = arith.constant 0 : index
    %c0_50 = arith.constant 0 : index
    %90 = vector.load %arg14[%c0_48, %c0_49, %c0_50] : memref<1x1x25xf32, #tpu.memory_space<vmem>>, vector<1x1x25xf32>
    %91 = vector.shape_cast %90 : vector<1x1x25xf32> to vector<1x25xf32>
    %92 = vector.shape_cast %89 : vector<1x25xf32> to vector<1x1x25xf32>
    tpu.vector_store %arg14[%c0_48, %c0_49, %c0_50], %92 {strides = array<i32>} : memref<1x1x25xf32, #tpu.memory_space<vmem>>, vector<1x1x25xf32>,
    return
  }
  func.func @transform_0(%arg0: i32) -> (i32, i32, i32) {
    %c0_i32 = arith.constant 0 : i32
    %c0_i32_0 = arith.constant 0 : i32
    %c0_i32_1 = arith.constant 0 : i32
    return %arg0, %c0_i32, %c0_i32_0 : i32, i32, i32
  }
  func.func @transform_1(%arg0: i32) -> (i32, i32, i32) {
    %c0_i32 = arith.constant 0 : i32
    %c0_i32_0 = arith.constant 0 : i32
    %c0_i32_1 = arith.constant 0 : i32
    %c0_i32_2 = arith.constant 0 : i32
    return %c0_i32, %c0_i32_0, %c0_i32_1 : i32, i32, i32
  }
  func.func @transform_2(%arg0: i32) -> (i32, i32) {
    %c0_i32 = arith.constant 0 : i32
    %c0_i32_0 = arith.constant 0 : i32
    %c0_i32_1 = arith.constant 0 : i32
    return %c0_i32, %c0_i32_0 : i32, i32
  }
  func.func @transform_3(%arg0: i32) -> (i32, i32, i32) {
    %c0_i32 = arith.constant 0 : i32
    %c0_i32_0 = arith.constant 0 : i32
    %c0_i32_1 = arith.constant 0 : i32
    %c0_i32_2 = arith.constant 0 : i32
    return %c0_i32, %c0_i32_0, %c0_i32_1 : i32, i32, i32
  }
  func.func @transform_4(%arg0: i32) -> (i32, i32) {
    %c0_i32 = arith.constant 0 : i32
    %c0_i32_0 = arith.constant 0 : i32
    %c0_i32_1 = arith.constant 0 : i32
    return %c0_i32, %c0_i32_0 : i32, i32
  }
  func.func @transform_5(%arg0: i32) -> (i32, i32, i32) {
    %c0_i32 = arith.constant 0 : i32
    %c0_i32_0 = arith.constant 0 : i32
    %c0_i32_1 = arith.constant 0 : i32
    %c0_i32_2 = arith.constant 0 : i32
    return %c0_i32, %c0_i32_0, %c0_i32_1 : i32, i32, i32
  }
  func.func @transform_6(%arg0: i32) -> (i32, i32) {
    %c0_i32 = arith.constant 0 : i32
    %c0_i32_0 = arith.constant 0 : i32
    %c0_i32_1 = arith.constant 0 : i32
    return %c0_i32, %c0_i32_0 : i32, i32
  }
  func.func @transform_7(%arg0: i32) -> (i32, i32, i32) {
    %c0_i32 = arith.constant 0 : i32
    %c0_i32_0 = arith.constant 0 : i32
    %c0_i32_1 = arith.constant 0 : i32
    %c0_i32_2 = arith.constant 0 : i32
    return %c0_i32, %c0_i32_0, %c0_i32_1 : i32, i32, i32
  }
  func.func @transform_8(%arg0: i32) -> (i32, i32) {
    %c0_i32 = arith.constant 0 : i32
    %c0_i32_0 = arith.constant 0 : i32
    %c0_i32_1 = arith.constant 0 : i32
    return %c0_i32, %c0_i32_0 : i32, i32
  }
  func.func @transform_9(%arg0: i32) -> (i32, i32) {
    %c0_i32 = arith.constant 0 : i32
    %c0_i32_0 = arith.constant 0 : i32
    %c0_i32_1 = arith.constant 0 : i32
    return %c0_i32, %c0_i32_0 : i32, i32
  }
  func.func @transform_10(%arg0: i32) -> (i32, i32) {
    %c0_i32 = arith.constant 0 : i32
    %c0_i32_0 = arith.constant 0 : i32
    %c0_i32_1 = arith.constant 0 : i32
    return %c0_i32, %c0_i32_0 : i32, i32
  }
  func.func @transform_11(%arg0: i32) -> (i32, i32) {
    %c0_i32 = arith.constant 0 : i32
    %c0_i32_0 = arith.constant 0 : i32
    %c0_i32_1 = arith.constant 0 : i32
    return %c0_i32, %c0_i32_0 : i32, i32
  }
  func.func @transform_12(%arg0: i32) -> (i32, i32) {
    %c0_i32 = arith.constant 0 : i32
    %c0_i32_0 = arith.constant 0 : i32
    %c0_i32_1 = arith.constant 0 : i32
    return %c0_i32, %c0_i32_0 : i32, i32
  }
  func.func @transform_13(%arg0: i32) -> (i32, i32, i32) {
    %c0_i32 = arith.constant 0 : i32
    %c0_i32_0 = arith.constant 0 : i32
    %c0_i32_1 = arith.constant 0 : i32
    return %arg0, %c0_i32, %c0_i32_0 : i32, i32, i32
  }
}

</mosaic_0001>

<bundles_post_ra>
// kernel: vitamon_phase2_pallas.1
= control target key start
LH: loop header
LB: loop body
LE: loop exit
PB: predicated region body
PF: predicated region fallthrough
CT: control target
= control target key end

     0   :  { %s6452_s0 = inlined_call_operand.vmem [shape: f32[2,1600,200], index: 0, kind: input, shape index: {}]   ;;  %s6453_s1 = inlined_call_operand.vmem [shape: f32[3,32,24], index: 1, kind: input, shape index: {}]   ;;  %s6454_s2 = inlined_call_operand.vmem [shape: f32[32,1], index: 2, kind: input, shape index: {}]   ;;  %s6455_s3 = inlined_call_operand.vmem [shape: f32[3,32,96], index: 3, kind: input, shape index: {}]   ;;  %s6456_s4 = inlined_call_operand.vmem [shape: f32[32,1], index: 4, kind: input, shape index: {}]   ;;  %s6457_s5 = inlined_call_operand.vmem [shape: f32[3,64,96], index: 5, kind: input, shape index: {}]   ;;  %s6458_s6 = inlined_call_operand.vmem [shape: f32[64,1], index: 6, kind: input, shape index: {}]   ;;  %s6459_s7 = inlined_call_operand.vmem [shape: f32[9,64,25], index: 7, kind: input, shape index: {}]   ;;  %s6460_s8 = inlined_call_operand.vmem [shape: f32[1,25], index: 8, kind: input, shape index: {}]   ;;  %s6461_s9 = inlined_call_operand.vmem [shape: f32[25,25], index: 9, kind: input, shape index: {}]   ;;  %s6462_s10 = inlined_call_operand.vmem [shape: f32[1,25], index: 10, kind: input, shape index: {}]   ;;  %s6463_s11 = inlined_call_operand.vmem [shape: f32[25,25], index: 11, kind: input, shape index: {}]   ;;  %s6464_s12 = inlined_call_operand.vmem [shape: f32[1,25], index: 12, kind: input, shape index: {}]   ;;  %s6465_s13 = inlined_call_operand.hbm [shape: f32[2,1,25], index: 13, kind: output, shape index: {}]  }
   0x1   :  { %6469 = sst [smem:[#allocation25_spill]] %s6452_s0 }
   0x2   :  { %18 = vsyncpa [#allocation5], 0 }
   0x3   :  { %20 = vsyncpa [#allocation5 + $0x1], 0  ;;  %s4460_s25 = smov 0   ;;  %s4462_s26 = smov 0  }
   0x4   :  { %s4464_s27 = smov 0   ;;  %s4466_s28 = smov 0  }
   0x5 LB: > { %6470 = sst [smem:[#allocation7_spill]] %s4254_s27  ;;  %s4481_s29 = sadd.s32 4294967295, %s4258_s28   ;;  %s4258_s28 = sphi %s4466_s28, %s6563_s28   ;;  %s4254_s27 = sphi %s4464_s27, %s6560_s27   ;;  %s4250_s26 = sphi %s4462_s26, %s6562_s26   ;;  %s4246_s25 = sphi %s4460_s25, %s6561_s25  }
   0x6   : > { %s3504_s30 = sadd.s32 4294967294, %s4258_s28   ;;  %s4485_s14 = sadd.s32 1, %s4258_s28  }
   0x7   : > { %s311_s15 = sadd.s32 1, %s4254_s27  ;;  %s308_s16 = ssub.s32 %s4258_s28, %s4485_s14 }
   0x8   : > { %p321_p0 = scmp.ne.s32.totalorder %s4254_s27, %s4250_s26  ;;  %p309_p1 = scmp.eq.s32.totalorder %s308_s16, 0 }
   0x9   : > { %p322_p2 = scmp.eq.s32.totalorder %s4481_s29, 1  ;;  %p327_p3 = scmp.ne.s32.totalorder %s4250_s26, %s4246_s25 }
   0xa   : > { %p328_p4 = scmp.eq.s32.totalorder %s3504_s30, 1  ;;  %p3507_p7 = scmp.ge.s32.totalorder %s4258_s28, 1 }
   0xb   : > { %s4496_s17 = scalar_select %p309_p1, %s4254_s27, %s311_s15  }
   0xc   : > { %p4498_p5 = por %p322_p2, %p321_p0  ;;  %p4502_p6 = por %p328_p4, %p327_p3 }
   0xd   : > { %6471 = sst [smem:[#allocation8_spill]] %s4496_s17  ;;  %p390_p8 = scmp.lt.s32.totalorder %s4258_s28, 3 }
   0xf   : > { %p391_p9 = pnand %p3507_p7, %p390_p8 }
  0x10   : > { %s6466_s20 = sand.u32 (!%p391_p9), 1, %s4250_s26   ;;  %p433_p10 = scmp.lt.s32.totalorder (!%p391_p9), %s4481_s29, 1 }
  0x11   : > { %394 = sbr.rel (%p391_p9) target bundleno = 2397 (0x95d), region = 72  ;;  %s6474_s0 = sld [smem:[#allocation25_spill]] (!%p391_p9) }
  0x12   : > { %s4518_s15 = scalar_lea.vmem (!%p391_p9), [#allocation4], %s6466_s20  ;;  %s4520_s16 = smov (!%p391_p9), 0  }
  0x16   : > { %s434_s21 = scalar_select %p433_p10, %s4481_s29, 1 }
  0x18   : > { %s3765_s22 = smul.u32 3200, %s434_s21 }
  0x1a   : > { %s4514_s30 = scalar_lea.vmem %s6474_s0, %s3765_s22 }
  0x1b LB: >> { %v4368_v0 = vmov 0.0   ;;  %s3509_s21 = sshll.u32 %s4262_s16, 3  ;;  %v4369_v1 = vmov 0   ;;  %v865_v2 = vld [vmem:[%s6454_s2 + $0x8] sm:$0xff]  ;;  %v864_v3 = vld [vmem:[%s6454_s2] sm:$0xff]  ;;  %vm460_vm0 = vcmask 195584   ;;  %s4262_s16 = sphi %s4520_s16, %s443_s16  }
  0x1c   : >> { %537 = vmatprep.mubr.f32.mxu0 %v4368_v0  ;;  %549 = vmatprep.mubr.f32.mxu1 %v4368_v0  ;;  %s445_s22 = sshra.s32 %s3509_s21, 3  ;;  %v456_v10 = vld [vmem:[%s6453_s1] sm:$0xff]  ;;  %v458_v11 = vld [vmem:[%s6453_s1 + $0x10] sm:$0xff]  ;;  %v457_v12 = vld [vmem:[%s6453_s1 + $0x8] sm:$0xff]  ;;  %vm692_vm1 = vcmask 1039360   ;;  %vm843_vm2 = vcmask 1031168  }
  0x1d   : >> { %4043 = vset.pattern.permute.xlu1 %v4369_v1  ;;  %4042 = vset.pattern.permute.xlu0 %v4369_v1  ;;  %s3674_s23 = sshll.u32 %s445_s22, 4  ;;  %v459_v13 = vld [vmem:[%s6453_s1 + $0x18] sm:$0xff]  ;;  %v3516_v14 = vld [vmem:[%s6453_s1 + $0x20] sm:$0xff]  ;;  %v866_v16 = vld [vmem:[%s6454_s2 + $0x10] sm:$0xff]  ;;  %s4371_s22 = smov 126   ;;  %vm911_vm3 = vcmask 572416  }
  0x1e   : >> { %s449_s27 = scalar_lea.vmem %s4514_s30, %s3674_s23  ;;  %875 = vperm.xlu1 %4043, %v865_v2   ;;  %870 = vperm.xlu0 %4042, %v864_v3   ;;  %v3524_v15 = vld [vmem:[%s6453_s1 + $0x40] sm:$0xff]  ;;  %v867_v17 = vld [vmem:[%s6454_s2 + $0x18] sm:$0xff]  ;;  %v3517_v18 = vld [vmem:[%s6453_s1 + $0x28] sm:$0xff]  ;;  %s3532_s23 = sshll.u32 %s4262_s16, 5 }
  0x1f   : >> { %v455_v4 = vld [vmem:[%s449_s27 + $0x28] sm:$0xff]  ;;  %v454_v5 = vld [vmem:[%s449_s27 + $0x20] sm:$0xff]  ;;  %v453_v6 = vld [vmem:[%s449_s27 + $0x18] sm:$0xff]  ;;  %s905_s24 = sshra.s32 %s3532_s23, 3  ;;  %s443_s16 = sadd.s32 1, %s4262_s16  }
  0x20   : >> { %499 = vmatprep.subr.mxu0 %v455_v4  ;;  %3711 = vmatprep.subr.mxu1 %v455_v4  ;;  %v452_v7 = vld [vmem:[%s449_s27 + $0x10] sm:$0xff]  ;;  %v451_v8 = vld [vmem:[%s449_s27 + $0x8] sm:$0xff]  ;;  %v450_v9 = vld [vmem:[%s449_s27] sm:$0xff]  ;;  %s4370_s27 = smov 127   ;;  %s3675_s20 = sshll.u32 %s905_s24, 4 }
  0x21   : >> { %500 = vmatpush1.msra.mxu0 %v454_v5  ;;  %3714 = vmatpush1.msra.mxu1 %v454_v5  ;;  %v3525_v19 = vld [vmem:[%s6453_s1 + $0x48] sm:$0xff]  ;;  %v3518_v20 = vld [vmem:[%s6453_s1 + $0x30] sm:$0xff]  ;;  %v3519_v22 = vld [vmem:[%s6453_s1 + $0x38] sm:$0xff]  ;;  %s4619_s0 = scalar_lea.vmem [#allocation2], %s3675_s20  ;;  %p440_p11 = scmp.ge.s32.totalorder %s443_s16, 198  }
  0x22   : >> { %501 = vmatprep.subr.mxu0 %v453_v6  ;;  %3712 = vmatprep.subr.mxu1 %v453_v6  ;;  %v3526_v21 = vld [vmem:[%s6453_s1 + $0x50] sm:$0xff]  ;;  %v3527_v23 = vld [vmem:[%s6453_s1 + $0x58] sm:$0xff]  ;;  %s4647_s17 = smov (%p440_p11), 0  }
  0x23   : >> { %502 = vmatpush1.msra.mxu0 %v452_v7  ;;  %3715 = vmatpush1.msra.mxu1 %v452_v7 }
  0x24   : >> { %503 = vmatprep.subr.mxu0 %v451_v8  ;;  %3713 = vmatprep.subr.mxu1 %v451_v8 }
  0x25   : >> { %504 = vmatpush1.msra.mxu0 %v450_v9  ;;  %3716 = vmatpush1.msra.mxu1 %v450_v9 }
  0x26   : >> { %3512 = vmatmul.mubr.msk.f32.vlgmr.msra.gmra.mxu0 %vm460_vm0, %v456_v10  ;;  %3514 = vmatmul.mubr.msk.f32.vlgmr.msra.gmra.mxu1 %vm460_vm0, %v458_v11 }
  0x27   : >> { %605 = vmatprep.subr.mxu1 %v455_v4  ;;  %756 = vmatprep.subr.mxu0 %v455_v4 }
  0x28   : >> { %606 = vmatpush1.msra.mxu1 %v454_v5  ;;  %757 = vmatpush1.msra.mxu0 %v454_v5 }
  0x29   : >> { %543 = vmatprep.mubr.f32.mxu0 %v4368_v0  ;;  %555 = vmatprep.mubr.f32.mxu1 %v4368_v0 }
  0x2a   : >> { %607 = vmatprep.subr.mxu1 %v453_v6  ;;  %758 = vmatprep.subr.mxu0 %v453_v6 }
  0x2b   : >> { %3513 = vmatmul.mubr.msk.f32.gmra.mxu0 %vm460_vm0, %v457_v12  ;;  %3515 = vmatmul.mubr.msk.f32.gmra.mxu1 %vm460_vm0, %v459_v13 }
  0x2c   : >> { %608 = vmatpush1.msra.mxu1 %v452_v7  ;;  %759 = vmatpush1.msra.mxu0 %v452_v7 }
  0x2d   : >> { %609 = vmatprep.subr.mxu1 %v451_v8  ;;  %760 = vmatprep.subr.mxu0 %v451_v8 }
  0x2e   : >> { %610 = vmatpush1.msra.mxu1 %v450_v9  ;;  %643 = vmatprep.mubr.f32.mxu1 %v4368_v0 }
  0x2f   : >> { %761 = vmatpush1.msra.mxu0 %v450_v9  ;;  %794 = vmatprep.mubr.f32.mxu0 %v4368_v0 }
  0x30   : >> { %3520 = vmatmul.mubr.msk.f32.vlgmr.msra.gmra.mxu1 %vm460_vm0, %v3516_v14  ;;  %3528 = vmatmul.mubr.msk.f32.vlgmr.msra.gmra.mxu0 %vm460_vm0, %v3524_v15 }
  0x31   : >> { %649 = vmatprep.mubr.f32.mxu1 %v4368_v0  ;;  %800 = vmatprep.mubr.f32.mxu0 %v4368_v0 }
  0x32   : >> { %880 = vperm.xlu1 %4043, %v866_v16   ;;  %885 = vperm.xlu0 %4042, %v867_v17  }
  0x34   : >> { %3521 = vmatmul.mubr.msk.f32.gmra.mxu1 %vm460_vm0, %v3517_v18  ;;  %3529 = vmatmul.mubr.msk.f32.gmra.mxu0 %vm460_vm0, %v3525_v19 }
  0x35   : >> { %655 = vmatprep.mubr.f32.mxu1 %v4368_v0  ;;  %806 = vmatprep.mubr.f32.mxu0 %v4368_v0 }
  0x38   : >> { %3522 = vmatmul.mubr.msk.f32.gmra.mxu1 %vm460_vm0, %v3518_v20  ;;  %3530 = vmatmul.mubr.msk.f32.gmra.mxu0 %vm460_vm0, %v3526_v21 }
  0x39   : >> { %661 = vmatprep.mubr.f32.mxu1 %v4368_v0  ;;  %812 = vmatprep.mubr.f32.mxu0 %v4368_v0 }
  0x3c   : >> { %3523 = vmatmul.mubr.msk.f32.gmra.mxu1 %vm460_vm0, %v3519_v22  ;;  %3531 = vmatmul.mubr.msk.f32.gmra.mxu0 %vm460_vm0, %v3527_v23 }
  0x99   : >> { %v876_v48 = vpop.permute.xlu1 %875  ;;  %v871_v49 = vpop.permute.xlu0 %870 }
  0xad   : >> { %v881_v50 = vpop.permute.xlu1 %880  ;;  %v4611_v51 = vpop.permute.xlu0 %885 }
  0xe6   : >> { %v539_v24 = vpop.f32.mrf.mxu0  ;;  %v4599_v25 = vpop.f32.mrf.mxu1 }
  0xe8   : >> { %v541_v26 = vpop.f32.mrf.mxu0  ;;  %v4601_v27 = vpop.f32.mrf.mxu1 }
  0xeb   : >> { %v4603_v28 = vpop.f32.mrf.mxu0  ;;  %v4605_v29 = vpop.f32.mrf.mxu1 }
  0xed   : >> { %v4607_v30 = vpop.f32.mrf.mxu0  ;;  %v4609_v31 = vpop.f32.mrf.mxu1 }
  0xf0   : >> { %v645_v32 = vpop.f32.mrf.mxu1  ;;  %v796_v33 = vpop.f32.mrf.mxu0 }
  0xf1   : >> { %676 = vrot.lane.b32.xlu0 %v645_v32, %s4370_s27  ;;  %827 = vrot.lane.b32.xlu1 %v796_v33, %s4371_s22 }
  0xf2   : >> { %v647_v34 = vpop.f32.mrf.mxu1  ;;  %v798_v36 = vpop.f32.mrf.mxu0 }
  0xf4   : >> { %v651_v35 = vpop.f32.mrf.mxu1  ;;  %v802_v37 = vpop.f32.mrf.mxu0 }
  0xf5   : >> { %678 = vrot.lane.b32.xlu0 %v647_v34, %s4370_s27  ;;  %680 = vrot.lane.b32.xlu1 %v651_v35, %s4370_s27 }
  0xf6   : >> { %v653_v38 = vpop.f32.mrf.mxu1  ;;  %v804_v39 = vpop.f32.mrf.mxu0 }
  0xf8   : >> { %v657_v40 = vpop.f32.mrf.mxu1  ;;  %v808_v41 = vpop.f32.mrf.mxu0 }
  0xf9   : >> { %829 = vrot.lane.b32.xlu0 %v798_v36, %s4371_s22  ;;  %831 = vrot.lane.b32.xlu1 %v802_v37, %s4371_s22 }
  0xfa   : >> { %v659_v42 = vpop.f32.mrf.mxu1  ;;  %v810_v43 = vpop.f32.mrf.mxu0 }
  0xfc   : >> { %v663_v44 = vpop.f32.mrf.mxu1  ;;  %v814_v46 = vpop.f32.mrf.mxu0 }
  0xfd   : >> { %682 = vrot.lane.b32.xlu1 %v653_v38, %s4370_s27  ;;  %833 = vrot.lane.b32.xlu0 %v804_v39, %s4371_s22 }
  0xfe   : >> { %v665_v45 = vpop.f32.mrf.mxu1  ;;  %v816_v47 = vpop.f32.mrf.mxu0 }
 0x101   : >> { %684 = vrot.lane.b32.xlu0 %v657_v40, %s4370_s27  ;;  %835 = vrot.lane.b32.xlu1 %v808_v41, %s4371_s22 }
 0x105   : >> { %686 = vrot.lane.b32.xlu1 %v659_v42, %s4370_s27  ;;  %837 = vrot.lane.b32.xlu0 %v810_v43, %s4371_s22 }
 0x109   : >> { %690 = vrot.lane.b32.xlu1 %v665_v45, %s4370_s27  ;;  %688 = vrot.lane.b32.xlu0 %v663_v44, %s4370_s27 }
 0x10d   : >> { %839 = vrot.lane.b32.xlu1 %v814_v46, %s4371_s22  ;;  %841 = vrot.lane.b32.xlu0 %v816_v47, %s4371_s22 }
 0x163   : >> { %v677_v52 = vpop.permute.xlu0 %676  ;;  %v828_v53 = vpop.permute.xlu1 %827 }
 0x167   : >> { %v679_v54 = vpop.permute.xlu0 %678  ;;  %v681_v55 = vpop.permute.xlu1 %680 }
 0x168   : >> { %v693_v56 = vsel %vm692_vm1, %v677_v52, %v679_v54  ;;  %v706_v57 = vadd.f32 %v679_v54, %v541_v26 }
 0x169   : >> { %v705_v58 = vadd.f32 %v693_v56, %v539_v24 }
 0x16b   : >> { %v830_v59 = vpop.permute.xlu0 %829  ;;  %v832_v60 = vpop.permute.xlu1 %831 }
 0x16c   : >> { %v844_v61 = vsel %vm843_vm2, %v828_v53, %v830_v59  ;;  %v857_v62 = vadd.f32 %v830_v59, %v706_v57 }
 0x16d   : >> { %v856_v63 = vadd.f32 %v844_v61, %v705_v58 }
 0x16e   : >> { %v889_v0 = vadd.f32 %v871_v49, %v857_v62 }
 0x16f   : >> { %v888_v1 = vadd.f32 %v871_v49, %v856_v63  ;;  %v683_v2 = vpop.permute.xlu1 %682  ;;  %v834_v3 = vpop.permute.xlu0 %833 }
 0x170   : >> { %v897_v4 = vmax.f32 %v889_v0, 0.0  ;;  %v694_v5 = vsel %vm692_vm1, %v681_v55, %v683_v2  ;;  %v708_v6 = vadd.f32 %v683_v2, %v4607_v30  ;;  %v845_v9 = vsel %vm843_vm2, %v832_v60, %v834_v3 }
 0x171   : >> { %v896_v7 = vmax.f32 %v888_v1, 0.0  ;;  %v707_v8 = vadd.f32 %v694_v5, %v4603_v28 }
 0x172   : >> { %912 = vst.msk [vmem:[%s4619_s0 + $0x8] sm:$0xff] %vm911_vm3, %v897_v4  ;;  %v859_v10 = vadd.f32 %v834_v3, %v708_v6 }
 0x173   : >> { %910 = vst [vmem:[%s4619_s0] sm:$0xff] %v896_v7  ;;  %v858_v11 = vadd.f32 %v845_v9, %v707_v8  ;;  %v685_v12 = vpop.permute.xlu0 %684  ;;  %v836_v13 = vpop.permute.xlu1 %835 }
 0x174   : >> { %v891_v14 = vadd.f32 %v876_v48, %v859_v10 }
 0x175   : >> { %v890_v15 = vadd.f32 %v876_v48, %v858_v11 }
 0x176   : >> { %v899_v16 = vmax.f32 %v891_v14, 0.0 }
 0x177   : >> { %v898_v17 = vmax.f32 %v890_v15, 0.0  ;;  %v687_v18 = vpop.permute.xlu1 %686  ;;  %v838_v19 = vpop.permute.xlu0 %837 }
 0x178   : >> { %914 = vst.msk [vmem:[%s4619_s0 + $0x18] sm:$0xff] %vm911_vm3, %v899_v16  ;;  %v695_v20 = vsel %vm692_vm1, %v685_v12, %v687_v18  ;;  %v710_v21 = vadd.f32 %v687_v18, %v4601_v27  ;;  %v846_v23 = vsel %vm843_vm2, %v836_v13, %v838_v19 }
 0x179   : >> { %913 = vst [vmem:[%s4619_s0 + $0x10] sm:$0xff] %v898_v17  ;;  %v709_v22 = vadd.f32 %v695_v20, %v4599_v25 }
 0x17a   : >> { %v861_v24 = vadd.f32 %v838_v19, %v710_v21 }
 0x17b   : >> { %v860_v26 = vadd.f32 %v846_v23, %v709_v22  ;;  %v691_v28 = vpop.permute.xlu1 %690  ;;  %v689_v30 = vpop.permute.xlu0 %688 }
 0x17c   : >> { %v893_v32 = vadd.f32 %v881_v50, %v861_v24  ;;  %v696_v33 = vsel %vm692_vm1, %v689_v30, %v691_v28  ;;  %v712_v27 = vadd.f32 %v691_v28, %v4609_v31 }
 0x17d   : >> { %v892_v34 = vadd.f32 %v881_v50, %v860_v26  ;;  %v711_v37 = vadd.f32 %v696_v33, %v4605_v29 }
 0x17e   : >> { %v901_v35 = vmax.f32 %v893_v32, 0.0 }
 0x17f   : >> { %v900_v36 = vmax.f32 %v892_v34, 0.0  ;;  %v840_v25 = vpop.permute.xlu1 %839  ;;  %v842_v38 = vpop.permute.xlu0 %841 }
 0x180   : >> { %916 = vst.msk [vmem:[%s4619_s0 + $0x28] sm:$0xff] %vm911_vm3, %v901_v35  ;;  %v847_v39 = vsel %vm843_vm2, %v840_v25, %v842_v38  ;;  %v863_v40 = vadd.f32 %v842_v38, %v712_v27 }
 0x181   : >> { %915 = vst [vmem:[%s4619_s0 + $0x20] sm:$0xff] %v900_v36  ;;  %v862_v41 = vadd.f32 %v847_v39, %v711_v37 }
 0x182   : >> { %v895_v42 = vadd.f32 %v4611_v51, %v863_v40 }
 0x183   : >> { %v894_v43 = vadd.f32 %v4611_v51, %v862_v41  ;;  %442 = sbr.rel (!%p440_p11) target bundleno = 27 (0x1b), region = 147 }
 0x184   : >> { %v903_v44 = vmax.f32 %v895_v42, 0.0 }
 0x185   : >> { %v902_v45 = vmax.f32 %v894_v43, 0.0 }
 0x186   : >> { %918 = vst.msk [vmem:[%s4619_s0 + $0x38] sm:$0xff] %vm911_vm3, %v903_v44 }
 0x187   : >> { %917 = vst [vmem:[%s4619_s0 + $0x30] sm:$0xff] %v902_v45 }
 0x188 LB: >> { %v4372_v29 = vmov 0.0   ;;  %s3535_s21 = sshll.u32 %s4266_s17, 5  ;;  %v4373_v31 = vmov 0   ;;  %v1363_v46 = vld [vmem:[%s6456_s4] sm:$0xff]  ;;  %v1364_v47 = vld [vmem:[%s6456_s4 + $0x8] sm:$0xff]  ;;  %vm959_vm4 = vcmask 785408   ;;  %s4266_s17 = sphi %s4647_s17, %s924_s17  }
 0x189   : >> { %1036 = vmatprep.mubr.f32.mxu0 %v4372_v29  ;;  %1142 = vmatprep.mubr.f32.mxu1 %v4372_v29  ;;  %s4655_s27 = sshra.s32 %s3535_s21, 3  ;;  %v955_v8 = vld [vmem:[%s6455_s3] sm:$0xff]  ;;  %v3543_v10 = vld [vmem:[%s6455_s3 + $0x28] sm:$0xff]  ;;  %v3544_v12 = vld [vmem:[%s6455_s3 + $0x30] sm:$0xff]  ;;  %vm1406_vm5 = vcmask 556032   ;;  %s924_s17 = sadd.s32 1, %s4266_s17  }
 0x18a   : >> { %4044 = vset.pattern.permute.xlu0 %v4373_v31  ;;  %4045 = vset.pattern.permute.xlu1 %v4373_v31  ;;  %s6468_s30 = sshll.u32 %s4655_s27, 4  ;;  %v3542_v9 = vld [vmem:[%s6455_s3 + $0x20] sm:$0xff]  ;;  %v956_v11 = vld [vmem:[%s6455_s3 + $0x8] sm:$0xff]  ;;  %v957_v13 = vld [vmem:[%s6455_s3 + $0x10] sm:$0xff]  ;;  %s6475_s0 = sshll.u32 %s4655_s27, 4 }
 0x18b   : >> { %1369 = vperm.xlu0 %4044, %v1363_v46   ;;  %1374 = vperm.xlu1 %4045, %v1364_v47   ;;  %s4666_s20 = scalar_lea.vmem [#allocation2], %s6468_s30  ;;  %v3545_v14 = vld [vmem:[%s6455_s3 + $0x38] sm:$0xff]  ;;  %v3550_v16 = vld [vmem:[%s6455_s3 + $0x40] sm:$0xff]  ;;  %v3552_v17 = vld [vmem:[%s6455_s3 + $0x50] sm:$0xff]  ;;  %s4375_s30 = smov 126  }
 0x18c   : >> { %v958_v15 = vld [vmem:[%s6455_s3 + $0x18] sm:$0xff]  ;;  %v1365_v19 = vld [vmem:[%s6456_s4 + $0x10] sm:$0xff]  ;;  %v3551_v20 = vld [vmem:[%s6455_s3 + $0x48] sm:$0xff]  ;;  %s4916_s21 = scalar_lea.vmem [#allocation3], %s6475_s0  ;;  %p921_p12 = scmp.ge.s32.totalorder %s924_s17, 196  }
 0x18d   : >> { %v1366_v18 = vld [vmem:[%s6456_s4 + $0x18] sm:$0xff]  ;;  %s4987_s17 = smov (%p921_p12), 0  }
 0x18e   : >> { %v4669_v48 = vld [vmem:[%s4666_s20 + $0xb8] sm:$0xff]  ;;  %v4672_v49 = vld [vmem:[%s4666_s20 + $0xb0] sm:$0xff]  ;;  %v4675_v50 = vld [vmem:[%s4666_s20 + $0xa8] sm:$0xff] }
 0x18f   : >> { %980 = vmatprep.subr.mxu0 %v4669_v48  ;;  %1086 = vmatprep.subr.mxu1 %v4669_v48  ;;  %v4680_v51 = vld [vmem:[%s4666_s20 + $0xa0] sm:$0xff]  ;;  %v4685_v52 = vld [vmem:[%s4666_s20 + $0x98] sm:$0xff]  ;;  %v4690_v53 = vld [vmem:[%s4666_s20 + $0x90] sm:$0xff] }
 0x190   : >> { %981 = vmatpush1.msra.mxu0 %v4672_v49  ;;  %1087 = vmatpush1.msra.mxu1 %v4672_v49  ;;  %v4695_v54 = vld [vmem:[%s4666_s20 + $0x88] sm:$0xff]  ;;  %v4700_v55 = vld [vmem:[%s4666_s20 + $0x80] sm:$0xff]  ;;  %v4705_v56 = vld [vmem:[%s4666_s20 + $0x78] sm:$0xff] }
 0x191   : >> { %982 = vmatprep.subr.mxu0 %v4675_v50  ;;  %1088 = vmatprep.subr.mxu1 %v4675_v50  ;;  %v4710_v57 = vld [vmem:[%s4666_s20 + $0x70] sm:$0xff]  ;;  %v4715_v58 = vld [vmem:[%s4666_s20 + $0x68] sm:$0xff]  ;;  %v4720_v59 = vld [vmem:[%s4666_s20 + $0x60] sm:$0xff] }
 0x192   : >> { %983 = vmatpush1.msra.mxu0 %v4680_v51  ;;  %1089 = vmatpush1.msra.mxu1 %v4680_v51  ;;  %v4725_v60 = vld [vmem:[%s4666_s20 + $0x58] sm:$0xff]  ;;  %v4730_v61 = vld [vmem:[%s4666_s20 + $0x50] sm:$0xff]  ;;  %v4735_v62 = vld [vmem:[%s4666_s20 + $0x48] sm:$0xff] }
 0x193   : >> { %984 = vmatprep.subr.mxu0 %v4685_v52  ;;  %1090 = vmatprep.subr.mxu1 %v4685_v52  ;;  %v4740_v63 = vld [vmem:[%s4666_s20 + $0x40] sm:$0xff]  ;;  %v4745_v0 = vld [vmem:[%s4666_s20 + $0x38] sm:$0xff]  ;;  %v4750_v1 = vld [vmem:[%s4666_s20 + $0x30] sm:$0xff] }
 0x194   : >> { %985 = vmatpush1.msra.mxu0 %v4690_v53  ;;  %1091 = vmatpush1.msra.mxu1 %v4690_v53  ;;  %v4755_v2 = vld [vmem:[%s4666_s20 + $0x28] sm:$0xff]  ;;  %v4760_v3 = vld [vmem:[%s4666_s20 + $0x20] sm:$0xff]  ;;  %v4765_v4 = vld [vmem:[%s4666_s20 + $0x18] sm:$0xff] }
 0x195   : >> { %986 = vmatprep.subr.mxu0 %v4695_v54  ;;  %1092 = vmatprep.subr.mxu1 %v4695_v54  ;;  %v4770_v5 = vld [vmem:[%s4666_s20 + $0x10] sm:$0xff]  ;;  %v4775_v6 = vld [vmem:[%s4666_s20 + $0x8] sm:$0xff]  ;;  %v4780_v7 = vld [vmem:[%s4666_s20] sm:$0xff]  ;;  %s4374_s20 = smov 127  }
 0x196   : >> { %987 = vmatpush1.msra.mxu0 %v4700_v55  ;;  %1093 = vmatpush1.msra.mxu1 %v4700_v55  ;;  %v3553_v21 = vld [vmem:[%s6455_s3 + $0x58] sm:$0xff] }
 0x197   : >> { %988 = vmatprep.subr.mxu0 %v4705_v56  ;;  %1094 = vmatprep.subr.mxu1 %v4705_v56 }
 0x198   : >> { %989 = vmatpush1.msra.mxu0 %v4710_v57  ;;  %1095 = vmatpush1.msra.mxu1 %v4710_v57 }
 0x199   : >> { %990 = vmatprep.subr.mxu0 %v4715_v58  ;;  %1096 = vmatprep.subr.mxu1 %v4715_v58 }
 0x19a   : >> { %991 = vmatpush1.msra.mxu0 %v4720_v59  ;;  %1097 = vmatpush1.msra.mxu1 %v4720_v59 }
 0x19b   : >> { %992 = vmatprep.subr.mxu0 %v4725_v60  ;;  %1098 = vmatprep.subr.mxu1 %v4725_v60 }
 0x19c   : >> { %993 = vmatpush1.msra.mxu0 %v4730_v61  ;;  %1099 = vmatpush1.msra.mxu1 %v4730_v61 }
 0x19d   : >> { %994 = vmatprep.subr.mxu0 %v4735_v62  ;;  %1100 = vmatprep.subr.mxu1 %v4735_v62 }
 0x19e   : >> { %995 = vmatpush1.msra.mxu0 %v4740_v63  ;;  %1101 = vmatpush1.msra.mxu1 %v4740_v63 }
 0x19f   : >> { %996 = vmatprep.subr.mxu0 %v4745_v0  ;;  %1102 = vmatprep.subr.mxu1 %v4745_v0 }
 0x1a0   : >> { %997 = vmatpush1.msra.mxu0 %v4750_v1  ;;  %1103 = vmatpush1.msra.mxu1 %v4750_v1 }
 0x1a1   : >> { %998 = vmatprep.subr.mxu0 %v4755_v2  ;;  %1104 = vmatprep.subr.mxu1 %v4755_v2 }
 0x1a2   : >> { %999 = vmatpush1.msra.mxu0 %v4760_v3  ;;  %1105 = vmatpush1.msra.mxu1 %v4760_v3 }
 0x1a3   : >> { %1000 = vmatprep.subr.mxu0 %v4765_v4  ;;  %1106 = vmatprep.subr.mxu1 %v4765_v4 }
 0x1a4   : >> { %1001 = vmatpush1.msra.mxu0 %v4770_v5  ;;  %1107 = vmatpush1.msra.mxu1 %v4770_v5 }
 0x1a5   : >> { %1002 = vmatprep.subr.mxu0 %v4775_v6  ;;  %1108 = vmatprep.subr.mxu1 %v4775_v6 }
 0x1a6   : >> { %1003 = vmatpush1.msra.mxu0 %v4780_v7  ;;  %1109 = vmatpush1.msra.mxu1 %v4780_v7 }
 0x1a7   : >> { %3538 = vmatmul.mubr.msk.f32.vlgmr.msra.gmra.mxu0 %vm959_vm4, %v955_v8  ;;  %3546 = vmatmul.mubr.msk.f32.vlgmr.msra.gmra.mxu1 %vm959_vm4, %v3542_v9 }
 0x1a8   : >> { %1237 = vmatprep.subr.mxu0 %v4669_v48  ;;  %3717 = vmatprep.subr.mxu1 %v4669_v48 }
 0x1a9   : >> { %1238 = vmatpush1.msra.mxu0 %v4672_v49  ;;  %1148 = vmatprep.mubr.f32.mxu1 %v4372_v29 }
 0x1aa   : >> { %1239 = vmatprep.subr.mxu0 %v4675_v50  ;;  %3729 = vmatpush1.msra.mxu1 %v4672_v49 }
 0x1ab   : >> { %1240 = vmatpush1.msra.mxu0 %v4680_v51  ;;  %3547 = vmatmul.mubr.msk.f32.gmra.mxu1 %vm959_vm4, %v3543_v10 }
 0x1ac   : >> { %3718 = vmatprep.subr.mxu1 %v4675_v50  ;;  %1241 = vmatprep.subr.mxu0 %v4685_v52 }
 0x1ad   : >> { %3730 = vmatpush1.msra.mxu1 %v4680_v51  ;;  %1242 = vmatpush1.msra.mxu0 %v4690_v53 }
 0x1ae   : >> { %3719 = vmatprep.subr.mxu1 %v4685_v52  ;;  %1243 = vmatprep.subr.mxu0 %v4695_v54 }
 0x1af   : >> { %3731 = vmatpush1.msra.mxu1 %v4690_v53  ;;  %1244 = vmatpush1.msra.mxu0 %v4700_v55 }
 0x1b0   : >> { %3720 = vmatprep.subr.mxu1 %v4695_v54  ;;  %1245 = vmatprep.subr.mxu0 %v4705_v56 }
 0x1b1   : >> { %1042 = vmatprep.mubr.f32.mxu0 %v4372_v29  ;;  %1154 = vmatprep.mubr.f32.mxu1 %v4372_v29 }
 0x1b2   : >> { %3732 = vmatpush1.msra.mxu1 %v4700_v55  ;;  %1246 = vmatpush1.msra.mxu0 %v4710_v57 }
 0x1b3   : >> { %3539 = vmatmul.mubr.msk.f32.gmra.mxu0 %vm959_vm4, %v956_v11  ;;  %3548 = vmatmul.mubr.msk.f32.gmra.mxu1 %vm959_vm4, %v3544_v12 }
 0x1b4   : >> { %3721 = vmatprep.subr.mxu1 %v4705_v56  ;;  %1247 = vmatprep.subr.mxu0 %v4715_v58 }
 0x1b5   : >> { %3733 = vmatpush1.msra.mxu1 %v4710_v57  ;;  %1248 = vmatpush1.msra.mxu0 %v4720_v59 }
 0x1b6   : >> { %3722 = vmatprep.subr.mxu1 %v4715_v58  ;;  %1249 = vmatprep.subr.mxu0 %v4725_v60 }
 0x1b7   : >> { %1048 = vmatprep.mubr.f32.mxu0 %v4372_v29  ;;  %1160 = vmatprep.mubr.f32.mxu1 %v4372_v29 }
 0x1b8   : >> { %3734 = vmatpush1.msra.mxu1 %v4720_v59  ;;  %1250 = vmatpush1.msra.mxu0 %v4730_v61 }
 0x1b9   : >> { %3540 = vmatmul.mubr.msk.f32.gmra.mxu0 %vm959_vm4, %v957_v13  ;;  %3549 = vmatmul.mubr.msk.f32.gmra.mxu1 %vm959_vm4, %v3545_v14 }
 0x1ba   : >> { %3723 = vmatprep.subr.mxu1 %v4725_v60  ;;  %1251 = vmatprep.subr.mxu0 %v4735_v62 }
 0x1bb   : >> { %3735 = vmatpush1.msra.mxu1 %v4730_v61  ;;  %1252 = vmatpush1.msra.mxu0 %v4740_v63 }
 0x1bc   : >> { %3724 = vmatprep.subr.mxu1 %v4735_v62  ;;  %1253 = vmatprep.subr.mxu0 %v4745_v0 }
 0x1bd   : >> { %1054 = vmatprep.mubr.f32.mxu0 %v4372_v29  ;;  %3736 = vmatpush1.msra.mxu1 %v4740_v63 }
 0x1be   : >> { %1254 = vmatpush1.msra.mxu0 %v4750_v1  ;;  %3725 = vmatprep.subr.mxu1 %v4745_v0 }
 0x1bf   : >> { %3541 = vmatmul.mubr.msk.f32.gmra.mxu0 %vm959_vm4, %v958_v15  ;;  %1255 = vmatprep.subr.mxu0 %v4755_v2 }
 0x1c0   : >> { %3737 = vmatpush1.msra.mxu1 %v4750_v1  ;;  %1256 = vmatpush1.msra.mxu0 %v4760_v3 }
 0x1c1   : >> { %3726 = vmatprep.subr.mxu1 %v4755_v2  ;;  %1257 = vmatprep.subr.mxu0 %v4765_v4 }
 0x1c2   : >> { %3738 = vmatpush1.msra.mxu1 %v4760_v3  ;;  %1258 = vmatpush1.msra.mxu0 %v4770_v5 }
 0x1c3   : >> { %3727 = vmatprep.subr.mxu1 %v4765_v4  ;;  %1259 = vmatprep.subr.mxu0 %v4775_v6 }
 0x1c4   : >> { %3739 = vmatpush1.msra.mxu1 %v4770_v5  ;;  %1260 = vmatpush1.msra.mxu0 %v4780_v7 }
 0x1c5   : >> { %1293 = vmatprep.mubr.f32.mxu0 %v4372_v29  ;;  %3728 = vmatprep.subr.mxu1 %v4775_v6 }
 0x1c6   : >> { %3554 = vmatmul.mubr.msk.f32.vlgmr.msra.gmra.mxu0 %vm959_vm4, %v3550_v16  ;;  %3740 = vmatpush1.msra.mxu1 %v4780_v7 }
 0x1c7   : >> { %1305 = vmatprep.mubr.f32.mxu1 %v4372_v29  ;;  %1299 = vmatprep.mubr.f32.mxu0 %v4372_v29 }
 0x1c8   : >> { %3556 = vmatmul.mubr.msk.f32.vlgmr.msra.gmra.mxu1 %vm959_vm4, %v3552_v17  ;;  %1384 = vperm.xlu0 %4044, %v1366_v18  }
 0x1c9   : >> { %1311 = vmatprep.mubr.f32.mxu1 %v4372_v29  ;;  %1379 = vperm.xlu1 %4045, %v1365_v19  }
 0x1ca   : >> { %3555 = vmatmul.mubr.msk.f32.gmra.mxu0 %vm959_vm4, %v3551_v20 }
 0x1cc   : >> { %3557 = vmatmul.mubr.msk.f32.gmra.mxu1 %vm959_vm4, %v3553_v21 }
 0x206   : >> { %v1375_v46 = vpop.permute.xlu1 %1374  ;;  %v1370_v47 = vpop.permute.xlu0 %1369 }
 0x243   : >> { %v1385_v49 = vpop.permute.xlu0 %1384 }
 0x244   : >> { %v1380_v48 = vpop.permute.xlu1 %1379 }
 0x267   : >> { %v1144_v22 = vpop.f32.mrf.mxu1  ;;  %v1038_v26 = vpop.f32.mrf.mxu0 }
 0x268   : >> { %1175 = vrot.lane.b32.xlu0 %v1144_v22, %s4374_s20 }
 0x269   : >> { %v1146_v23 = vpop.f32.mrf.mxu1  ;;  %v1040_v30 = vpop.f32.mrf.mxu0 }
 0x26b   : >> { %v1150_v24 = vpop.f32.mrf.mxu1 }
 0x26c   : >> { %1177 = vrot.lane.b32.xlu0 %v1146_v23, %s4374_s20  ;;  %1179 = vrot.lane.b32.xlu1 %v1150_v24, %s4374_s20 }
 0x26d   : >> { %v1152_v28 = vpop.f32.mrf.mxu1 }
 0x270   : >> { %1181 = vrot.lane.b32.xlu1 %v1152_v28, %s4374_s20 }
 0x273   : >> { %v4900_v32 = vpop.f32.mrf.mxu0  ;;  %v1156_v33 = vpop.f32.mrf.mxu1 }
 0x274   : >> { %1183 = vrot.lane.b32.xlu0 %v1156_v33, %s4374_s20 }
 0x275   : >> { %v4902_v34 = vpop.f32.mrf.mxu0  ;;  %v1158_v35 = vpop.f32.mrf.mxu1 }
 0x276   : >> { %1185 = vrot.lane.b32.xlu1 %v1158_v35, %s4374_s20 }
 0x279   : >> { %v1050_v27 = vpop.f32.mrf.mxu0  ;;  %v1162_v36 = vpop.f32.mrf.mxu1 }
 0x27a   : >> { %1187 = vrot.lane.b32.xlu0 %v1162_v36, %s4374_s20 }
 0x27b   : >> { %v1164_v37 = vpop.f32.mrf.mxu1  ;;  %v1052_v25 = vpop.f32.mrf.mxu0 }
 0x27c   : >> { %1189 = vrot.lane.b32.xlu1 %v1164_v37, %s4374_s20 }
 0x27f   : >> { %v4904_v38 = vpop.f32.mrf.mxu0 }
 0x281   : >> { %v4906_v39 = vpop.f32.mrf.mxu0 }
 0x286   : >> { %v1295_v40 = vpop.f32.mrf.mxu0 }
 0x287   : >> { %1326 = vrot.lane.b32.xlu1 %v1295_v40, %s4375_s30 }
 0x288   : >> { %v1297_v41 = vpop.f32.mrf.mxu0  ;;  %v1307_v42 = vpop.f32.mrf.mxu1 }
 0x289   : >> { %1328 = vrot.lane.b32.xlu0 %v1297_v41, %s4375_s30 }
 0x28a   : >> { %v1309_v43 = vpop.f32.mrf.mxu1  ;;  %v1301_v44 = vpop.f32.mrf.mxu0 }
 0x28b   : >> { %1334 = vrot.lane.b32.xlu1 %v1307_v42, %s4375_s30 }
 0x28c   : >> { %v1303_v45 = vpop.f32.mrf.mxu0  ;;  %v1313_v29 = vpop.f32.mrf.mxu1 }
 0x28d   : >> { %1336 = vrot.lane.b32.xlu0 %v1309_v43, %s4375_s30 }
 0x28e   : >> { %v1315_v31 = vpop.f32.mrf.mxu1 }
 0x28f   : >> { %1330 = vrot.lane.b32.xlu1 %v1301_v44, %s4375_s30 }
 0x291   : >> { %1332 = vrot.lane.b32.xlu0 %v1303_v45, %s4375_s30  ;;  %v4941_v45 = vmov (%p921_p12), 0.0  }
 0x293   : >> { %1338 = vrot.lane.b32.xlu1 %v1313_v29, %s4375_s30  ;;  %v4943_v29 = vmov (%p921_p12), 0.0  }
 0x295   : >> { %1340 = vrot.lane.b32.xlu0 %v1315_v31, %s4375_s30  ;;  %v4945_v31 = vmov (%p921_p12), 0.0  }
 0x2da   : >> { %v1176_v51 = vpop.permute.xlu0 %1175 }
 0x2de   : >> { %v1180_v50 = vpop.permute.xlu1 %1179  ;;  %v1178_v53 = vpop.permute.xlu0 %1177 }
 0x2df   : >> { %v1192_v58 = vsel %vm692_vm1, %v1176_v51, %v1178_v53  ;;  %v1205_v60 = vadd.f32 %v1178_v53, %v1040_v30  ;;  %v4957_v51 = vmov (%p921_p12), 0.0   ;;  %v4961_v53 = vmov (%p921_p12), 0.0  }
 0x2e0   : >> { %v1204_v61 = vadd.f32 %v1192_v58, %v1038_v26  ;;  %v4971_v58 = vmov (%p921_p12), 0.0  }
 0x2e2   : >> { %v1182_v52 = vpop.permute.xlu1 %1181 }
 0x2e3   : >> { %v1193_v9 = vsel %vm692_vm1, %v1180_v50, %v1182_v52  ;;  %v1207_v16 = vadd.f32 %v1182_v52, %v4902_v34  ;;  %v4955_v50 = vmov (%p921_p12), 0.0   ;;  %v4959_v52 = vmov (%p921_p12), 0.0  }
 0x2e4   : >> { %v1206_v18 = vadd.f32 %v1193_v9, %v4900_v32 }
 0x2e6   : >> { %v1184_v55 = vpop.permute.xlu0 %1183 }
 0x2e8   : >> { %v1186_v54 = vpop.permute.xlu1 %1185 }
 0x2e9   : >> { %v1194_v63 = vsel %vm692_vm1, %v1184_v55, %v1186_v54  ;;  %v1209_v4 = vadd.f32 %v1186_v54, %v1052_v25  ;;  %v4963_v54 = vmov (%p921_p12), 0.0   ;;  %v4965_v55 = vmov (%p921_p12), 0.0  }
 0x2ea   : >> { %v1208_v6 = vadd.f32 %v1194_v63, %v1050_v27  ;;  %v4981_v63 = vmov (%p921_p12), 0.0  }
 0x2ec   : >> { %v1188_v57 = vpop.permute.xlu0 %1187 }
 0x2ee   : >> { %v1190_v56 = vpop.permute.xlu1 %1189 }
 0x2ef   : >> { %v1195_v21 = vsel %vm692_vm1, %v1188_v57, %v1190_v56  ;;  %v1211_v30 = vadd.f32 %v1190_v56, %v4906_v39  ;;  %v4967_v56 = vmov (%p921_p12), 0.0   ;;  %v4969_v57 = vmov (%p921_p12), 0.0  }
 0x2f0   : >> { %v1210_v32 = vadd.f32 %v1195_v21, %v4904_v38  ;;  %v4939_v38 = vmov (%p921_p12), 0.0  }
 0x2f9   : >> { %v1327_v59 = vpop.permute.xlu1 %1326 }
 0x2fb   : >> { %v1329_v62 = vpop.permute.xlu0 %1328 }
 0x2fc   : >> { %v1343_v0 = vsel %vm843_vm2, %v1327_v59, %v1329_v62  ;;  %v1356_v1 = vadd.f32 %v1329_v62, %v1205_v60  ;;  %v4973_v59 = vmov (%p921_p12), 0.0   ;;  %v4975_v60 = vmov (%p921_p12), 0.0  }
 0x2fd   : >> { %v1355_v2 = vadd.f32 %v1343_v0, %v1204_v61  ;;  %v1335_v3 = vpop.permute.xlu1 %1334  ;;  %v4977_v61 = vmov (%p921_p12), 0.0   ;;  %v4979_v62 = vmov (%p921_p12), 0.0   ;;  %v4983_v0 = vmov (%p921_p12), 0.0  }
 0x2fe   : >> { %v1388_v5 = vadd.f32 %v1370_v47, %v1356_v1  ;;  %v4985_v1 = vmov (%p921_p12), 0.0  }
 0x2ff   : >> { %v1387_v7 = vadd.f32 %v1370_v47, %v1355_v2  ;;  %v1337_v8 = vpop.permute.xlu0 %1336  ;;  %v4949_v47 = vmov (%p921_p12), 0.0  }
 0x300   : >> { %v1396_v10 = vmax.f32 %v1388_v5, 0.0  ;;  %v1345_v11 = vsel %vm843_vm2, %v1335_v3, %v1337_v8  ;;  %v1360_v12 = vadd.f32 %v1337_v8, %v1209_v4 }
 0x301   : >> { %v1395_v13 = vmax.f32 %v1387_v7, 0.0  ;;  %v1359_v14 = vadd.f32 %v1345_v11, %v1208_v6  ;;  %v1331_v15 = vpop.permute.xlu1 %1330 }
 0x302   : >> { %1407 = vst.msk [vmem:[%s4916_s21 + $0x8] sm:$0xff] %vm1406_vm5, %v1396_v10  ;;  %v1392_v17 = vadd.f32 %v1380_v48, %v1360_v12 }
 0x303   : >> { %1405 = vst [vmem:[%s4916_s21] sm:$0xff] %v1395_v13  ;;  %v1391_v19 = vadd.f32 %v1380_v48, %v1359_v14  ;;  %v1333_v20 = vpop.permute.xlu0 %1332  ;;  %v4951_v48 = vmov (%p921_p12), 0.0  }
 0x304   : >> { %v1400_v22 = vmax.f32 %v1392_v17, 0.0  ;;  %v1344_v23 = vsel %vm843_vm2, %v1331_v15, %v1333_v20  ;;  %v1358_v24 = vadd.f32 %v1333_v20, %v1207_v16 }
 0x305   : >> { %v1399_v26 = vmax.f32 %v1391_v19, 0.0  ;;  %v1357_v28 = vadd.f32 %v1344_v23, %v1206_v18  ;;  %v1339_v35 = vpop.permute.xlu1 %1338 }
 0x306   : >> { %1411 = vst.msk [vmem:[%s4916_s21 + $0x28] sm:$0xff] %vm1406_vm5, %v1400_v22  ;;  %v1390_v33 = vadd.f32 %v1375_v46, %v1358_v24 }
 0x307   : >> { %1410 = vst [vmem:[%s4916_s21 + $0x20] sm:$0xff] %v1399_v26  ;;  %v1389_v34 = vadd.f32 %v1375_v46, %v1357_v28  ;;  %v1341_v27 = vpop.permute.xlu0 %1340  ;;  %v4947_v46 = vmov (%p921_p12), 0.0  }
 0x308   : >> { %v1398_v36 = vmax.f32 %v1390_v33, 0.0  ;;  %v1346_v37 = vsel %vm843_vm2, %v1339_v35, %v1341_v27  ;;  %v1362_v25 = vadd.f32 %v1341_v27, %v1211_v30 }
 0x309   : >> { %v1397_v40 = vmax.f32 %v1389_v34, 0.0  ;;  %v1361_v41 = vadd.f32 %v1346_v37, %v1210_v32 }
 0x30a   : >> { %1409 = vst.msk [vmem:[%s4916_s21 + $0x18] sm:$0xff] %vm1406_vm5, %v1398_v36  ;;  %v1394_v39 = vadd.f32 %v1385_v49, %v1362_v25 }
 0x30b   : >> { %1408 = vst [vmem:[%s4916_s21 + $0x10] sm:$0xff] %v1397_v40  ;;  %v1393_v42 = vadd.f32 %v1385_v49, %v1361_v41  ;;  %923 = sbr.rel (!%p921_p12) target bundleno = 392 (0x188), region = 158  ;;  %v4953_v49 = vmov (%p921_p12), 0.0  }
 0x30c   : >> { %v1402_v43 = vmax.f32 %v1394_v39, 0.0 }
 0x30d   : >> { %v1401_v44 = vmax.f32 %v1393_v42, 0.0 }
 0x30e   : >> { %1413 = vst.msk [vmem:[%s4916_s21 + $0x38] sm:$0xff] %vm1406_vm5, %v1402_v43 }
 0x30f   : >> { %1412 = vst [vmem:[%s4916_s21 + $0x30] sm:$0xff] %v1401_v44 }
 0x310 LB: >> { %6476 = vst [vmem:[#allocation9_spill] sm:$0xff] %v4270_v38  ;;  %6477 = vst [vmem:[#allocation10_spill] sm:$0xff] %v4274_v45  ;;  %v4376_v2 = vmov 0.0   ;;  %s3559_s27 = sshll.u32 %s4366_s17, 5  ;;  %v4377_v3 = vmov 0   ;;  %v1474_v33 = vld [vmem:[%s6457_s5] sm:$0xff]  ;;  %s4366_s17 = sphi %s4987_s17, %s1419_s17   ;;  %v4362_v1 = vphi %v4985_v1, %v6557_v1   ;;  %v4358_v0 = vphi %v4983_v0, %v6556_v0   ;;  %v4354_v63 = vphi %v4981_v63, %v6555_v63   ;;  %v4350_v62 = vphi %v4979_v62, %v6554_v62   ;;  %v4346_v61 = vphi %v4977_v61, %v6553_v61   ;;  %v4342_v60 = vphi %v4975_v60, %v6552_v60   ;;  %v4338_v59 = vphi %v4973_v59, %v6551_v59   ;;  %v4334_v58 = vphi %v4971_v58, %v6550_v58   ;;  %v4330_v57 = vphi %v4969_v57, %v6549_v57   ;;  %v4326_v56 = vphi %v4967_v56, %v6548_v56   ;;  %v4322_v55 = vphi %v4965_v55, %v6547_v55   ;;  %v4318_v54 = vphi %v4963_v54, %v6546_v54   ;;  %v4314_v53 = vphi %v4961_v53, %v6545_v53   ;;  %v4310_v52 = vphi %v4959_v52, %v6544_v52   ;;  %v4306_v51 = vphi %v4957_v51, %v6543_v51   ;;  %v4302_v50 = vphi %v4955_v50, %v6542_v50   ;;  %v4298_v49 = vphi %v4953_v49, %v6541_v49   ;;  %v4294_v48 = vphi %v4951_v48, %v6540_v48   ;;  %v4290_v47 = vphi %v4949_v47, %v6539_v47   ;;  %v4286_v46 = vphi %v4947_v46, %v6538_v46   ;;  %v4282_v31 = vphi %v4945_v31, %v6537_v31   ;;  %v4278_v29 = vphi %v4943_v29, %v6536_v29   ;;  %v4274_v45 = vphi %v4941_v45, %v6535_v45   ;;  %v4270_v38 = vphi %v4939_v38, %v6534_v38  }
 0x311   : >> { %6478 = vst [vmem:[#allocation11_spill] sm:$0xff] %v4278_v29  ;;  %6479 = vst [vmem:[#allocation12_spill] sm:$0xff] %v4286_v46  ;;  %1571 = vmatprep.mubr.f32.mxu0 %v4376_v2  ;;  %1717 = vmatprep.mubr.f32.mxu1 %v4376_v2  ;;  %s1445_s16 = sshra.s32 %s3559_s27, 3  ;;  %v3570_v32 = vld [vmem:[%s6457_s5 + $0x40] sm:$0xff]  ;;  %v1475_v34 = vld [vmem:[%s6457_s5 + $0x8] sm:$0xff]  ;;  %s4378_s20 = smov 127  }
 0x312   : >> { %6480 = vst [vmem:[#allocation13_spill] sm:$0xff] %v4290_v47  ;;  %6481 = vst [vmem:[#allocation14_spill] sm:$0xff] %v4294_v48  ;;  %4047 = vset.pattern.permute.xlu0 %v4377_v3  ;;  %4046 = vset.pattern.permute.xlu1 %v4377_v3  ;;  %s3678_s22 = sshll.u32 %s1445_s16, 4  ;;  %v3571_v35 = vld [vmem:[%s6457_s5 + $0x48] sm:$0xff]  ;;  %v1476_v27 = vld [vmem:[%s6457_s5 + $0x10] sm:$0xff]  ;;  %s4379_s30 = smov 126  }
 0x313   : >> { %6482 = vst [vmem:[#allocation15_spill] sm:$0xff] %v4302_v50  ;;  %6483 = vst [vmem:[#allocation16_spill] sm:$0xff] %v4306_v51  ;;  %s5067_s23 = scalar_lea.vmem [#allocation3], %s3678_s22  ;;  %v3572_v36 = vld [vmem:[%s6457_s5 + $0x50] sm:$0xff]  ;;  %v1477_v37 = vld [vmem:[%s6457_s5 + $0x18] sm:$0xff]  ;;  %s4380_s0 = smov 63  }
 0x314   : >> { %6484 = vst [vmem:[#allocation17_spill] sm:$0xff] %v4310_v52  ;;  %6485 = vst [vmem:[#allocation18_spill] sm:$0xff] %v4318_v54  ;;  %v3573_v25 = vld [vmem:[%s6457_s5 + $0x58] sm:$0xff]  ;;  %v1478_v40 = vld [vmem:[%s6457_s5 + $0x20] sm:$0xff]  ;;  %vm2170_vm6 = vcmask 539648   ;;  %s4381_s21 = smov 64  }
 0x315   : >> { %6486 = vst [vmem:[#allocation19_spill] sm:$0xff] %v4322_v55  ;;  %6487 = vst [vmem:[#allocation20_spill] sm:$0xff] %v4334_v58  ;;  %v3574_v41 = vld [vmem:[%s6457_s5 + $0x60] sm:$0xff]  ;;  %v1479_v39 = vld [vmem:[%s6457_s5 + $0x28] sm:$0xff]  ;;  %s4382_s27 = smov 1   ;;  %s4383_s16 = smov 2  }
 0x316   : >> { %6488 = vst [vmem:[#allocation21_spill] sm:$0xff] %v4338_v59  ;;  %6489 = vst [vmem:[#allocation22_spill] sm:$0xff] %v4342_v60  ;;  %v5070_v4 = vld [vmem:[%s5067_s23 + $0xb8] sm:$0xff]  ;;  %v5073_v5 = vld [vmem:[%s5067_s23 + $0xb0] sm:$0xff]  ;;  %p2448_p13 = scmp.ge.s32.totalorder %s4366_s17, 1  ;;  %p2449_p0 = scmp.le.s32.totalorder %s4366_s17, 192 }
 0x317   : >> { %6490 = vst [vmem:[#allocation23_spill] sm:$0xff] %v4350_v62  ;;  %6491 = vst [vmem:[#allocation24_spill] sm:$0xff] %v4354_v63  ;;  %v5076_v6 = vld [vmem:[%s5067_s23 + $0xa8] sm:$0xff]  ;;  %1515 = vmatprep.subr.mxu0 %v5070_v4  ;;  %1661 = vmatprep.subr.mxu1 %v5070_v4  ;;  %v5081_v7 = vld [vmem:[%s5067_s23 + $0xa0] sm:$0xff]  ;;  %p2445_p1 = scmp.le.s32.totalorder %s4366_s17, 191  ;;  %p2454_p3 = scmp.ge.s32.totalorder %s4366_s17, 2 }
 0x318   : >> { %1516 = vmatpush1.msra.mxu0 %v5073_v5  ;;  %1662 = vmatpush1.msra.mxu1 %v5073_v5  ;;  %v5086_v8 = vld [vmem:[%s5067_s23 + $0x98] sm:$0xff]  ;;  %v5091_v9 = vld [vmem:[%s5067_s23 + $0x90] sm:$0xff]  ;;  %v5096_v10 = vld [vmem:[%s5067_s23 + $0x88] sm:$0xff]  ;;  %p5680_p2 = pnand %p2449_p0, %p2448_p13  ;;  %vm2427_vm7 = vcmask 7168   ;;  %vm2436_vm8 = vcmask 15360   ;;  %s1419_s17 = sadd.s32 1, %s4366_s17  }
 0x319   : >> { %1517 = vmatprep.subr.mxu0 %v5076_v6  ;;  %1663 = vmatprep.subr.mxu1 %v5076_v6  ;;  %v5101_v11 = vld [vmem:[%s5067_s23 + $0x80] sm:$0xff]  ;;  %v5106_v12 = vld [vmem:[%s5067_s23 + $0x78] sm:$0xff]  ;;  %v5111_v13 = vld [vmem:[%s5067_s23 + $0x70] sm:$0xff]  ;;  %p5811_p4 = scmp.ge.s32.totalorder %s1419_s17, 194  }
 0x31a   : >> { %1518 = vmatpush1.msra.mxu0 %v5081_v7  ;;  %1664 = vmatpush1.msra.mxu1 %v5081_v7  ;;  %v5116_v14 = vld [vmem:[%s5067_s23 + $0x68] sm:$0xff]  ;;  %v5121_v15 = vld [vmem:[%s5067_s23 + $0x60] sm:$0xff]  ;;  %v5126_v16 = vld [vmem:[%s5067_s23 + $0x58] sm:$0xff]  ;;  %s3602_s24 = scalar_select %p5680_p2, 0, 1  ;;  %vm2564_vm9 = vcmask (%p5811_p4), 203776  }
 0x31b   : >> { %1519 = vmatprep.subr.mxu0 %v5086_v8  ;;  %1665 = vmatprep.subr.mxu1 %v5086_v8  ;;  %v5131_v17 = vld [vmem:[%s5067_s23 + $0x50] sm:$0xff]  ;;  %v5136_v18 = vld [vmem:[%s5067_s23 + $0x48] sm:$0xff]  ;;  %v5141_v19 = vld [vmem:[%s5067_s23 + $0x40] sm:$0xff]  ;;  %vm3182_vm10 = vcmask (%p5811_p4), 1040384   ;;  %vm4388_vm11 = vmmov (%p5811_p4), 0   ;;  %vm3337_vm12 = vcmask (%p5811_p4), 196608  }
 0x31c   : >> { %1520 = vmatpush1.msra.mxu0 %v5091_v9  ;;  %1666 = vmatpush1.msra.mxu1 %v5091_v9  ;;  %v5146_v20 = vld [vmem:[%s5067_s23 + $0x38] sm:$0xff]  ;;  %v5151_v21 = vld [vmem:[%s5067_s23 + $0x30] sm:$0xff]  ;;  %v5156_v22 = vld [vmem:[%s5067_s23 + $0x28] sm:$0xff] }
 0x31d   : >> { %1521 = vmatprep.subr.mxu0 %v5096_v10  ;;  %1667 = vmatprep.subr.mxu1 %v5096_v10  ;;  %v5161_v23 = vld [vmem:[%s5067_s23 + $0x20] sm:$0xff]  ;;  %v5166_v24 = vld [vmem:[%s5067_s23 + $0x18] sm:$0xff]  ;;  %v5171_v26 = vld [vmem:[%s5067_s23 + $0x10] sm:$0xff] }
 0x31e   : >> { %1522 = vmatpush1.msra.mxu0 %v5101_v11  ;;  %1668 = vmatpush1.msra.mxu1 %v5101_v11  ;;  %v5176_v28 = vld [vmem:[%s5067_s23 + $0x8] sm:$0xff]  ;;  %v5181_v30 = vld [vmem:[%s5067_s23] sm:$0xff]  ;;  %v1480_v43 = vld [vmem:[%s6457_s5 + $0x30] sm:$0xff]  ;;  %s2446_s23 = scalar_select %p2445_p1, 1, 0 }
 0x31f   : >> { %1523 = vmatprep.subr.mxu0 %v5106_v12  ;;  %1669 = vmatprep.subr.mxu1 %v5106_v12  ;;  %v3575_v42 = vld [vmem:[%s6457_s5 + $0x68] sm:$0xff]  ;;  %v3576_v44 = vld [vmem:[%s6457_s5 + $0x70] sm:$0xff]  ;;  %v1481_v3 = vld [vmem:[%s6457_s5 + $0x38] sm:$0xff] }
 0x320   : >> { %1524 = vmatpush1.msra.mxu0 %v5111_v13  ;;  %1670 = vmatpush1.msra.mxu1 %v5111_v13 }
 0x321   : >> { %1525 = vmatprep.subr.mxu0 %v5116_v14  ;;  %1671 = vmatprep.subr.mxu1 %v5116_v14 }
 0x322   : >> { %1526 = vmatpush1.msra.mxu0 %v5121_v15  ;;  %1672 = vmatpush1.msra.mxu1 %v5121_v15 }
 0x323   : >> { %1527 = vmatprep.subr.mxu0 %v5126_v16  ;;  %1673 = vmatprep.subr.mxu1 %v5126_v16 }
 0x324   : >> { %1528 = vmatpush1.msra.mxu0 %v5131_v17  ;;  %1674 = vmatpush1.msra.mxu1 %v5131_v17 }
 0x325   : >> { %1529 = vmatprep.subr.mxu0 %v5136_v18  ;;  %1675 = vmatprep.subr.mxu1 %v5136_v18 }
 0x326   : >> { %1530 = vmatpush1.msra.mxu0 %v5141_v19  ;;  %1676 = vmatpush1.msra.mxu1 %v5141_v19 }
 0x327   : >> { %1531 = vmatprep.subr.mxu0 %v5146_v20  ;;  %1677 = vmatprep.subr.mxu1 %v5146_v20 }
 0x328   : >> { %1532 = vmatpush1.msra.mxu0 %v5151_v21  ;;  %1678 = vmatpush1.msra.mxu1 %v5151_v21 }
 0x329   : >> { %1533 = vmatprep.subr.mxu0 %v5156_v22  ;;  %1679 = vmatprep.subr.mxu1 %v5156_v22 }
 0x32a   : >> { %1534 = vmatpush1.msra.mxu0 %v5161_v23  ;;  %1680 = vmatpush1.msra.mxu1 %v5161_v23 }
 0x32b   : >> { %1535 = vmatprep.subr.mxu0 %v5166_v24  ;;  %1681 = vmatprep.subr.mxu1 %v5166_v24 }
 0x32c   : >> { %1536 = vmatpush1.msra.mxu0 %v5171_v26  ;;  %1682 = vmatpush1.msra.mxu1 %v5171_v26 }
 0x32d   : >> { %1537 = vmatprep.subr.mxu0 %v5176_v28  ;;  %1683 = vmatprep.subr.mxu1 %v5176_v28 }
 0x32e   : >> { %1538 = vmatpush1.msra.mxu0 %v5181_v30  ;;  %1684 = vmatpush1.msra.mxu1 %v5181_v30 }
 0x32f   : >> { %3562 = vmatmul.mubr.msk.f32.vlgmr.msra.gmra.mxu0 %vm959_vm4, %v1474_v33  ;;  %3578 = vmatmul.mubr.msk.f32.vlgmr.msra.gmra.mxu1 %vm959_vm4, %v3570_v32 }
 0x330   : >> { %1896 = vmatprep.subr.mxu0 %v5070_v4  ;;  %1577 = vmatprep.mubr.f32.mxu0 %v4376_v2 }
 0x331   : >> { %1897 = vmatpush1.msra.mxu0 %v5073_v5  ;;  %1723 = vmatprep.mubr.f32.mxu1 %v4376_v2 }
 0x332   : >> { %1898 = vmatprep.subr.mxu0 %v5076_v6  ;;  %3741 = vmatprep.subr.mxu1 %v5070_v4  ;;  %v3577_v4 = vld [vmem:[%s6457_s5 + $0x78] sm:$0xff] }
 0x333   : >> { %3563 = vmatmul.mubr.msk.f32.gmra.mxu0 %vm959_vm4, %v1475_v34  ;;  %3579 = vmatmul.mubr.msk.f32.gmra.mxu1 %vm959_vm4, %v3571_v35 }
 0x334   : >> { %1899 = vmatpush1.msra.mxu0 %v5081_v7  ;;  %3753 = vmatpush1.msra.mxu1 %v5073_v5  ;;  %v3586_v5 = vld [vmem:[%s6457_s5 + $0x80] sm:$0xff] }
 0x335   : >> { %1583 = vmatprep.mubr.f32.mxu0 %v4376_v2  ;;  %1729 = vmatprep.mubr.f32.mxu1 %v4376_v2 }
 0x336   : >> { %1900 = vmatprep.subr.mxu0 %v5086_v8  ;;  %3742 = vmatprep.subr.mxu1 %v5076_v6  ;;  %v3590_v6 = vld [vmem:[%s6457_s5 + $0xa0] sm:$0xff] }
 0x337   : >> { %3564 = vmatmul.mubr.msk.f32.gmra.mxu0 %vm959_vm4, %v1476_v27  ;;  %3580 = vmatmul.mubr.msk.f32.gmra.mxu1 %vm959_vm4, %v3572_v36 }
 0x338   : >> { %1901 = vmatpush1.msra.mxu0 %v5091_v9  ;;  %3754 = vmatpush1.msra.mxu1 %v5081_v7  ;;  %v2091_v7 = vld [vmem:[%s6458_s6 + $0x8] sm:$0xff] }
 0x339   : >> { %1902 = vmatprep.subr.mxu0 %v5096_v10  ;;  %1589 = vmatprep.mubr.f32.mxu0 %v4376_v2 }
 0x33a   : >> { %1903 = vmatpush1.msra.mxu0 %v5101_v11  ;;  %1735 = vmatprep.mubr.f32.mxu1 %v4376_v2 }
 0x33b   : >> { %3743 = vmatprep.subr.mxu1 %v5086_v8  ;;  %3565 = vmatmul.mubr.msk.f32.gmra.mxu0 %vm959_vm4, %v1477_v37  ;;  %v3587_v8 = vld [vmem:[%s6457_s5 + $0x88] sm:$0xff] }
 0x33c   : >> { %3581 = vmatmul.mubr.msk.f32.gmra.mxu1 %vm959_vm4, %v3573_v25  ;;  %1904 = vmatprep.subr.mxu0 %v5106_v12 }
 0x33d   : >> { %3755 = vmatpush1.msra.mxu1 %v5091_v9  ;;  %1905 = vmatpush1.msra.mxu0 %v5111_v13  ;;  %v2090_v9 = vld [vmem:[%s6458_s6] sm:$0xff] }
 0x33e   : >> { %3744 = vmatprep.subr.mxu1 %v5096_v10  ;;  %1595 = vmatprep.mubr.f32.mxu0 %v4376_v2  ;;  %v3591_v10 = vld [vmem:[%s6457_s5 + $0xa8] sm:$0xff] }
 0x33f   : >> { %3756 = vmatpush1.msra.mxu1 %v5101_v11  ;;  %1741 = vmatprep.mubr.f32.mxu1 %v4376_v2  ;;  %v2094_v11 = vld [vmem:[%s6458_s6 + $0x20] sm:$0xff] }
 0x340   : >> { %1906 = vmatprep.subr.mxu0 %v5116_v14  ;;  %3566 = vmatmul.mubr.msk.f32.gmra.mxu0 %vm959_vm4, %v1478_v40 }
 0x341   : >> { %3582 = vmatmul.mubr.msk.f32.gmra.mxu1 %vm959_vm4, %v3574_v41  ;;  %3745 = vmatprep.subr.mxu1 %v5106_v12  ;;  %v3588_v12 = vld [vmem:[%s6457_s5 + $0x90] sm:$0xff] }
 0x342   : >> { %1907 = vmatpush1.msra.mxu0 %v5121_v15  ;;  %3757 = vmatpush1.msra.mxu1 %v5111_v13  ;;  %v2092_v13 = vld [vmem:[%s6458_s6 + $0x10] sm:$0xff] }
 0x343   : >> { %1908 = vmatprep.subr.mxu0 %v5126_v16  ;;  %1601 = vmatprep.mubr.f32.mxu0 %v4376_v2 }
 0x344   : >> { %1909 = vmatpush1.msra.mxu0 %v5131_v17  ;;  %1747 = vmatprep.mubr.f32.mxu1 %v4376_v2 }
 0x345   : >> { %3746 = vmatprep.subr.mxu1 %v5116_v14  ;;  %3567 = vmatmul.mubr.msk.f32.gmra.mxu0 %vm959_vm4, %v1479_v39  ;;  %v3592_v14 = vld [vmem:[%s6457_s5 + $0xb0] sm:$0xff] }
 0x346   : >> { %3583 = vmatmul.mubr.msk.f32.gmra.mxu1 %vm959_vm4, %v3575_v42  ;;  %1910 = vmatprep.subr.mxu0 %v5136_v18 }
 0x347   : >> { %3758 = vmatpush1.msra.mxu1 %v5121_v15  ;;  %1911 = vmatpush1.msra.mxu0 %v5141_v19  ;;  %v2096_v15 = vld [vmem:[%s6458_s6 + $0x30] sm:$0xff] }
 0x348   : >> { %3747 = vmatprep.subr.mxu1 %v5126_v16  ;;  %1607 = vmatprep.mubr.f32.mxu0 %v4376_v2  ;;  %v3589_v16 = vld [vmem:[%s6457_s5 + $0x98] sm:$0xff] }
 0x349   : >> { %3759 = vmatpush1.msra.mxu1 %v5131_v17  ;;  %1753 = vmatprep.mubr.f32.mxu1 %v4376_v2  ;;  %v2093_v17 = vld [vmem:[%s6458_s6 + $0x18] sm:$0xff] }
 0x34a   : >> { %1912 = vmatprep.subr.mxu0 %v5146_v20  ;;  %3568 = vmatmul.mubr.msk.f32.gmra.mxu0 %vm959_vm4, %v1480_v43 }
 0x34b   : >> { %3584 = vmatmul.mubr.msk.f32.gmra.mxu1 %vm959_vm4, %v3576_v44  ;;  %3748 = vmatprep.subr.mxu1 %v5136_v18  ;;  %v3593_v18 = vld [vmem:[%s6457_s5 + $0xb8] sm:$0xff] }
 0x34c   : >> { %1913 = vmatpush1.msra.mxu0 %v5151_v21  ;;  %3760 = vmatpush1.msra.mxu1 %v5141_v19  ;;  %v2095_v19 = vld [vmem:[%s6458_s6 + $0x28] sm:$0xff] }
 0x34d   : >> { %1914 = vmatprep.subr.mxu0 %v5156_v22  ;;  %1613 = vmatprep.mubr.f32.mxu0 %v4376_v2 }
 0x34e   : >> { %1915 = vmatpush1.msra.mxu0 %v5161_v23  ;;  %1759 = vmatprep.mubr.f32.mxu1 %v4376_v2 }
 0x34f   : >> { %3749 = vmatprep.subr.mxu1 %v5146_v20  ;;  %3569 = vmatmul.mubr.msk.f32.gmra.mxu0 %vm959_vm4, %v1481_v3  ;;  %v2097_v20 = vld [vmem:[%s6458_s6 + $0x38] sm:$0xff] }
 0x350   : >> { %3585 = vmatmul.mubr.msk.f32.gmra.mxu1 %vm959_vm4, %v3577_v4  ;;  %1916 = vmatprep.subr.mxu0 %v5166_v24 }
 0x351   : >> { %3761 = vmatpush1.msra.mxu1 %v5151_v21  ;;  %1917 = vmatpush1.msra.mxu0 %v5171_v26 }
 0x352   : >> { %3750 = vmatprep.subr.mxu1 %v5156_v22  ;;  %1918 = vmatprep.subr.mxu0 %v5176_v28 }
 0x353   : >> { %3762 = vmatpush1.msra.mxu1 %v5161_v23  ;;  %1919 = vmatpush1.msra.mxu0 %v5181_v30 }
 0x354   : >> { %1952 = vmatprep.mubr.f32.mxu0 %v4376_v2  ;;  %3751 = vmatprep.subr.mxu1 %v5166_v24 }
 0x355   : >> { %3594 = vmatmul.mubr.msk.f32.vlgmr.msra.gmra.mxu0 %vm959_vm4, %v3586_v5  ;;  %3763 = vmatpush1.msra.mxu1 %v5171_v26 }
 0x356   : >> { %3752 = vmatprep.subr.mxu1 %v5176_v28  ;;  %1976 = vmatprep.mubr.f32.mxu1 %v4376_v2 }
 0x357   : >> { %3764 = vmatpush1.msra.mxu1 %v5181_v30  ;;  %1958 = vmatprep.mubr.f32.mxu0 %v4376_v2 }
 0x358   : >> { %3598 = vmatmul.mubr.msk.f32.vlgmr.msra.gmra.mxu1 %vm959_vm4, %v3590_v6  ;;  %2105 = vperm.xlu0 %4047, %v2091_v7  }
 0x359   : >> { %3595 = vmatmul.mubr.msk.f32.gmra.mxu0 %vm959_vm4, %v3587_v8  ;;  %1982 = vmatprep.mubr.f32.mxu1 %v4376_v2 }
 0x35a   : >> { %1964 = vmatprep.mubr.f32.mxu0 %v4376_v2  ;;  %2100 = vperm.xlu1 %4046, %v2090_v9  }
 0x35c   : >> { %3599 = vmatmul.mubr.msk.f32.gmra.mxu1 %vm959_vm4, %v3591_v10  ;;  %2120 = vperm.xlu0 %4047, %v2094_v11  }
 0x35d   : >> { %3596 = vmatmul.mubr.msk.f32.gmra.mxu0 %vm959_vm4, %v3588_v12  ;;  %1988 = vmatprep.mubr.f32.mxu1 %v4376_v2 }
 0x35e   : >> { %1970 = vmatprep.mubr.f32.mxu0 %v4376_v2  ;;  %2110 = vperm.xlu1 %4046, %v2092_v13  }
 0x360   : >> { %3600 = vmatmul.mubr.msk.f32.gmra.mxu1 %vm959_vm4, %v3592_v14  ;;  %2130 = vperm.xlu0 %4047, %v2096_v15  }
 0x361   : >> { %3597 = vmatmul.mubr.msk.f32.gmra.mxu0 %vm959_vm4, %v3589_v16  ;;  %1994 = vmatprep.mubr.f32.mxu1 %v4376_v2 }
 0x362   : >> { %2115 = vperm.xlu1 %4046, %v2093_v17  }
 0x364   : >> { %3601 = vmatmul.mubr.msk.f32.gmra.mxu1 %vm959_vm4, %v3593_v18 }
 0x366   : >> { %2125 = vperm.xlu1 %4046, %v2095_v19  }
 0x36a   : >> { %2135 = vperm.xlu1 %4046, %v2097_v20  }
 0x3ef   : >> { %v5379_v21 = vpop.f32.mrf.mxu0  ;;  %v1719_v2 = vpop.f32.mrf.mxu1 }
 0x3f0   : >> { %1782 = vrot.lane.b32.xlu0 %v1719_v2, %s4378_s20 }
 0x3f1   : >> { %v5382_v22 = vpop.f32.mrf.mxu0  ;;  %v1721_v23 = vpop.f32.mrf.mxu1 }
 0x3f3   : >> { %v5384_v24 = vpop.f32.mrf.mxu0  ;;  %v1725_v26 = vpop.f32.mrf.mxu1 }
 0x3f4   : >> { %1784 = vrot.lane.b32.xlu0 %v1721_v23, %s4378_s20  ;;  %1786 = vrot.lane.b32.xlu1 %v1725_v26, %s4378_s20 }
 0x3f5   : >> { %v5388_v28 = vpop.f32.mrf.mxu0  ;;  %v1727_v30 = vpop.f32.mrf.mxu1 }
 0x3f7   : >> { %v5390_v33 = vpop.f32.mrf.mxu0  ;;  %v1731_v32 = vpop.f32.mrf.mxu1 }
 0x3f8   : >> { %1788 = vrot.lane.b32.xlu1 %v1727_v30, %s4378_s20  ;;  %1790 = vrot.lane.b32.xlu0 %v1731_v32, %s4378_s20 }
 0x3f9   : >> { %v5394_v34 = vpop.f32.mrf.mxu0  ;;  %v1733_v35 = vpop.f32.mrf.mxu1 }
 0x3fb   : >> { %v5396_v27 = vpop.f32.mrf.mxu0 }
 0x3fc   : >> { %v1737_v36 = vpop.f32.mrf.mxu1  ;;  %1792 = vrot.lane.b32.xlu1 %v1733_v35, %s4378_s20 }
 0x3fd   : >> { %1794 = vrot.lane.b32.xlu0 %v1737_v36, %s4378_s20  ;;  %v5400_v37 = vpop.f32.mrf.mxu0 }
 0x3fe   : >> { %v1739_v25 = vpop.f32.mrf.mxu1 }
 0x400   : >> { %v5402_v40 = vpop.f32.mrf.mxu0  ;;  %1796 = vrot.lane.b32.xlu1 %v1739_v25, %s4378_s20 }
 0x401   : >> { %v1743_v41 = vpop.f32.mrf.mxu1 }
 0x402   : >> { %1798 = vrot.lane.b32.xlu0 %v1743_v41, %s4378_s20  ;;  %v5406_v39 = vpop.f32.mrf.mxu0  ;;  %v2101_v41 = vpop.permute.xlu1 %2100 }
 0x403   : >> { %v1745_v42 = vpop.f32.mrf.mxu1 }
 0x404   : >> { %1800 = vrot.lane.b32.xlu1 %v1745_v42, %s4378_s20 }
 0x405   : >> { %v5409_v43 = vpop.f32.mrf.mxu0 }
 0x406   : >> { %v1749_v44 = vpop.f32.mrf.mxu1  ;;  %v5443_v42 = vpop.permute.xlu1 %2110 }
 0x407   : >> { %1802 = vrot.lane.b32.xlu0 %v1749_v44, %s4378_s20  ;;  %v5412_v3 = vpop.f32.mrf.mxu0  ;;  %v5445_v44 = vpop.permute.xlu0 %2105 }
 0x408   : >> { %v1751_v4 = vpop.f32.mrf.mxu1 }
 0x409   : >> { %1804 = vrot.lane.b32.xlu1 %v1751_v4, %s4378_s20 }
 0x40a   : >> { %v5415_v5 = vpop.f32.mrf.mxu0  ;;  %v5447_v4 = vpop.permute.xlu1 %2115 }
 0x40b   : >> { %v1755_v6 = vpop.f32.mrf.mxu1 }
 0x40c   : >> { %1806 = vrot.lane.b32.xlu0 %v1755_v6, %s4378_s20  ;;  %v5418_v7 = vpop.f32.mrf.mxu0  ;;  %v5449_v6 = vpop.permute.xlu0 %2120 }
 0x40d   : >> { %v1757_v8 = vpop.f32.mrf.mxu1 }
 0x40f   : >> { %v5420_v9 = vpop.f32.mrf.mxu0 }
 0x410   : >> { %v1761_v10 = vpop.f32.mrf.mxu1  ;;  %1808 = vrot.lane.b32.xlu0 %v1757_v8, %s4378_s20  ;;  %v5451_v8 = vpop.permute.xlu1 %2125 }
 0x411   : >> { %v5423_v11 = vpop.f32.mrf.mxu0  ;;  %1810 = vrot.lane.b32.xlu1 %v1761_v10, %s4378_s20  ;;  %v5453_v10 = vpop.permute.xlu0 %2130 }
 0x412   : >> { %v1763_v12 = vpop.f32.mrf.mxu1 }
 0x414   : >> { %1812 = vrot.lane.b32.xlu0 %v1763_v12, %s4378_s20  ;;  %v5455_v12 = vpop.permute.xlu1 %2135 }
 0x415   : >> { %v1954_v13 = vpop.f32.mrf.mxu0 }
 0x416   : >> { %2017 = vrot.lane.b32.xlu1 %v1954_v13, %s4379_s30 }
 0x417   : >> { %v1956_v14 = vpop.f32.mrf.mxu0 }
 0x418   : >> { %v1978_v15 = vpop.f32.mrf.mxu1  ;;  %2019 = vrot.lane.b32.xlu0 %v1956_v14, %s4379_s30 }
 0x419   : >> { %v1960_v16 = vpop.f32.mrf.mxu0 }
 0x41a   : >> { %2033 = vrot.lane.b32.xlu1 %v1978_v15, %s4379_s30  ;;  %v1980_v17 = vpop.f32.mrf.mxu1 }
 0x41b   : >> { %v1962_v18 = vpop.f32.mrf.mxu0 }
 0x41c   : >> { %2035 = vrot.lane.b32.xlu0 %v1980_v17, %s4379_s30  ;;  %v1984_v19 = vpop.f32.mrf.mxu1 }
 0x41d   : >> { %v1966_v2 = vpop.f32.mrf.mxu0 }
 0x41e   : >> { %2021 = vrot.lane.b32.xlu1 %v1960_v16, %s4379_s30  ;;  %v1986_v20 = vpop.f32.mrf.mxu1 }
 0x41f   : >> { %v1968_v23 = vpop.f32.mrf.mxu0 }
 0x420   : >> { %2023 = vrot.lane.b32.xlu0 %v1962_v18, %s4379_s30  ;;  %v1990_v26 = vpop.f32.mrf.mxu1 }
 0x421   : >> { %v1972_v32 = vpop.f32.mrf.mxu0 }
 0x422   : >> { %2037 = vrot.lane.b32.xlu1 %v1984_v19, %s4379_s30  ;;  %v1992_v30 = vpop.f32.mrf.mxu1 }
 0x423   : >> { %v1974_v35 = vpop.f32.mrf.mxu0 }
 0x424   : >> { %2039 = vrot.lane.b32.xlu0 %v1986_v20, %s4379_s30  ;;  %v1996_v36 = vpop.f32.mrf.mxu1 }
 0x426   : >> { %2025 = vrot.lane.b32.xlu1 %v1966_v2, %s4379_s30  ;;  %v1998_v25 = vpop.f32.mrf.mxu1 }
 0x428   : >> { %2027 = vrot.lane.b32.xlu0 %v1968_v23, %s4379_s30 }
 0x42a   : >> { %2041 = vrot.lane.b32.xlu1 %v1990_v26, %s4379_s30 }
 0x42c   : >> { %2043 = vrot.lane.b32.xlu0 %v1992_v30, %s4379_s30 }
 0x42e   : >> { %2029 = vrot.lane.b32.xlu1 %v1972_v32, %s4379_s30 }
 0x430   : >> { %2031 = vrot.lane.b32.xlu0 %v1974_v35, %s4379_s30 }
 0x432   : >> { %2045 = vrot.lane.b32.xlu1 %v1996_v36, %s4379_s30 }
 0x434   : >> { %2047 = vrot.lane.b32.xlu0 %v1998_v25, %s4379_s30  ;;  %s2447_s30 = scvt.s32.f32 %s2446_s23 }
 0x462   : >> { %v1783_v13 = vpop.permute.xlu0 %1782 }
 0x466   : >> { %v1785_v14 = vpop.permute.xlu0 %1784  ;;  %v1787_v15 = vpop.permute.xlu1 %1786 }
 0x46a   : >> { %v5457_v16 = vpop.permute.xlu1 %1788  ;;  %v1791_v17 = vpop.permute.xlu0 %1790 }
 0x46b   : >> { %v5461_v18 = vsel %vm692_vm1, %v1787_v15, %v5457_v16 }
 0x46e   : >> { %v5463_v19 = vpop.permute.xlu1 %1792 }
 0x46f   : >> { %v5467_v20 = vsel %vm692_vm1, %v1791_v17, %v5463_v19  ;;  %v1795_v2 = vpop.permute.xlu0 %1794 }
 0x472   : >> { %v5469_v23 = vpop.permute.xlu1 %1796 }
 0x473   : >> { %v5473_v26 = vsel %vm692_vm1, %v1795_v2, %v5469_v23  ;;  %v1840_v2 = vadd.f32 %v1785_v14, %v5382_v22 }
 0x474   : >> { %v1799_v30 = vpop.permute.xlu0 %1798 }
 0x476   : >> { %v1801_v32 = vpop.permute.xlu1 %1800 }
 0x477   : >> { %v1848_v51 = vadd.f32 %v1801_v32, %v5406_v39 }
 0x479   : >> { %v5475_v35 = vpop.permute.xlu0 %1802 }
 0x47b   : >> { %v5477_v25 = vpop.permute.xlu1 %1804 }
 0x47e   : >> { %v1807_v36 = vpop.permute.xlu0 %1806 }
 0x482   : >> { %v1809_v15 = vpop.permute.xlu0 %1808 }
 0x483   : >> { %v1821_v38 = vsel %vm692_vm1, %v1807_v36, %v1809_v15  ;;  %v1811_v50 = vpop.permute.xlu1 %1810 }
 0x486   : >> { %v5480_v17 = vpop.permute.xlu0 %1812 }
 0x487   : >> { %v5484_v58 = vsel %vm692_vm1, %v1811_v50, %v5480_v17  ;;  %v1815_v50 = vsel %vm692_vm1, %v1783_v13, %v1785_v14  ;;  %v1852_v14 = vadd.f32 %v1809_v15, %v5418_v7 }
 0x488   : >> { %v2018_v46 = vpop.permute.xlu1 %2017 }
 0x48a   : >> { %v2020_v54 = vpop.permute.xlu0 %2019 }
 0x48b   : >> { %v2075_v62 = vadd.f32 %v2020_v54, %v1840_v2  ;;  %v2050_v2 = vsel %vm843_vm2, %v2018_v46, %v2020_v54 }
 0x48c   : >> { %v2034_v45 = vpop.permute.xlu1 %2033 }
 0x48d   : >> { %v2139_v59 = vadd.f32 %v2101_v41, %v2075_v62  ;;  %v1839_v62 = vadd.f32 %v1815_v50, %v5379_v21 }
 0x48e   : >> { %v2036_v47 = vpop.permute.xlu0 %2035 }
 0x48f   : >> { %v5488_v55 = vmax.f32 %v2139_v59, 0.0  ;;  %v2083_v36 = vadd.f32 %v2036_v47, %v1848_v51  ;;  %v1819_v51 = vsel %vm692_vm1, %v1799_v30, %v1801_v32  ;;  %v2074_v39 = vadd.f32 %v2050_v2, %v1839_v62 }
 0x490   : >> { %v2022_v63 = vpop.permute.xlu1 %2021  ;;  %v1847_v13 = vadd.f32 %v1819_v51, %v5402_v40  ;;  %v1851_v30 = vadd.f32 %v1821_v38, %v5415_v5  ;;  %v1842_v51 = vadd.f32 %v5457_v16, %v5388_v28  ;;  %v1820_v28 = vsel %vm692_vm1, %v5475_v35, %v5477_v25 }
 0x491   : >> { %v2147_v29 = vadd.f32 %v5449_v6, %v2083_v36  ;;  %2219 = vrot.lane.b32.xlu0 %v5488_v55, %s4378_s20  ;;  %v2054_v36 = vsel %vm843_vm2, %v2034_v45, %v2036_v47  ;;  %v2138_v54 = vadd.f32 %v2101_v41, %v2074_v39 }
 0x492   : >> { %v2024_v52 = vpop.permute.xlu0 %2023  ;;  %v2082_v46 = vadd.f32 %v2054_v36, %v1847_v13 }
 0x493   : >> { %v5494_v22 = vmax.f32 %v2147_v29, 0.0  ;;  %v5510_v40 = vmax.f32 %v2138_v54, 0.0  ;;  %v2051_v54 = vsel %vm843_vm2, %v2022_v63, %v2024_v52 }
 0x494   : >> { %v2038_v60 = vpop.permute.xlu1 %2037  ;;  %v2146_v50 = vadd.f32 %v5449_v6, %v2082_v46  ;;  %v1850_v6 = vadd.f32 %v5477_v25, %v5412_v3  ;;  %v2171_v46 = vsel %vm2170_vm6, %v5488_v55, 0.0 }
 0x495   : >> { %2227 = vrot.lane.b32.xlu1 %v5494_v22, %s4378_s20  ;;  %v2187_v38 = vsel %vm2170_vm6, %v5494_v22, 0.0  ;;  %v2172_v3 = vadd.f32 %v2171_v46, %v5510_v40 }
 0x496   : >> { %v2040_v59 = vpop.permute.xlu0 %2039  ;;  %v5517_v41 = vmax.f32 %v2146_v50, 0.0 }
 0x497   : >> { %v2085_v15 = vadd.f32 %v2040_v59, %v1850_v6 }
 0x498   : >> { %v2026_v48 = vpop.permute.xlu1 %2025  ;;  %v2188_v5 = vadd.f32 %v2187_v38, %v5517_v41 }
 0x499   : >> { %2259 = vrot.lane.b32.xlu1 %v5488_v55, %s4380_s0  ;;  %v2149_v39 = vadd.f32 %v5451_v8, %v2085_v15 }
 0x49a   : >> { %v2028_v29 = vpop.permute.xlu0 %2027 }
 0x49b   : >> { %v5530_v13 = vmax.f32 %v2149_v39, 0.0 }
 0x49c   : >> { %v2042_v21 = vpop.permute.xlu1 %2041 }
 0x49d   : >> { %2267 = vrot.lane.b32.xlu1 %v5494_v22, %s4380_s0 }
 0x49e   : >> { %v2044_v32 = vpop.permute.xlu0 %2043 }
 0x49f   : >> { %v2056_v45 = vsel %vm843_vm2, %v2042_v21, %v2044_v32  ;;  %v2087_v47 = vadd.f32 %v2044_v32, %v1852_v14  ;;  %v1841_v21 = vadd.f32 %v5461_v18, %v5384_v24 }
 0x4a0   : >> { %v2086_v2 = vadd.f32 %v2056_v45, %v1851_v30  ;;  %v2055_v30 = vsel %vm843_vm2, %v2038_v60, %v2040_v59 }
 0x4a1   : >> { %v2151_v62 = vadd.f32 %v5453_v10, %v2087_v47  ;;  %2299 = vrot.lane.b32.xlu1 %v5510_v40, %s4378_s20  ;;  %v2076_v16 = vadd.f32 %v2051_v54, %v1841_v21 }
 0x4a2   : >> { %v2150_v7 = vadd.f32 %v5453_v10, %v2086_v2  ;;  %v2077_v10 = vadd.f32 %v2024_v52, %v1842_v51  ;;  %v1849_v52 = vadd.f32 %v1820_v28, %v5409_v43  ;;  %v1844_v43 = vadd.f32 %v5463_v19, %v5394_v34 }
 0x4a3   : >> { %v2140_v24 = vadd.f32 %v5445_v44, %v2076_v16  ;;  %v5577_v19 = vmax.f32 %v2151_v62, 0.0  ;;  %v1854_v51 = vadd.f32 %v5480_v17, %v5423_v11 }
 0x4a4   : >> { %v2141_v36 = vadd.f32 %v5445_v44, %v2077_v10  ;;  %v2084_v63 = vadd.f32 %v2055_v30, %v1849_v52  ;;  %v2052_v44 = vsel %vm843_vm2, %v2026_v48, %v2028_v29  ;;  %v2079_v25 = vadd.f32 %v2028_v29, %v1844_v43 }
 0x4a5   : >> { %2307 = vrot.lane.b32.xlu1 %v5517_v41, %s4378_s20  ;;  %v5552_v18 = vmax.f32 %v2140_v24, 0.0  ;;  %v2191_v29 = vsel %vm2170_vm6, %v5530_v13, 0.0 }
 0x4a6   : >> { %v5543_v14 = vmax.f32 %v2141_v36, 0.0  ;;  %v2148_v35 = vadd.f32 %v5451_v8, %v2084_v63  ;;  %v1843_v8 = vadd.f32 %v5467_v20, %v5390_v33  ;;  %v2143_v32 = vadd.f32 %v5443_v42, %v2079_v25  ;;  %v2030_v36 = vpop.permute.xlu1 %2029 }
 0x4a7   : >> { %v5581_v33 = vmax.f32 %v2150_v7, 0.0  ;;  %v1846_v7 = vadd.f32 %v5469_v23, %v5400_v37  ;;  %v1845_v23 = vadd.f32 %v5473_v26, %v5396_v27 }
 0x4a8   : >> { %v5557_v60 = vmax.f32 %v2148_v35, 0.0  ;;  %v2078_v59 = vadd.f32 %v2052_v44, %v1843_v8  ;;  %v5570_v47 = vmax.f32 %v2143_v32, 0.0  ;;  %v2175_v50 = vsel %vm2170_vm6, %v5543_v14, 0.0 }
 0x4a9   : >> { %v2176_v34 = vadd.f32 %v2175_v50, %v5552_v18 }
 0x4aa   : >> { %v2142_v45 = vadd.f32 %v5443_v42, %v2078_v59  ;;  %v2179_v48 = vsel %vm2170_vm6, %v5570_v47, 0.0  ;;  %v2195_v42 = vsel %vm2170_vm6, %v5577_v19, 0.0  ;;  %v2192_v62 = vadd.f32 %v2191_v29, %v5557_v60  ;;  %v2046_v17 = vpop.permute.xlu1 %2045 }
 0x4ab   : >> { %v2196_v38 = vadd.f32 %v2195_v42, %v5581_v33 }
 0x4ac   : >> { %v5574_v2 = vmax.f32 %v2142_v45, 0.0 }
 0x4ae   : >> { %v2180_v20 = vadd.f32 %v2179_v48, %v5574_v2 }
 0x4b0   : >> { %2189 = vadd.xlane.f32.xlu0 %v2188_v5  ;;  %v2032_v5 = vpop.permute.xlu0 %2031 }
 0x4b1   : >> { %v2081_v6 = vadd.f32 %v2032_v5, %v1846_v7  ;;  %v2053_v11 = vsel %vm843_vm2, %v2030_v36, %v2032_v5 }
 0x4b2   : >> { %v2080_v21 = vadd.f32 %v2053_v11, %v1845_v23 }
 0x4b3   : >> { %v2145_v10 = vadd.f32 %v5447_v4, %v2081_v6 }
 0x4b4   : >> { %v2048_v15 = vpop.permute.xlu0 %2047  ;;  %v2144_v26 = vadd.f32 %v5447_v4, %v2080_v21 }
 0x4b5   : >> { %v2089_v39 = vadd.f32 %v2048_v15, %v1854_v51  ;;  %v5597_v46 = vmax.f32 %v2145_v10, 0.0  ;;  %v2057_v28 = vsel %vm843_vm2, %v2046_v17, %v2048_v15 }
 0x4b6   : >> { %v5625_v16 = vmax.f32 %v2144_v26, 0.0 }
 0x4b7   : >> { %v2153_v54 = vadd.f32 %v5455_v12, %v2089_v39  ;;  %v2183_v52 = vsel %vm2170_vm6, %v5597_v46, 0.0 }
 0x4b8   : >> { %v2184_v24 = vadd.f32 %v2183_v52, %v5625_v16 }
 0x4b9   : >> { %v5604_v37 = vmax.f32 %v2153_v54, 0.0 }
 0x4c6   : >> { %2229 = vrot.lane.b32.xlu0 %v5530_v13, %s4378_s20 }
 0x4c9   : >> { %2173 = vadd.xlane.f32.xlu1 %v2172_v3  ;;  %v1853_v3 = vadd.f32 %v5484_v58, %v5420_v9 }
 0x4ca   : >> { %2261 = vrot.lane.b32.xlu0 %v5543_v14, %s4380_s0 }
 0x4cb   : >> { %v2088_v27 = vadd.f32 %v2057_v28, %v1853_v3 }
 0x4cd   : >> { %v2152_v30 = vadd.f32 %v5455_v12, %v2088_v27  ;;  %v2199_v12 = vsel %vm2170_vm6, %v5604_v37, 0.0 }
 0x4ce   : >> { %2269 = vrot.lane.b32.xlu0 %v5530_v13, %s4380_s0 }
 0x4cf   : >> { %v5632_v58 = vmax.f32 %v2152_v30, 0.0 }
 0x4d1   : >> { %v2200_v43 = vadd.f32 %v2199_v12, %v5632_v58 }
 0x4d2   : >> { %2301 = vrot.lane.b32.xlu0 %v5552_v18, %s4378_s20 }
 0x4d6   : >> { %2309 = vrot.lane.b32.xlu0 %v5557_v60, %s4378_s20 }
 0x4da   : >> { %2221 = vrot.lane.b32.xlu1 %v5543_v14, %s4378_s20 }
 0x4f5   : >> { %2177 = vadd.xlane.f32.xlu0 %v2176_v34 }
 0x4f9   : >> { %2181 = vadd.xlane.f32.xlu0 %v2180_v20 }
 0x4fd   : >> { %2197 = vadd.xlane.f32.xlu0 %v2196_v38 }
 0x4fe   : >> { %2193 = vadd.xlane.f32.xlu1 %v2192_v62 }
 0x503   : >> { %v2220_v25 = vpop.permute.xlu0 %2219 }
 0x507   : >> { %v2228_v9 = vpop.permute.xlu1 %2227 }
 0x50b   : >> { %v2260_v4 = vpop.permute.xlu1 %2259 }
 0x50f   : >> { %2223 = vrot.lane.b32.xlu1 %v5570_v47, %s4378_s20  ;;  %v2268_v63 = vpop.permute.xlu1 %2267 }
 0x513   : >> { %2231 = vrot.lane.b32.xlu1 %v5577_v19, %s4378_s20  ;;  %2225 = vrot.lane.b32.xlu0 %v5597_v46, %s4378_s20  ;;  %v2300_v35 = vpop.permute.xlu1 %2299 }
 0x517   : >> { %2263 = vrot.lane.b32.xlu1 %v5570_v47, %s4380_s0  ;;  %2233 = vrot.lane.b32.xlu0 %v5604_v37, %s4378_s20  ;;  %v2308_v44 = vpop.permute.xlu1 %2307 }
 0x51b   : >> { %2271 = vrot.lane.b32.xlu1 %v5577_v19, %s4380_s0  ;;  %2265 = vrot.lane.b32.xlu0 %v5597_v46, %s4380_s0 }
 0x51f   : >> { %2303 = vrot.lane.b32.xlu1 %v5574_v2, %s4378_s20  ;;  %2273 = vrot.lane.b32.xlu0 %v5604_v37, %s4380_s0  ;;  %s2453_s0 = scvt.s32.f32 %s3602_s24 }
 0x523   : >> { %2311 = vrot.lane.b32.xlu1 %v5581_v33, %s4378_s20  ;;  %2305 = vrot.lane.b32.xlu0 %v5625_v16, %s4378_s20 }
 0x527   : >> { %2313 = vrot.lane.b32.xlu0 %v5632_v58, %s4378_s20  ;;  %s2455_s20 = scalar_select %p2454_p3, 1, 0 }
 0x539   : >> { %v2190_v32 = vpop.xlane.xlu0 %2189 }
 0x53a   : >> { %v2207_v45 = vsub.f32 %v2190_v32, %v5494_v22  ;;  %v2255_v20 = vsub.f32 %v2190_v32, %v5517_v41 }
 0x53c   : >> { %v2247_v34 = vsub.f32 %v2207_v45, %v2228_v9  ;;  %v2327_v62 = vsub.f32 %v2255_v20, %v2308_v44 }
 0x53d   : >> { %v2230_v42 = vpop.permute.xlu0 %2229 }
 0x541   : >> { %v2262_v38 = vpop.permute.xlu0 %2261 }
 0x545   : >> { %v2270_v5 = vpop.permute.xlu0 %2269 }
 0x547   : >> { %2185 = vadd.xlane.f32.xlu1 %v2184_v24 }
 0x54b   : >> { %2201 = vadd.xlane.f32.xlu1 %v2200_v43 }
 0x552   : >> { %v2174_v8 = vpop.xlane.xlu1 %2173 }
 0x553   : >> { %v2203_v59 = vsub.f32 %v2174_v8, %v5488_v55  ;;  %v2251_v48 = vsub.f32 %v2174_v8, %v5510_v40  ;;  %v2287_v55 = vsub.f32 %v2255_v20, %v2268_v63  ;;  %v2302_v40 = vpop.permute.xlu0 %2301 }
 0x555   : >> { %v2243_v50 = vsub.f32 %v2203_v59, %v2220_v25  ;;  %v2283_v29 = vsub.f32 %v2251_v48, %v2260_v4  ;;  %v2323_v22 = vsub.f32 %v2251_v48, %v2300_v35 }
 0x556   : >> { %v2222_v15 = vpop.permute.xlu1 %2221 }
 0x557   : >> { %v2310_v7 = vpop.permute.xlu0 %2309 }
 0x55c   : >> { %2339 = vrot.lane.b32.xlu1 %v2243_v50, %s4381_s21 }
 0x560   : >> { %2347 = vrot.lane.b32.xlu1 %v2247_v34, %s4381_s21 }
 0x564   : >> { %2371 = vrot.lane.b32.xlu1 %v2283_v29, %s4382_s27 }
 0x568   : >> { %2379 = vrot.lane.b32.xlu1 %v2287_v55, %s4382_s27 }
 0x56c   : >> { %2403 = vrot.lane.b32.xlu1 %v2323_v22, %s4383_s16 }
 0x570   : >> { %2411 = vrot.lane.b32.xlu1 %v2327_v62, %s4383_s16 }
 0x57e   : >> { %v2178_v41 = vpop.xlane.xlu0 %2177 }
 0x57f   : >> { %v2204_v6 = vsub.f32 %v2178_v41, %v5543_v14  ;;  %v2252_v54 = vsub.f32 %v2178_v41, %v5552_v18 }
 0x581   : >> { %v2244_v51 = vsub.f32 %v2204_v6, %v2222_v15  ;;  %v2284_v3 = vsub.f32 %v2252_v54, %v2262_v38  ;;  %v2324_v4 = vsub.f32 %v2252_v54, %v2302_v40  ;;  %v5693_v40 = vstv %s2453_s0  ;;  %s3352_s0 = sshll.u32 (%p5811_p4), %s4518_s15, 4  ;;  %s3353_s0 = int_to_ptr.vmem [resolvable:$true] %s3352_s0 }
 0x582   : >> { %v2182_v10 = vpop.xlane.xlu0 %2181  ;;  %s4090_s23 = scalar_lea.vmem (%p5811_p4), %s3353_s0, 16 }
 0x583   : >> { %2341 = vrot.lane.b32.xlu0 %v2244_v51, %s4381_s21  ;;  %v2205_v11 = vsub.f32 %v2182_v10, %v5570_v47  ;;  %p4091_p7 = scmp.ne.s32.totalorder (%p5811_p4), %s3353_s0, %s4090_s23 }
 0x585   : > { %p4092_p8 = pnand (%p5811_p4), %p4091_p7, %p4498_p5 }
 0x586   : >> { %v2198_v17 = vpop.xlane.xlu0 %2197 }
 0x587   : >> { %v2194_v39 = vpop.xlane.xlu1 %2193  ;;  %v2209_v14 = vsub.f32 %v2198_v17, %v5577_v19  ;;  %v2257_v19 = vsub.f32 %v2198_v17, %v5581_v33  ;;  %p4093_p9 = pneg (%p5811_p4), %p4092_p8 }
 0x588   : >> { %v2208_v36 = vsub.f32 %v2194_v39, %v5530_v13  ;;  %v2256_v27 = vsub.f32 %v2194_v39, %v5557_v60  ;;  %v2253_v13 = vsub.f32 %v2182_v10, %v5574_v2 }
 0x58a   : >> { %v2248_v23 = vsub.f32 %v2208_v36, %v2230_v42  ;;  %v2288_v18 = vsub.f32 %v2256_v27, %v2270_v5  ;;  %v2328_v63 = vsub.f32 %v2256_v27, %v2310_v7  ;;  %v2226_v33 = vpop.permute.xlu0 %2225  ;;  %v5691_v5 = vstv %s2447_s30  ;;  %s3671_s30 = sshll.u32 (%p5811_p4), %s4481_s29, 4  ;;  %s4389_s29 = smov (%p5811_p4), [#allocation4]  }
 0x58b   : >> { %v2224_v21 = vpop.permute.xlu1 %2223  ;;  %s6414_s17 = scalar_lea.hbm (%p5811_p4), %s6465_s13, %s3671_s30  ;;  %s4094_s24 = sshll.u32 (%p5811_p4), %s4389_s29, 4  ;;  %s4095_s24 = int_to_ptr.vmem [resolvable:$false] %s4094_s24 }
 0x58c   : >> { %v2245_v28 = vsub.f32 %v2205_v11, %v2224_v21  ;;  %2349 = vrot.lane.b32.xlu0 %v2248_v23, %s4381_s21  ;;  %p4097_p10 = scmp.lt.s32.totalorder (%p5811_p4), %s3353_s0, %s4095_s24 }
 0x58e   : >> { %2343 = vrot.lane.b32.xlu1 %v2245_v28, %s4381_s21  ;;  %v2234_v43 = vpop.permute.xlu0 %2233 }
 0x58f   : >> { %v2232_v26 = vpop.permute.xlu1 %2231 }
 0x590   : >> { %v2249_v30 = vsub.f32 %v2209_v14, %v2232_v26  ;;  %2373 = vrot.lane.b32.xlu0 %v2284_v3, %s4382_s27 }
 0x592   : >> { %2351 = vrot.lane.b32.xlu1 %v2249_v30, %s4381_s21  ;;  %v2266_v59 = vpop.permute.xlu0 %2265 }
 0x593   : >> { %v2264_v47 = vpop.permute.xlu1 %2263 }
 0x594   : >> { %v2285_v9 = vsub.f32 %v2253_v13, %v2264_v47  ;;  %2381 = vrot.lane.b32.xlu0 %v2288_v18, %s4382_s27 }
 0x596   : >> { %2375 = vrot.lane.b32.xlu1 %v2285_v9, %s4382_s27  ;;  %v2274_v20 = vpop.permute.xlu0 %2273 }
 0x597   : >> { %v2272_v60 = vpop.permute.xlu1 %2271 }
 0x598   : >> { %v2289_v52 = vsub.f32 %v2257_v19, %v2272_v60  ;;  %2405 = vrot.lane.b32.xlu0 %v2324_v4, %s4383_s16 }
 0x59a   : >> { %2383 = vrot.lane.b32.xlu1 %v2289_v52, %s4382_s27  ;;  %v2306_v29 = vpop.permute.xlu0 %2305 }
 0x59b   : >> { %v2304_v2 = vpop.permute.xlu1 %2303 }
 0x59c   : >> { %v2325_v24 = vsub.f32 %v2253_v13, %v2304_v2  ;;  %2413 = vrot.lane.b32.xlu0 %v2328_v63, %s4383_s16 }
 0x59e   : >> { %2407 = vrot.lane.b32.xlu1 %v2325_v24, %s4383_s16 }
 0x59f   : >> { %v2312_v12 = vpop.permute.xlu1 %2311 }
 0x5a0   : >> { %v2329_v35 = vsub.f32 %v2257_v19, %v2312_v12  ;;  %v6501_v12 = vld [vmem:[#allocation14_spill] sm:$0xff] }
 0x5a2   : >> { %2415 = vrot.lane.b32.xlu1 %v2329_v35, %s4383_s16 }
 0x5d0   : >> { %v2186_v44 = vpop.xlane.xlu1 %2185 }
 0x5d1   : >> { %v2206_v25 = vsub.f32 %v2186_v44, %v5597_v46  ;;  %v2254_v50 = vsub.f32 %v2186_v44, %v5625_v16 }
 0x5d3   : >> { %v2246_v8 = vsub.f32 %v2206_v25, %v2226_v33  ;;  %v2286_v46 = vsub.f32 %v2254_v50, %v2266_v59  ;;  %v2326_v38 = vsub.f32 %v2254_v50, %v2306_v29  ;;  %v6507_v50 = vld [vmem:[#allocation11_spill] sm:$0xff] }
 0x5d4   : >> { %v2202_v32 = vpop.xlane.xlu1 %2201 }
 0x5d5   : >> { %v2210_v45 = vsub.f32 %v2202_v32, %v5604_v37  ;;  %2345 = vrot.lane.b32.xlu0 %v2246_v8, %s4381_s21  ;;  %v2258_v37 = vsub.f32 %v2202_v32, %v5632_v58  ;;  %v2314_v58 = vpop.permute.xlu0 %2313 }
 0x5d7   : >> { %v2250_v34 = vsub.f32 %v2210_v45, %v2234_v43  ;;  %v2290_v16 = vsub.f32 %v2258_v37, %v2274_v20  ;;  %v2330_v62 = vsub.f32 %v2258_v37, %v2314_v58  ;;  %v6503_v45 = vld [vmem:[#allocation22_spill] sm:$0xff]  ;;  %v6511_v58 = vld [vmem:[#allocation19_spill] sm:$0xff] }
 0x5d8   : >> { %v2340_v48 = vpop.permute.xlu1 %2339 }
 0x5d9   : >> { %2353 = vrot.lane.b32.xlu0 %v2250_v34, %s4381_s21  ;;  %s2456_s21 = scvt.s32.f32 %s2455_s20  ;;  %s4096_s20 = scalar_lea.vmem (%p5811_p4), %s4095_s24, 32 }
 0x5da   : > { %p4098_p11 = scmp.lt.s32.totalorder (%p5811_p4), %s4096_s20, %s4090_s23 }
 0x5db   : >> { %v5695_v7 = vstv %s2456_s21 }
 0x5dc   : >> { %v2348_v42 = vpop.permute.xlu1 %2347  ;;  %p4099_p12 = por (%p5811_p4), %p4098_p11, %p4097_p10 }
 0x5dd   : >> { %2377 = vrot.lane.b32.xlu0 %v2286_v46, %s4382_s27 }
 0x5de   : > { %p4100_p13 = pnand (%p5811_p4), %p4099_p12, %p4093_p9 }
 0x5e0   : >> { %v2372_v55 = vpop.permute.xlu1 %2371 }
 0x5e1   : >> { %2385 = vrot.lane.b32.xlu0 %v2290_v16, %s4382_s27  ;;  %v2428_v41 = vsel %vm2427_vm7, %v2340_v48, %v2372_v55  ;;  %v6509_v55 = vld [vmem:[#allocation24_spill] sm:$0xff] }
 0x5e4   : >> { %v2380_v22 = vpop.permute.xlu1 %2379 }
 0x5e5   : >> { %2409 = vrot.lane.b32.xlu0 %v2326_v38, %s4383_s16  ;;  %v2432_v36 = vsel %vm2427_vm7, %v2348_v42, %v2380_v22 }
 0x5e8   : >> { %v2404_v6 = vpop.permute.xlu1 %2403 }
 0x5e9   : >> { %v2437_v15 = vsel %vm2436_vm8, %v2428_v41, %v2404_v6  ;;  %2417 = vrot.lane.b32.xlu0 %v2330_v62, %s4383_s16  ;;  %v6513_v62 = vld [vmem:[#allocation13_spill] sm:$0xff]  ;;  %s6558_s16 = sand.u32 (%p5811_p4), 1, %s4250_s26  }
 0x5ea   : >> { %v2458_v51 = vmul.f32 %v5691_v5, %v2437_v15  ;;  %v2475_v10 = vmul.f32 %v5693_v40, %v2437_v15  ;;  %v2492_v39 = vmul.f32 %v5695_v7, %v2437_v15  ;;  %s3340_s22 = scalar_lea.sflag (%p5811_p4), [#allocation5], %s6558_s16 }
 0x5ec   : >> { %v5705_v1 = vadd.f32 %v4362_v1, %v2458_v51   ;;  %v5708_v57 = vadd.f32 %v4330_v57, %v2475_v10   ;;  %v5711_v49 = vadd.f32 %v4298_v49, %v2492_v39   ;;  %v2412_v54 = vpop.permute.xlu1 %2411  ;;  %v6515_v39 = vld [vmem:[#allocation21_spill] sm:$0xff] }
 0x5ed   : >> { %v2441_v21 = vsel %vm2436_vm8, %v2432_v36, %v2412_v54  ;;  %v6517_v54 = vld [vmem:[#allocation16_spill] sm:$0xff] }
 0x5ee   : >> { %v6493_v11 = vmov %v5705_v1  ;;  %v6494_v23 = vmov %v5708_v57  ;;  %v6495_v17 = vmov %v5711_v49  ;;  %v2462_v28 = vmul.f32 %v5691_v5, %v2441_v21 }
 0x5ef   : >> { %v2479_v3 = vmul.f32 %v5693_v40, %v2441_v21  ;;  %v2496_v14 = vmul.f32 %v5695_v7, %v2441_v21 }
 0x5f0   : >> { %v5718_v61 = vadd.f32 %v4346_v61, %v2462_v28   ;;  %v6519_v28 = vld [vmem:[#allocation10_spill] sm:$0xff] }
 0x5f1   : >> { %v5721_v53 = vadd.f32 %v4314_v53, %v2479_v3   ;;  %v5724_v31 = vadd.f32 %v4282_v31, %v2496_v14  }
 0x5f2   : >> { %v6496_v27 = vmov %v5718_v61 }
 0x5f3   : >> { %v6497_v26 = vmov %v5721_v53  ;;  %v6498_v30 = vmov %v5724_v31 }
 0x5f5   : >> { %v2342_v57 = vpop.permute.xlu0 %2341 }
 0x5fe   : >> { %v2350_v49 = vpop.permute.xlu0 %2349 }
 0x600   : >> { %v2344_v1 = vpop.permute.xlu1 %2343 }
 0x602   : >> { %v2374_v13 = vpop.permute.xlu0 %2373 }
 0x603   : >> { %v2429_v4 = vsel %vm2427_vm7, %v2342_v57, %v2374_v13 }
 0x604   : >> { %v2352_v18 = vpop.permute.xlu1 %2351 }
 0x606   : >> { %v2382_v47 = vpop.permute.xlu0 %2381 }
 0x607   : >> { %v2433_v31 = vsel %vm2427_vm7, %v2350_v49, %v2382_v47 }
 0x608   : >> { %v2376_v9 = vpop.permute.xlu1 %2375 }
 0x609   : >> { %v2430_v44 = vsel %vm2427_vm7, %v2344_v1, %v2376_v9 }
 0x60a   : >> { %v2406_v19 = vpop.permute.xlu0 %2405 }
 0x60b   : >> { %v2438_v60 = vsel %vm2436_vm8, %v2429_v4, %v2406_v19 }
 0x60c   : >> { %v2459_v61 = vmul.f32 %v5691_v5, %v2438_v60  ;;  %v2476_v52 = vmul.f32 %v5693_v40, %v2438_v60  ;;  %v2493_v53 = vmul.f32 %v5695_v7, %v2438_v60  ;;  %v2384_v63 = vpop.permute.xlu1 %2383 }
 0x60d   : >> { %v2434_v16 = vsel %vm2427_vm7, %v2352_v18, %v2384_v63 }
 0x60e   : >> { %v5733_v0 = vadd.f32 %v4358_v0, %v2459_v61   ;;  %v5736_v56 = vadd.f32 %v4326_v56, %v2476_v52   ;;  %v5739_v48 = vadd.f32 %v6501_v12, %v2493_v53   ;;  %v2414_v33 = vpop.permute.xlu0 %2413  ;;  %v6521_v61 = vld [vmem:[#allocation23_spill] sm:$0xff]  ;;  %v6525_v53 = vld [vmem:[#allocation12_spill] sm:$0xff] }
 0x60f   : >> { %v2442_v43 = vsel %vm2436_vm8, %v2433_v31, %v2414_v33 }
 0x610   : >> { %v6499_v2 = vmov %v5733_v0  ;;  %v6500_v24 = vmov %v5736_v56  ;;  %v6502_v35 = vmov %v5739_v48  ;;  %v2463_v25 = vmul.f32 %v5691_v5, %v2442_v43  ;;  %v2408_v32 = vpop.permute.xlu1 %2407  ;;  %v6505_v56 = vld [vmem:[#allocation17_spill] sm:$0xff] }
 0x611   : >> { %v2480_v8 = vmul.f32 %v5693_v40, %v2442_v43  ;;  %v2497_v59 = vmul.f32 %v5695_v7, %v2442_v43  ;;  %v2439_v0 = vsel %vm2436_vm8, %v2430_v44, %v2408_v32 }
 0x612   : >> { %v5748_v60 = vadd.f32 %v6503_v45, %v2463_v25   ;;  %v2460_v48 = vmul.f32 %v5691_v5, %v2439_v0  ;;  %v2477_v46 = vmul.f32 %v5693_v40, %v2439_v0  ;;  %v2494_v42 = vmul.f32 %v5695_v7, %v2439_v0  ;;  %v6529_v0 = vld [vmem:[#allocation15_spill] sm:$0xff] }
 0x613   : >> { %v5751_v52 = vadd.f32 %v6505_v56, %v2480_v8   ;;  %v5754_v29 = vadd.f32 %v6507_v50, %v2497_v59   ;;  %v6548_v56 = vmov %v6500_v24 }
 0x614   : >> { %v6504_v34 = vmov %v5748_v60  ;;  %v5761_v63 = vadd.f32 %v6509_v55, %v2460_v48   ;;  %v2416_v38 = vpop.permute.xlu1 %2415  ;;  %v5764_v55 = vadd.f32 %v6511_v58, %v2477_v46   ;;  %v5767_v47 = vadd.f32 %v6513_v62, %v2494_v42  }
 0x615   : >> { %v6506_v20 = vmov %v5751_v52  ;;  %v6508_v37 = vmov %v5754_v29  ;;  %v2443_v29 = vsel %vm2436_vm8, %v2434_v16, %v2416_v38  ;;  %v6523_v52 = vld [vmem:[#allocation18_spill] sm:$0xff]  ;;  %v6540_v48 = vmov %v6502_v35 }
 0x616   : >> { %v6510_v22 = vmov %v5761_v63  ;;  %v6512_v41 = vmov %v5764_v55  ;;  %v6514_v6 = vmov %v5767_v47  ;;  %v2464_v15 = vmul.f32 %v5691_v5, %v2443_v29 }
 0x617   : >> { %v2481_v51 = vmul.f32 %v5693_v40, %v2443_v29  ;;  %v2498_v10 = vmul.f32 %v5695_v7, %v2443_v29  ;;  %v6536_v29 = vmov %v6508_v37  ;;  %v6547_v55 = vmov %v6512_v41 }
 0x618   : >> { %v5774_v59 = vadd.f32 %v6515_v39, %v2464_v15  }
 0x619   : >> { %v5777_v51 = vadd.f32 %v6517_v54, %v2481_v51   ;;  %v5780_v45 = vadd.f32 %v6519_v28, %v2498_v10   ;;  %v2508_v28 = vld [vmem:[%s6459_s7] sm:$0xff] (%p5811_p4) }
 0x61a   : >> { %v6516_v36 = vmov %v5774_v59  ;;  %v6527_v59 = vld [vmem:[#allocation20_spill] sm:$0xff] }
 0x61b   : >> { %v6518_v21 = vmov %v5777_v51  ;;  %v6520_v3 = vmov %v5780_v45  ;;  %v6531_v45 = vld [vmem:[#allocation9_spill] sm:$0xff] }
 0x61c   : >> { %v6543_v51 = vmov %v6518_v21 }
 0x647   : >> { %v2346_v14 = vpop.permute.xlu0 %2345 }
 0x64b   : >> { %v2354_v57 = vpop.permute.xlu0 %2353 }
 0x64f   : >> { %v2378_v49 = vpop.permute.xlu0 %2377 }
 0x650   : >> { %v2431_v13 = vsel %vm2427_vm7, %v2346_v14, %v2378_v49  ;;  %v6541_v49 = vmov %v6495_v17 }
 0x653   : >> { %v2386_v1 = vpop.permute.xlu0 %2385 }
 0x654   : >> { %v2435_v60 = vsel %vm2427_vm7, %v2354_v57, %v2386_v1  ;;  %v6549_v57 = vmov %v6494_v23  ;;  %v6557_v1 = vmov %v6493_v11 }
 0x657   : >> { %v2410_v18 = vpop.permute.xlu0 %2409 }
 0x658   : >> { %v2440_v47 = vsel %vm2436_vm8, %v2431_v13, %v2410_v18 }
 0x659   : >> { %v2461_v9 = vmul.f32 %v5691_v5, %v2440_v47  ;;  %v2478_v4 = vmul.f32 %v5693_v40, %v2440_v47  ;;  %v2495_v19 = vmul.f32 %v5695_v7, %v2440_v47  ;;  %v6539_v47 = vmov %v6514_v6 }
 0x65a   : > { %v2511_v47 = vld [vmem:[%s6459_s7 + $0x18] sm:$0xff] (%p5811_p4) }
 0x65b   : >> { %v5789_v62 = vadd.f32 %v6521_v61, %v2461_v9   ;;  %v5792_v54 = vadd.f32 %v6523_v52, %v2478_v4   ;;  %v5795_v46 = vadd.f32 %v6525_v53, %v2495_v19   ;;  %v2418_v63 = vpop.permute.xlu0 %2417  ;;  %v6544_v52 = vmov %v6506_v20 }
 0x65c   : >> { %v2444_v31 = vsel %vm2436_vm8, %v2435_v60, %v2418_v63  ;;  %v6545_v53 = vmov %v6497_v26  ;;  %v6552_v60 = vmov %v6504_v34  ;;  %v6553_v61 = vmov %v6496_v27  ;;  %v2512_v52 = vld [vmem:[%s6459_s7 + $0x20] sm:$0xff] (%p5811_p4) }
 0x65d   : >> { %v6522_v12 = vmov %v5789_v62  ;;  %v6524_v33 = vmov %v5792_v54  ;;  %v6526_v43 = vmov %v5795_v46  ;;  %v2465_v44 = vmul.f32 %v5691_v5, %v2444_v31 }
 0x65e   : >> { %v2482_v25 = vmul.f32 %v5693_v40, %v2444_v31  ;;  %v2499_v8 = vmul.f32 %v5695_v7, %v2444_v31  ;;  %v6537_v31 = vmov %v6498_v30  ;;  %v6538_v46 = vmov %v6526_v43 }
 0x65f   : >> { %v5802_v58 = vadd.f32 %v6527_v59, %v2465_v44   ;;  %v6546_v54 = vmov %v6524_v33  ;;  %v6551_v59 = vmov %v6516_v36  ;;  %v6554_v62 = vmov %v6522_v12  ;;  %1418 = sbr.rel (!%p5811_p4) target bundleno = 784 (0x310), region = 169 }
 0x660   : >> { %v5805_v50 = vadd.f32 %v6529_v0, %v2482_v25   ;;  %v5808_v38 = vadd.f32 %v6531_v45, %v2499_v8   ;;  %v6535_v45 = vmov %v6520_v3  ;;  %v6555_v63 = vmov %v6510_v22  ;;  %v3620_v25 = vld [vmem:[%s6459_s7 + $0xc8] sm:$0xff] (%p5811_p4) }
 0x661   : >> { %v6528_v32 = vmov %v5802_v58  ;;  %v6556_v0 = vmov %v6499_v2  ;;  %v4384_v5 = vmov (%p5811_p4), 1   ;;  %v4385_v40 = vmov (%p5811_p4), 2  }
 0x662   : >> { %v6530_v42 = vmov %v5805_v50  ;;  %v6532_v16 = vmov %v5808_v38  ;;  %v6550_v58 = vmov %v6528_v32  ;;  %4051 = vset.pattern.permute.xlu0 (%p5811_p4), %v4384_v5  ;;  %4048 = vset.pattern.permute.xlu1 (%p5811_p4), %v4384_v5  ;;  %v4386_v7 = vmov (%p5811_p4), 0   ;;  %v3619_v0 = vld [vmem:[%s6459_s7 + $0xc0] sm:$0xff] (%p5811_p4) }
 0x663   : >> { %v6534_v38 = vmov %v6532_v16  ;;  %v6542_v50 = vmov %v6530_v42  ;;  %2609 = vperm.xlu0 (%p5811_p4), %4051, %v6522_v12   ;;  %2597 = vperm.xlu1 (%p5811_p4), %4048, %v6493_v11  }
 0x664   : > { %v3605_v50 = vld [vmem:[%s6459_s7 + $0x50] sm:$0xff] }
 0x667   : > { %2822 = vperm.xlu0 %4051, %v6500_v24   ;;  %2601 = vperm.xlu1 %4048, %v6499_v2  }
 0x66b   : > { %3043 = vperm.xlu0 %4051, %v6502_v35   ;;  %2605 = vperm.xlu1 %4048, %v6510_v22  }
 0x66f   : > { %2838 = vperm.xlu0 %4051, %v6506_v20   ;;  %4049 = vset.pattern.permute.xlu1 %v4385_v40 }
 0x670   : > { %2672 = vperm.xlu1 %4049, %v6499_v2  }
 0x673   : > { %3051 = vperm.xlu0 %4051, %v6526_v43  }
 0x674   : > { %4050 = vset.pattern.permute.xlu1 %v4386_v7 }
 0x675   : > { %2533 = vperm.xlu1 %4050, %v6522_v12  }
 0x677   : > { %4079 = vset.pattern.permute.xlu0 %v4386_v7 }
 0x678   : > { %2518 = vperm.xlu0 %4079, %v6493_v11  }
 0x679   : > { %4052 = vset.pattern.permute.xlu1 %v4385_v40 }
 0x67a   : > { %2676 = vperm.xlu1 %4052, %v6510_v22  }
 0x67c   : > { %2523 = vperm.xlu0 %4079, %v6499_v2   ;;  %v3604_v2 = vld [vmem:[%s6459_s7 + $0x48] sm:$0xff] }
 0x67e   : > { %4053 = vset.pattern.permute.xlu1 %v4386_v7 }
 0x67f   : > { %2740 = vperm.xlu1 %4053, %v6494_v23  }
 0x680   : > { %2528 = vperm.xlu0 %4079, %v6510_v22  }
 0x683   : > { %2538 = vperm.xlu1 %4053, %v6496_v27  }
 0x684   : > { %2745 = vperm.xlu0 %4079, %v6500_v24  }
 0x687   : > { %4054 = vset.pattern.permute.xlu1 %v4384_v5 }
 0x688   : > { %2548 = vperm.xlu0 %4079, %v6516_v36   ;;  %2613 = vperm.xlu1 %4054, %v6496_v27  }
 0x68c   : > { %2760 = vperm.xlu0 %4079, %v6497_v26   ;;  %4055 = vset.pattern.permute.xlu1 %v4386_v7 }
 0x68d   : > { %2750 = vperm.xlu1 %4055, %v6512_v41  }
 0x690   : > { %2553 = vperm.xlu0 %4079, %v6528_v32  }
 0x691   : > { %4056 = vset.pattern.permute.xlu1 %v4384_v5 }
 0x692   : > { %2818 = vperm.xlu1 %4056, %v6494_v23  }
 0x694   : > { %2765 = vperm.xlu0 %4079, %v6506_v20  }
 0x696   : > { %4057 = vset.pattern.permute.xlu1 %v4386_v7 }
 0x697   : > { %2543 = vperm.xlu1 %4057, %v6504_v34  }
 0x698   : > { %2976 = vperm.xlu0 %4079, %v6526_v43  }
 0x69b   : > { %4058 = vset.pattern.permute.xlu1 %v4384_v5 }
 0x69c   : > { %2991 = vperm.xlu0 %4079, %v6520_v3   ;;  %2617 = vperm.xlu1 %4058, %v6504_v34  }
 0x6a0   : > { %2996 = vperm.xlu0 %4079, %v6532_v16   ;;  %4059 = vset.pattern.permute.xlu1 %v4386_v7 }
 0x6a1   : > { %2755 = vperm.xlu1 %4059, %v6524_v33  }
 0x6a4   : > { %4087 = vset.pattern.permute.xlu0 %v4385_v40 }
 0x6a5   : > { %2668 = vperm.xlu0 %4087, %v6493_v11   ;;  %4060 = vset.pattern.permute.xlu1 %v4384_v5 }
 0x6a6   : > { %2826 = vperm.xlu1 %4060, %v6512_v41  }
 0x6a9   : > { %2680 = vperm.xlu0 %4087, %v6522_v12  }
 0x6aa   : > { %4061 = vset.pattern.permute.xlu1 %v4385_v40 }
 0x6ab   : > { %2893 = vperm.xlu1 %4061, %v6500_v24  }
 0x6ad   : > { %2684 = vperm.xlu0 %4087, %v6496_v27  }
 0x6af   : > { %4062 = vset.pattern.permute.xlu1 %v4384_v5 }
 0x6b0   : > { %2621 = vperm.xlu1 %4062, %v6516_v36  }
 0x6b1   : > { %2889 = vperm.xlu0 %4087, %v6494_v23   ;;  %v3603_v23 = vld [vmem:[%s6459_s7 + $0x40] sm:$0xff] }
 0x6b4   : > { %4063 = vset.pattern.permute.xlu1 %v4385_v40 }
 0x6b5   : > { %2897 = vperm.xlu0 %4087, %v6512_v41   ;;  %2688 = vperm.xlu1 %4063, %v6504_v34  }
 0x6b9   : > { %2901 = vperm.xlu0 %4087, %v6524_v33   ;;  %4064 = vset.pattern.permute.xlu1 %v4384_v5 }
 0x6ba   : > { %2830 = vperm.xlu1 %4064, %v6524_v33  }
 0x6bd   : > { %3114 = vperm.xlu0 %4087, %v6502_v35  }
 0x6be   : > { %4065 = vset.pattern.permute.xlu1 %v4386_v7 }
 0x6bf   : > { %2961 = vperm.xlu1 %4065, %v6495_v17  }
 0x6c1   : > { %2909 = vperm.xlu0 %4087, %v6506_v20  }
 0x6c3   : > { %2966 = vperm.xlu1 %4065, %v6502_v35   ;;  %v3606_v35 = vld [vmem:[%s6459_s7 + $0x58] sm:$0xff] }
 0x6c5   : > { %2913 = vperm.xlu0 %4087, %v6518_v21  }
 0x6c7   : > { %4066 = vset.pattern.permute.xlu1 %v4384_v5 }
 0x6c8   : > { %2625 = vperm.xlu1 %4066, %v6528_v32  }
 0x6c9   : > { %3122 = vperm.xlu0 %4087, %v6526_v43  }
 0x6cc   : > { %4067 = vset.pattern.permute.xlu1 %v4385_v40 }
 0x6cd   : > { %2692 = vperm.xlu1 %4067, %v6516_v36   ;;  %3130 = vperm.xlu0 %4087, %v6508_v37  }
 0x6d1   : > { %4068 = vset.pattern.permute.xlu1 %v4384_v5  ;;  %3138 = vperm.xlu0 %4087, %v6532_v16  }
 0x6d2   : > { %2834 = vperm.xlu1 %4068, %v6497_v26  }
 0x6d6   : > { %4069 = vset.pattern.permute.xlu1 %v4386_v7 }
 0x6d7   : > { %2971 = vperm.xlu1 %4069, %v6514_v6  }
 0x6db   : > { %4070 = vset.pattern.permute.xlu1 %v4384_v5 }
 0x6dc   : > { %3039 = vperm.xlu1 %4070, %v6495_v17  }
 0x6de   : > { %v2598_v11 = vpop.permute.xlu1 %2597  ;;  %v2610_v27 = vpop.permute.xlu0 %2609 }
 0x6df   : > { %v2628_v24 = vmul.f32 %v3603_v23, %v2598_v11  ;;  %v2631_v46 = vmul.f32 %v3606_v35, %v2610_v27  ;;  %v3621_v35 = vld [vmem:[%s6459_s7 + $0xd0] sm:$0xff] }
 0x6e0   : > { %4071 = vset.pattern.permute.xlu1 %v4385_v40 }
 0x6e1   : > { %2696 = vperm.xlu1 %4071, %v6528_v32   ;;  %v2636_v48 = vsel %vm2564_vm9, %v2628_v24, 0.0  ;;  %v2641_v62 = vsel %vm2564_vm9, %v2631_v46, 0.0  ;;  %v3607_v32 = vld [vmem:[%s6459_s7 + $0x60] sm:$0xff] }
 0x6e2   : > { %v2602_v34 = vpop.permute.xlu1 %2601  ;;  %v5981_v56 = vpop.permute.xlu0 %2822 }
 0x6e3   : > { %v2629_v20 = vmul.f32 %v3604_v2, %v2602_v34  ;;  %v3628_v34 = vld [vmem:[%s6459_s7 + $0x108] sm:$0xff] }
 0x6e5   : > { %v2637_v55 = vsel %vm2564_vm9, %v2629_v20, 0.0  ;;  %4072 = vset.pattern.permute.xlu1 %v4386_v7 }
 0x6e6   : > { %v2638_v22 = vadd.f32 %v2637_v55, %v2636_v48  ;;  %v2606_v38 = vpop.permute.xlu1 %2605  ;;  %2770 = vperm.xlu1 %4072, %v6518_v21   ;;  %v5990_v58 = vpop.permute.xlu0 %3043 }
 0x6e7   : > { %v2630_v41 = vmul.f32 %v3605_v50, %v2606_v38  ;;  %v2850_v38 = vmul.f32 %v3628_v34, %v5981_v56 }
 0x6e9   : > { %v2639_v29 = vsel %vm2564_vm9, %v2630_v41, 0.0 }
 0x6ea   : > { %v2640_v15 = vadd.f32 %v2639_v29, %v2638_v22  ;;  %4073 = vset.pattern.permute.xlu1 %v4385_v40  ;;  %v5995_v51 = vpop.permute.xlu0 %2838 }
 0x6eb   : > { %v5997_v10 = vpop.permute.xlu1 %2672  ;;  %2905 = vperm.xlu1 %4073, %v6497_v26   ;;  %v2509_v26 = vld [vmem:[%s6459_s7 + $0x8] sm:$0xff] }
 0x6ec   : > { %v2642_v39 = vadd.f32 %v2641_v62, %v2640_v15  ;;  %v3627_v15 = vld [vmem:[%s6459_s7 + $0x100] sm:$0xff] }
 0x6ee   : > { %v6000_v36 = vpop.permute.xlu0 %3051 }
 0x6ef   : > { %4074 = vset.pattern.permute.xlu1 %v4384_v5 }
 0x6f0   : > { %3047 = vperm.xlu1 %4074, %v6514_v6   ;;  %v2534_v54 = vpop.permute.xlu1 %2533 }
 0x6f1   : > { %v2559_v61 = vmul.f32 %v2534_v54, %v2511_v47 }
 0x6f3   : > { %v2519_v14 = vpop.permute.xlu0 %2518  ;;  %v2570_v44 = vsel %vm2564_vm9, %v2559_v61, 0.0  ;;  %v3622_v61 = vld [vmem:[%s6459_s7 + $0xd8] sm:$0xff] }
 0x6f4   : > { %v2556_v57 = vmul.f32 %v2519_v14, %v2508_v28  ;;  %4075 = vset.pattern.permute.xlu1 %v4385_v40  ;;  %v2858_v28 = vsel %vm2564_vm9, %v2850_v38, 0.0 }
 0x6f5   : > { %3110 = vperm.xlu1 %4075, %v6495_v17   ;;  %v6009_v49 = vpop.permute.xlu1 %2676  ;;  %v2510_v17 = vld [vmem:[%s6459_s7 + $0x10] sm:$0xff] }
 0x6f6   : > { %v2565_v13 = vsel %vm2564_vm9, %v2556_v57, 0.0  ;;  %v2513_v57 = vld [vmem:[%s6459_s7 + $0x28] sm:$0xff] }
 0x6f7   : > { %v2524_v1 = vpop.permute.xlu0 %2523 }
 0x6f8   : > { %v2557_v18 = vmul.f32 %v2524_v1, %v2509_v26 }
 0x6f9   : > { %4076 = vset.pattern.permute.xlu1 %v4386_v7 }
 0x6fa   : > { %v2566_v9 = vsel %vm2564_vm9, %v2557_v18, 0.0  ;;  %2775 = vperm.xlu1 %4076, %v6530_v42   ;;  %v2741_v4 = vpop.permute.xlu1 %2740 }
 0x6fb   : > { %v2567_v19 = vadd.f32 %v2566_v9, %v2565_v13  ;;  %v2529_v60 = vpop.permute.xlu0 %2528  ;;  %v2778_v2 = vmul.f32 %v3619_v0, %v2741_v4 }
 0x6fc   : > { %v2558_v12 = vmul.f32 %v2529_v60, %v2510_v17  ;;  %v3608_v17 = vld [vmem:[%s6459_s7 + $0x68] sm:$0xff] }
 0x6fd   : > { %v2786_v55 = vsel %vm2564_vm9, %v2778_v2, 0.0 }
 0x6fe   : > { %v2568_v33 = vsel %vm2564_vm9, %v2558_v12, 0.0  ;;  %4077 = vset.pattern.permute.xlu1 %v4384_v5  ;;  %v2539_v53 = vpop.permute.xlu1 %2538 }
 0x6ff   : > { %v2569_v43 = vadd.f32 %v2568_v33, %v2567_v19  ;;  %v2560_v63 = vmul.f32 %v2539_v53, %v2512_v52  ;;  %v2746_v31 = vpop.permute.xlu0 %2745  ;;  %2842 = vperm.xlu1 %4077, %v6518_v21   ;;  %v3612_v33 = vld [vmem:[%s6459_s7 + $0x88] sm:$0xff] }
 0x700   : > { %v2779_v11 = vmul.f32 %v3620_v25, %v2746_v31  ;;  %v3611_v31 = vld [vmem:[%s6459_s7 + $0x80] sm:$0xff] }
 0x701   : > { %v2571_v8 = vadd.f32 %v2570_v44, %v2569_v43  ;;  %v2572_v59 = vsel %vm2564_vm9, %v2560_v63, 0.0  ;;  %v3613_v63 = vld [vmem:[%s6459_s7 + $0x90] sm:$0xff]  ;;  %v2700_v44 = vmul.f32 %v3612_v33, %v5997_v10 }
 0x702   : > { %v2787_v20 = vsel %vm2564_vm9, %v2779_v11, 0.0 }
 0x703   : > { %v2573_v45 = vadd.f32 %v2572_v59, %v2571_v8  ;;  %4078 = vset.pattern.permute.xlu1 %v4386_v7  ;;  %v2614_v21 = vpop.permute.xlu1 %2613  ;;  %v6042_v23 = vpop.permute.xlu0 %2548  ;;  %v2788_v41 = vadd.f32 %v2787_v20, %v2786_v55  ;;  %v3629_v8 = vld [vmem:[%s6459_s7 + $0x110] sm:$0xff]  ;;  %v2708_v10 = vsel %vm2564_vm9, %v2700_v44, 0.0 }
 0x704   : > { %v2632_v27 = vmul.f32 %v3607_v32, %v2614_v21  ;;  %2981 = vperm.xlu1 %4078, %v6498_v30  }
 0x706   : > { %v2643_v24 = vsel %vm2564_vm9, %v2632_v27, 0.0 }
 0x707   : > { %v2644_v50 = vadd.f32 %v2643_v24, %v2642_v39  ;;  %v6053_v48 = vpop.permute.xlu0 %2760 }
 0x708   : > { %4080 = vset.pattern.permute.xlu1 %v4385_v40  ;;  %v2751_v46 = vpop.permute.xlu1 %2750 }
 0x709   : > { %v2780_v22 = vmul.f32 %v3621_v35, %v2751_v46  ;;  %3118 = vperm.xlu1 %4080, %v6514_v6  }
 0x70b   : > { %v2789_v62 = vsel %vm2564_vm9, %v2780_v22, 0.0  ;;  %v6060_v29 = vpop.permute.xlu0 %2553  ;;  %v3609_v22 = vld [vmem:[%s6459_s7 + $0x70] sm:$0xff] }
 0x70c   : > { %v2790_v39 = vadd.f32 %v2789_v62, %v2788_v41 }
 0x70d   : > { %4081 = vset.pattern.permute.xlu1 %v4384_v5  ;;  %v2819_v54 = vpop.permute.xlu1 %2818 }
 0x70e   : > { %v2849_v14 = vmul.f32 %v3627_v15, %v2819_v54  ;;  %2846 = vperm.xlu1 %4081, %v6530_v42   ;;  %v3616_v54 = vld [vmem:[%s6459_s7 + $0xa8] sm:$0xff] }
 0x70f   : > { %v6068_v6 = vpop.permute.xlu0 %2765 }
 0x710   : > { %v2857_v56 = vsel %vm2564_vm9, %v2849_v14, 0.0 }
 0x711   : > { %v2859_v26 = vadd.f32 %v2858_v28, %v2857_v56 }
 0x712   : > { %4082 = vset.pattern.permute.xlu1 %v4386_v7  ;;  %v2544_v1 = vpop.permute.xlu1 %2543 }
 0x713   : > { %v2561_v13 = vmul.f32 %v2544_v1, %v2513_v57  ;;  %2986 = vperm.xlu1 %4082, %v6508_v37   ;;  %v6076_v18 = vpop.permute.xlu0 %2976 }
 0x715   : > { %v2574_v47 = vsel %vm2564_vm9, %v2561_v13, 0.0 }
 0x716   : > { %v6082_v9 = vadd.f32 %v2574_v47, %v2573_v45 }
 0x717   : > { %4083 = vset.pattern.permute.xlu1 %v4384_v5  ;;  %v2618_v4 = vpop.permute.xlu1 %2617  ;;  %v6085_v19 = vpop.permute.xlu0 %2991 }
 0x718   : > { %v2633_v7 = vmul.f32 %v3608_v17, %v2618_v4  ;;  %3055 = vperm.xlu1 %4083, %v6498_v30   ;;  %v3630_v17 = vld [vmem:[%s6459_s7 + $0x118] sm:$0xff] }
 0x71a   : > { %v2645_v60 = vsel %vm2564_vm9, %v2633_v7, 0.0 }
 0x71b   : > { %v2646_v12 = vadd.f32 %v2645_v60, %v2644_v50  ;;  %v6092_v52 = vpop.permute.xlu0 %2996 }
 0x71c   : > { %4084 = vset.pattern.permute.xlu1 %v4385_v40  ;;  %v2756_v53 = vpop.permute.xlu1 %2755 }
 0x71d   : > { %v2781_v43 = vmul.f32 %v3622_v61, %v2756_v53  ;;  %2917 = vperm.xlu1 %4084, %v6530_v42   ;;  %v2701_v42 = vmul.f32 %v3613_v63, %v6009_v49  ;;  %v3614_v49 = vld [vmem:[%s6459_s7 + $0x98] sm:$0xff] }
 0x71f   : > { %v2791_v25 = vsel %vm2564_vm9, %v2781_v43, 0.0  ;;  %v2710_v35 = vsel %vm2564_vm9, %v2701_v42, 0.0  ;;  %v3643_v43 = vld [vmem:[%s6459_s7 + $0x180] sm:$0xff] }
 0x720   : > { %v6110_v59 = vadd.f32 %v2791_v25, %v2790_v39  ;;  %v2669_v32 = vpop.permute.xlu0 %2668 }
 0x721   : > { %v2699_v0 = vmul.f32 %v3611_v31, %v2669_v32  ;;  %4085 = vset.pattern.permute.xlu1 %v4384_v5  ;;  %v2827_v45 = vpop.permute.xlu1 %2826  ;;  %v3610_v32 = vld [vmem:[%s6459_s7 + $0x78] sm:$0xff] }
 0x722   : > { %v2851_v11 = vmul.f32 %v3629_v8, %v2827_v45  ;;  %3059 = vperm.xlu1 %4085, %v6508_v37   ;;  %v3615_v37 = vld [vmem:[%s6459_s7 + $0xa0] sm:$0xff]  ;;  %v3177_v45 = vld [vmem:[%s6461_s9 + $0x18] sm:$0x1] }
 0x723   : > { %v2707_v21 = vsel %vm2564_vm9, %v2699_v0, 0.0  ;;  %v4387_v0 = vmov 0.0  }
 0x724   : > { %v2709_v27 = vadd.f32 %v2708_v10, %v2707_v21  ;;  %v2860_v2 = vsel %vm2564_vm9, %v2851_v11, 0.0  ;;  %v2681_v24 = vpop.permute.xlu0 %2680  ;;  %3689 = vmatprep.subr.mxu0 %v4387_v0  ;;  %v3176_v11 = vld [vmem:[%s6461_s9 + $0x10] sm:$0xff]  ;;  %3700 = vmatprep.subr.mxu1 %v4387_v0 }
 0x725   : > { %v2861_v34 = vadd.f32 %v2860_v2, %v2859_v26  ;;  %v2702_v55 = vmul.f32 %v3614_v49, %v2681_v24  ;;  %v2515_v26 = vld [vmem:[%s6459_s7 + $0x38] sm:$0xff]  ;;  %3690 = vmatpush3.msk.msra.mxu0 %vm3182_vm10, %v3177_v45  ;;  %3697 = vmatprep.mubr.msk.f32.mxu0 %vm4388_vm11, %v4387_v0  ;;  %v3175_v2 = vld [vmem:[%s6461_s9 + $0x8] sm:$0xff] }
 0x726   : > { %v2711_v20 = vadd.f32 %v2710_v35, %v2709_v27  ;;  %4086 = vset.pattern.permute.xlu1 %v4385_v40  ;;  %v6123_v50 = vpop.permute.xlu1 %2893  ;;  %3691 = vmatprep.subr.mxu0 %v4387_v0  ;;  %v3617_v35 = vld [vmem:[%s6459_s7 + $0xb0] sm:$0xff] }
 0x727   : > { %3126 = vperm.xlu1 %4086, %v6498_v30   ;;  %v2514_v30 = vld [vmem:[%s6459_s7 + $0x30] sm:$0xff]  ;;  %v2712_v15 = vsel %vm2564_vm9, %v2702_v55, 0.0  ;;  %3708 = vmatprep.mubr.msk.f32.mxu1 %vm4388_vm11, %v4387_v0 }
 0x728   : > { %v2685_v46 = vpop.permute.xlu0 %2684  ;;  %v2713_v56 = vadd.f32 %v2712_v15, %v2711_v20  ;;  %3692 = vmatpush3.msra.mxu0 %v3176_v11  ;;  %v3623_v11 = vld [vmem:[%s6459_s7 + $0xe0] sm:$0xff] }
 0x729   : > { %v2703_v38 = vmul.f32 %v3615_v37, %v2685_v46  ;;  %3693 = vmatprep.subr.mxu0 %v4387_v0 }
 0x72a   : > { %3694 = vmatpush3.msra.mxu0 %v3175_v2  ;;  %v3653_v2 = vld [vmem:[%s6459_s7 + $0x1d0] sm:$0xff] }
 0x72b   : > { %4088 = vset.pattern.permute.xlu1 %v4384_v5  ;;  %v2622_v41 = vpop.permute.xlu1 %2621  ;;  %v2714_v28 = vsel %vm2564_vm9, %v2703_v38, 0.0  ;;  %v2562_v5 = vmul.f32 %v6042_v23, %v2514_v30  ;;  %v2563_v23 = vmul.f32 %v6060_v29, %v2515_v26  ;;  %3695 = vmatprep.subr.mxu0 %v4387_v0  ;;  %v3258_v38 = vld [vmem:[%s6463_s11 + $0x10] sm:$0xff] }
 0x72c   : > { %v2634_v62 = vmul.f32 %v3609_v22, %v2622_v41  ;;  %3063 = vperm.xlu1 %4088, %v6520_v3   ;;  %v2715_v13 = vadd.f32 %v2714_v28, %v2713_v56  ;;  %v3259_v22 = vld [vmem:[%s6463_s11 + $0x18] sm:$0x1]  ;;  %v3632_v41 = vld [vmem:[%s6459_s7 + $0x128] sm:$0xff] }
 0x72d   : > { %v2576_v4 = vsel %vm2564_vm9, %v2562_v5, 0.0  ;;  %3701 = vmatpush3.msk.msra.mxu1 %vm3182_vm10, %v3259_v22  ;;  %v2854_v5 = vmul.f32 %v3632_v41, %v5995_v51 }
 0x72e   : > { %v2647_v39 = vsel %vm2564_vm9, %v2634_v62, 0.0  ;;  %v2577_v61 = vadd.f32 %v2576_v4, %v6082_v9  ;;  %3702 = vmatprep.subr.mxu1 %v4387_v0 }
 0x72f   : > { %v2648_v14 = vadd.f32 %v2647_v39, %v2646_v12  ;;  %v2578_v12 = vsel %vm2564_vm9, %v2563_v23, 0.0  ;;  %v3631_v39 = vld [vmem:[%s6459_s7 + $0x120] sm:$0xff]  ;;  %3703 = vmatpush3.msra.mxu1 %v3258_v38  ;;  %v2866_v4 = vsel %vm2564_vm9, %v2854_v5, 0.0  ;;  %v3625_v38 = vld [vmem:[%s6459_s7 + $0xf0] sm:$0xff] }
 0x730   : > { %3067 = vperm.xlu1 %4088, %v6532_v16   ;;  %v2689_v57 = vpop.permute.xlu1 %2688  ;;  %v2579_v29 = vadd.f32 %v2578_v12, %v2577_v61  ;;  %3704 = vmatprep.subr.mxu1 %v4387_v0 }
 0x731   : > { %v2704_v1 = vmul.f32 %v3616_v54, %v2689_v57 }
 0x732   : > { %v2580_v44 = vrot.slane %v2579_v29, 4 }
 0x733   : > { %v2716_v47 = vsel %vm2564_vm9, %v2704_v1, 0.0 }
 0x734   : > { %v2717_v7 = vadd.f32 %v2716_v47, %v2715_v13  ;;  %4089 = vset.pattern.permute.xlu1 %v4385_v40  ;;  %v3644_v40 = vld [vmem:[%s6459_s7 + $0x188] sm:$0xff]  ;;  %v2581_v10 = vadd.f32 %v2580_v44, %v2579_v29  ;;  %v3645_v13 = vld [vmem:[%s6459_s7 + $0x190] sm:$0xff] }
 0x735   : > { %3134 = vperm.xlu1 %4089, %v6520_v3   ;;  %v2831_v16 = vpop.permute.xlu1 %2830 }
 0x736   : > { %v2852_v60 = vmul.f32 %v3630_v17, %v2831_v16  ;;  %v2582_v49 = vrot.slane %v2581_v10, 2 }
 0x738   : > { %v2862_v33 = vsel %vm2564_vm9, %v2852_v60, 0.0  ;;  %v2583_v62 = vadd.f32 %v2582_v49, %v2581_v10  ;;  %v3624_v49 = vld [vmem:[%s6459_s7 + $0xe8] sm:$0xff] }
 0x739   : > { %v2863_v53 = vadd.f32 %v2862_v33, %v2861_v34  ;;  %v3174_v34 = vld [vmem:[%s6461_s9] sm:$0xff]  ;;  %v2783_v41 = vmul.f32 %v3624_v49, %v6068_v6  ;;  %v2890_v6 = vpop.permute.xlu0 %2889 }
 0x73a   : > { %v2962_v63 = vpop.permute.xlu1 %2961  ;;  %3696 = vmatpush3.msra.mxu0 %v3174_v34  ;;  %v2584_v57 = vrot.slane %v2583_v62, 1 }
 0x73b   : > { %v2999_v3 = vmul.f32 %v3643_v43, %v2962_v63  ;;  %v3618_v63 = vld [vmem:[%s6459_s7 + $0xb8] sm:$0xff]  ;;  %v2795_v5 = vsel %vm2564_vm9, %v2783_v41, 0.0 }
 0x73d   : > { %v3007_v9 = vsel %vm2564_vm9, %v2999_v3, 0.0 }
 0x73e   : > { %v2967_v31 = vpop.permute.xlu1 %2966 }
 0x73f   : > { %v3000_v25 = vmul.f32 %v3644_v40, %v2967_v31 }
 0x741   : > { %v3008_v8 = vsel %vm2564_vm9, %v3000_v25, 0.0  ;;  %v3651_v25 = vld [vmem:[%s6459_s7 + $0x1c0] sm:$0xff] }
 0x742   : > { %v3009_v42 = vadd.f32 %v3008_v8, %v3007_v9  ;;  %v3652_v8 = vld [vmem:[%s6459_s7 + $0x1c8] sm:$0xff] }
 0x743   : > { %v2626_v21 = vpop.permute.xlu1 %2625  ;;  %v3071_v10 = vmul.f32 %v3652_v8, %v5990_v58 }
 0x744   : > { %v2635_v27 = vmul.f32 %v3610_v32, %v2626_v21 }
 0x745   : > { %v3079_v58 = vsel %vm2564_vm9, %v3071_v10, 0.0  ;;  %v3647_v10 = vld [vmem:[%s6459_s7 + $0x1a0] sm:$0xff] }
 0x746   : > { %v2649_v24 = vsel %vm2564_vm9, %v2635_v27, 0.0  ;;  %v3654_v27 = vld [vmem:[%s6459_s7 + $0x1d8] sm:$0xff] }
 0x747   : > { %v2650_v20 = vadd.f32 %v2649_v24, %v2648_v14  ;;  %v2782_v24 = vmul.f32 %v3623_v11, %v6053_v48  ;;  %v3638_v11 = vld [vmem:[%s6459_s7 + $0x158] sm:$0xff] }
 0x748   : > { %v2693_v37 = vpop.permute.xlu1 %2692 }
 0x749   : > { %v2651_v46 = vrot.slane %v2650_v20, 4  ;;  %v2705_v55 = vmul.f32 %v3617_v35, %v2693_v37  ;;  %v3073_v37 = vmul.f32 %v3654_v27, %v6000_v36  ;;  %v2793_v48 = vsel %vm2564_vm9, %v2782_v24, 0.0  ;;  %v3634_v24 = vld [vmem:[%s6459_s7 + $0x138] sm:$0xff] }
 0x74a   : > { %v2794_v36 = vadd.f32 %v2793_v48, %v6110_v59 }
 0x74b   : > { %v2652_v30 = vadd.f32 %v2651_v46, %v2650_v20  ;;  %v2718_v15 = vsel %vm2564_vm9, %v2705_v55, 0.0 }
 0x74c   : > { %v2719_v54 = vadd.f32 %v2718_v15, %v2717_v7  ;;  %v2585_v7 = vadd.f32 %v2584_v57, %v2583_v62 }
 0x74d   : > { %v2653_v28 = vrot.slane %v2652_v30, 2  ;;  %v2835_v14 = vpop.permute.xlu1 %2834 }
 0x74e   : > { %v2853_v56 = vmul.f32 %v3631_v39, %v2835_v14  ;;  %v3083_v39 = vsel %vm2564_vm9, %v3073_v37, 0.0 }
 0x74f   : > { %v2654_v26 = vadd.f32 %v2653_v28, %v2652_v30 }
 0x750   : > { %v2864_v1 = vsel %vm2564_vm9, %v2853_v56, 0.0  ;;  %v3626_v56 = vld [vmem:[%s6459_s7 + $0xf8] sm:$0xff] }
 0x751   : > { %v2655_v47 = vrot.slane %v2654_v26, 1  ;;  %v2865_v17 = vadd.f32 %v2864_v1, %v2863_v53 }
 0x752   : > { %v2972_v23 = vpop.permute.xlu1 %2971 }
 0x753   : > { %v2656_v16 = vadd.f32 %v2655_v47, %v2654_v26  ;;  %v3001_v60 = vmul.f32 %v3645_v13, %v2972_v23  ;;  %v6216_v51 = vadd.f32 %v2866_v4, %v2865_v17  ;;  %v2796_v26 = vadd.f32 %v2795_v5, %v2794_v36  ;;  %v2898_v23 = vpop.permute.xlu0 %2897 }
 0x755   : > { %v2657_v61 = vadd.f32 %v2656_v16, %v2585_v7  ;;  %v3010_v12 = vsel %vm2564_vm9, %v3001_v60, 0.0 }
 0x756   : > { %v6219_v33 = vadd.f32 %v3010_v12, %v3009_v42 }
 0x757   : > { %v3040_v43 = vpop.permute.xlu1 %3039  ;;  %v2902_v12 = vpop.permute.xlu0 %2901 }
 0x758   : > { %v3070_v32 = vmul.f32 %v3651_v25, %v3040_v43  ;;  %v2923_v49 = vmul.f32 %v3638_v11, %v2902_v12 }
 0x75a   : > { %v3078_v35 = vsel %vm2564_vm9, %v3070_v32, 0.0 }
 0x75b   : > { %v3080_v22 = vadd.f32 %v3079_v58, %v3078_v35 }
 0x75c   : > { %v2697_v29 = vpop.permute.xlu1 %2696 }
 0x75d   : > { %v2706_v53 = vmul.f32 %v3618_v63, %v2697_v29  ;;  %v3633_v63 = vld [vmem:[%s6459_s7 + $0x130] sm:$0xff]  ;;  %v3635_v29 = vld [vmem:[%s6459_s7 + $0x140] sm:$0xff] }
 0x75e   : > { %v2920_v8 = vmul.f32 %v3635_v29, %v2890_v6 }
 0x75f   : > { %v2720_v40 = vsel %vm2564_vm9, %v2706_v53, 0.0  ;;  %v3646_v53 = vld [vmem:[%s6459_s7 + $0x198] sm:$0xff] }
 0x760   : > { %v2721_v3 = vadd.f32 %v2720_v40, %v2719_v54 }
 0x761   : > { %v2771_v31 = vpop.permute.xlu1 %2770 }
 0x762   : > { %v2722_v44 = vrot.slane %v2721_v3, 4  ;;  %v2784_v54 = vmul.f32 %v3625_v38, %v2771_v31  ;;  %v3637_v31 = vld [vmem:[%s6459_s7 + $0x150] sm:$0xff] }
 0x763   : > { %v2922_v27 = vmul.f32 %v3637_v31, %v2898_v23 }
 0x764   : > { %v2723_v9 = vadd.f32 %v2722_v44, %v2721_v3  ;;  %v2797_v57 = vsel %vm2564_vm9, %v2784_v54, 0.0  ;;  %v3636_v3 = vld [vmem:[%s6459_s7 + $0x148] sm:$0xff]  ;;  %v6283_v44 = vpop.permute.xlu0 %3114  ;;  %v2933_v54 = vsel %vm2564_vm9, %v2923_v49, 0.0  ;;  %v3659_v49 = vld [vmem:[%s6459_s7 + $0x200] sm:$0xff] }
 0x765   : > { %v2798_v47 = vadd.f32 %v2797_v57, %v2796_v26  ;;  %v2931_v38 = vsel %vm2564_vm9, %v2922_v27, 0.0 }
 0x766   : > { %v2724_v42 = vrot.slane %v2723_v9, 2  ;;  %v6231_v45 = vpop.permute.xlu1 %2905 }
 0x768   : > { %v2725_v21 = vadd.f32 %v2724_v42, %v2723_v9  ;;  %v3002_v42 = vmul.f32 %v3646_v53, %v6076_v18  ;;  %v3639_v18 = vld [vmem:[%s6459_s7 + $0x160] sm:$0xff] }
 0x769   : > { %v2924_v48 = vmul.f32 %v3639_v18, %v6231_v45 }
 0x76a   : > { %v2726_v34 = vrot.slane %v2725_v21, 1  ;;  %v3012_v37 = vsel %vm2564_vm9, %v3002_v42, 0.0 }
 0x76b   : > { %v3048_v20 = vpop.permute.xlu1 %3047  ;;  %v3013_v6 = vadd.f32 %v3012_v37, %v6219_v33  ;;  %v3661_v37 = vld [vmem:[%s6459_s7 + $0x210] sm:$0xff] }
 0x76c   : > { %v2727_v46 = vadd.f32 %v2726_v34, %v2725_v21  ;;  %v3072_v55 = vmul.f32 %v3653_v2, %v3048_v20  ;;  %v2921_v21 = vmul.f32 %v3636_v3, %v6123_v50  ;;  %v2928_v34 = vsel %vm2564_vm9, %v2920_v8, 0.0  ;;  %v2910_v50 = vpop.permute.xlu0 %2909 }
 0x76e   : > { %v2728_v62 = vadd.f32 %v2727_v46, %v2657_v61  ;;  %v3081_v30 = vsel %vm2564_vm9, %v3072_v55, 0.0  ;;  %v3649_v55 = vld [vmem:[%s6459_s7 + $0x1b0] sm:$0xff] }
 0x76f   : > { %v3082_v15 = vadd.f32 %v3081_v30, %v3080_v22  ;;  %v2929_v22 = vsel %vm2564_vm9, %v2921_v21, 0.0  ;;  %v3640_v30 = vld [vmem:[%s6459_s7 + $0x168] sm:$0xff]  ;;  %v3005_v45 = vmul.f32 %v3649_v55, %v6085_v19 }
 0x770   : > { %v6257_v28 = vpop.permute.xlu1 %3110  ;;  %v2925_v26 = vmul.f32 %v3640_v30, %v2910_v50  ;;  %v2914_v23 = vpop.permute.xlu0 %2913 }
 0x771   : > { %v6260_v14 = vadd.f32 %v3083_v39, %v3082_v15  ;;  %v3648_v39 = vld [vmem:[%s6459_s7 + $0x1a8] sm:$0xff]  ;;  %v3141_v55 = vmul.f32 %v3659_v49, %v6257_v28 }
 0x772   : > { %v2937_v12 = vsel %vm2564_vm9, %v2925_v26, 0.0 }
 0x774   : > { %v3123_v30 = vpop.permute.xlu0 %3122 }
 0x775   : > { %v2776_v1 = vpop.permute.xlu1 %2775 }
 0x776   : > { %v2785_v13 = vmul.f32 %v3626_v56, %v2776_v1  ;;  %v2935_v1 = vsel %vm2564_vm9, %v2924_v48, 0.0 }
 0x778   : > { %v2799_v17 = vsel %vm2564_vm9, %v2785_v13, 0.0 }
 0x779   : > { %v2800_v4 = vadd.f32 %v2799_v17, %v2798_v47 }
 0x77a   : > { %v2843_v59 = vpop.permute.xlu1 %2842 }
 0x77b   : > { %v2801_v7 = vrot.slane %v2800_v4, 4  ;;  %v2855_v25 = vmul.f32 %v3633_v63, %v2843_v59 }
 0x77d   : > { %v2802_v16 = vadd.f32 %v2801_v7, %v2800_v4  ;;  %v2868_v35 = vsel %vm2564_vm9, %v2855_v25, 0.0  ;;  %v3641_v4 = vld [vmem:[%s6459_s7 + $0x170] sm:$0xff] }
 0x77e   : > { %v2869_v41 = vadd.f32 %v2868_v35, %v6216_v51  ;;  %v3650_v51 = vld [vmem:[%s6459_s7 + $0x1b8] sm:$0xff] }
 0x77f   : > { %v2803_v60 = vrot.slane %v2802_v16, 2  ;;  %v2982_v61 = vpop.permute.xlu1 %2981  ;;  %v3006_v59 = vmul.f32 %v3650_v51, %v6092_v52  ;;  %v3642_v52 = vld [vmem:[%s6459_s7 + $0x178] sm:$0xff] }
 0x780   : > { %v3003_v20 = vmul.f32 %v3647_v10, %v2982_v61  ;;  %v3018_v61 = vsel %vm2564_vm9, %v3005_v45, 0.0 }
 0x781   : > { %v2804_v43 = vadd.f32 %v2803_v60, %v2802_v16 }
 0x782   : > { %v3014_v36 = vsel %vm2564_vm9, %v3003_v20, 0.0 }
 0x783   : > { %v2805_v40 = vrot.slane %v2804_v43, 1  ;;  %v3015_v19 = vadd.f32 %v3014_v36, %v3013_v6  ;;  %v3149_v36 = vsel %vm2564_vm9, %v3141_v55, 0.0  ;;  %v3657_v6 = vld [vmem:[%s6459_s7 + $0x1f0] sm:$0xff] }
 0x784   : > { %v6285_v9 = vpop.permute.xlu1 %3118 }
 0x785   : > { %v2806_v32 = vadd.f32 %v2805_v40, %v2804_v43  ;;  %v2926_v43 = vmul.f32 %v3641_v4, %v2914_v23  ;;  %v3020_v40 = vsel %vm2564_vm9, %v3006_v59, 0.0  ;;  %v3143_v48 = vmul.f32 %v3661_v37, %v6285_v9  ;;  %v3663_v9 = vld [vmem:[%s6459_s7 + $0x220] sm:$0xff]  ;;  %v3131_v4 = vpop.permute.xlu0 %3130 }
 0x787   : > { %v2807_v2 = vadd.f32 %v2806_v32, %v2728_v62  ;;  %v2930_v62 = vadd.f32 %v2929_v22, %v2928_v34  ;;  %v2939_v8 = vsel %vm2564_vm9, %v2926_v43, 0.0  ;;  %v3660_v34 = vld [vmem:[%s6459_s7 + $0x208] sm:$0xff]  ;;  %v3655_v22 = vld [vmem:[%s6459_s7 + $0x1e0] sm:$0xff] }
 0x789   : > { %v2847_v58 = vpop.permute.xlu1 %2846  ;;  %v2932_v56 = vadd.f32 %v2931_v38, %v2930_v62  ;;  %v3662_v62 = vld [vmem:[%s6459_s7 + $0x218] sm:$0xff] }
 0x78a   : > { %v2856_v46 = vmul.f32 %v3634_v24, %v2847_v58  ;;  %v3144_v51 = vmul.f32 %v3662_v62, %v3123_v30 }
 0x78b   : > { %v2934_v17 = vadd.f32 %v2933_v54, %v2932_v56  ;;  %v3152_v56 = vsel %vm2564_vm9, %v3143_v48, 0.0 }
 0x78c   : > { %v2870_v15 = vsel %vm2564_vm9, %v2856_v46, 0.0 }
 0x78d   : > { %v2871_v5 = vadd.f32 %v2870_v15, %v2869_v41  ;;  %v2936_v60 = vadd.f32 %v2935_v1, %v2934_v17  ;;  %v3656_v41 = vld [vmem:[%s6459_s7 + $0x1e8] sm:$0xff] }
 0x78e   : > { %v2987_v57 = vpop.permute.xlu1 %2986 }
 0x78f   : > { %v2872_v13 = vrot.slane %v2871_v5, 4  ;;  %v3004_v47 = vmul.f32 %v3648_v39, %v2987_v57  ;;  %v2938_v31 = vadd.f32 %v2937_v12, %v2936_v60 }
 0x791   : > { %v2873_v7 = vadd.f32 %v2872_v13, %v2871_v5  ;;  %v3016_v16 = vsel %vm2564_vm9, %v3004_v47, 0.0  ;;  %v2940_v27 = vadd.f32 %v2939_v8, %v2938_v31  ;;  %v3666_v8 = vld [vmem:[%s6459_s7 + $0x238] sm:$0xff] }
 0x792   : > { %v3017_v33 = vadd.f32 %v3016_v16, %v3015_v19  ;;  %v3154_v16 = vsel %vm2564_vm9, %v3144_v51, 0.0  ;;  %v3178_v51 = vld [vmem:[%s6462_s10] sm:$0x1] }
 0x793   : > { %v2874_v63 = vrot.slane %v2873_v7, 2  ;;  %v3056_v29 = vpop.permute.xlu1 %3055 }
 0x794   : > { %v3019_v53 = vadd.f32 %v3018_v61, %v3017_v33  ;;  %v3658_v33 = vld [vmem:[%s6459_s7 + $0x1f8] sm:$0xff]  ;;  %v3664_v61 = vld [vmem:[%s6459_s7 + $0x228] sm:$0xff] }
 0x795   : > { %v2875_v3 = vadd.f32 %v2874_v63, %v2873_v7 }
 0x796   : > { %v3021_v25 = vadd.f32 %v3020_v40, %v3019_v53 }
 0x797   : > { %v2876_v32 = vrot.slane %v2875_v3, 1 }
 0x798   : > { %v3022_v42 = vrot.slane %v3021_v25, 4  ;;  %v2918_v11 = vpop.permute.xlu1 %2917 }
 0x799   : > { %v2877_v10 = vadd.f32 %v2876_v32, %v2875_v3  ;;  %v2927_v21 = vmul.f32 %v3642_v52, %v2918_v11  ;;  %v3139_v32 = vpop.permute.xlu0 %3138 }
 0x79a   : > { %v3023_v24 = vadd.f32 %v3022_v42, %v3021_v25 }
 0x79b   : > { %v2878_v18 = vadd.f32 %v2877_v10, %v2807_v2  ;;  %v2941_v35 = vsel %vm2564_vm9, %v2927_v21, 0.0  ;;  %v3142_v2 = vmul.f32 %v3660_v34, %v6283_v44  ;;  %v3074_v44 = vmul.f32 %v3655_v22, %v3056_v29  ;;  %v3665_v10 = vld [vmem:[%s6459_s7 + $0x230] sm:$0xff] }
 0x79c   : > { %v2942_v20 = vadd.f32 %v2941_v35, %v2940_v27  ;;  %v3024_v50 = vrot.slane %v3023_v24, 2 }
 0x79d   : > { %v3060_v58 = vpop.permute.xlu1 %3059  ;;  %v3150_v54 = vsel %vm2564_vm9, %v3142_v2, 0.0  ;;  %v3085_v1 = vsel %vm2564_vm9, %v3074_v44, 0.0 }
 0x79e   : > { %v2943_v46 = vrot.slane %v2942_v20, 4  ;;  %v3025_v15 = vadd.f32 %v3024_v50, %v3023_v24  ;;  %v3075_v45 = vmul.f32 %v3656_v41, %v3060_v58  ;;  %v3151_v57 = vadd.f32 %v3150_v54, %v3149_v36  ;;  %v3172_v54 = vld [vmem:[%s6460_s8] sm:$0x1] }
 0x79f   : > { %v3086_v60 = vadd.f32 %v3085_v1, %v6260_v14  ;;  %v3146_v14 = vmul.f32 %v3664_v61, %v3131_v4 }
 0x7a0   : > { %v2944_v38 = vadd.f32 %v2943_v46, %v2942_v20  ;;  %v3026_v26 = vrot.slane %v3025_v15, 1  ;;  %v3153_v23 = vadd.f32 %v3152_v56, %v3151_v57  ;;  %v3087_v59 = vsel %vm2564_vm9, %v3075_v45, 0.0  ;;  %v3257_v45 = vld [vmem:[%s6463_s11 + $0x8] sm:$0xff] }
 0x7a1   : > { %v3088_v29 = vadd.f32 %v3087_v59, %v3086_v60  ;;  %v3158_v24 = vsel %vm2564_vm9, %v3146_v14, 0.0  ;;  %3705 = vmatpush3.msra.mxu1 %v3257_v45 }
 0x7a2   : > { %v2945_v39 = vrot.slane %v2944_v38, 2  ;;  %v3127_v28 = vpop.permute.xlu1 %3126  ;;  %v3027_v12 = vadd.f32 %v3026_v26, %v3025_v15  ;;  %v3155_v3 = vadd.f32 %v3154_v16, %v3153_v23  ;;  %3706 = vmatprep.subr.mxu1 %v4387_v0  ;;  %v3260_v0 = vld [vmem:[%s6464_s12] sm:$0x1] }
 0x7a3   : > { %v3145_v47 = vmul.f32 %v3663_v9, %v3127_v28  ;;  %v3256_v9 = vld [vmem:[%s6463_s11] sm:$0xff] }
 0x7a4   : > { %v2946_v5 = vadd.f32 %v2945_v39, %v2944_v38  ;;  %3707 = vmatpush3.msra.mxu1 %v3256_v9 }
 0x7a5   : > { %v3156_v53 = vsel %vm2564_vm9, %v3145_v47, 0.0 }
 0x7a6   : > { %v2947_v13 = vrot.slane %v2946_v5, 1  ;;  %v3157_v42 = vadd.f32 %v3156_v53, %v3155_v3 }
 0x7a7   : > { %v3064_v17 = vpop.permute.xlu1 %3063 }
 0x7a8   : > { %v2948_v19 = vadd.f32 %v2947_v13, %v2946_v5  ;;  %v3076_v7 = vmul.f32 %v3657_v6, %v3064_v17  ;;  %v3159_v49 = vadd.f32 %v3158_v24, %v3157_v42 }
 0x7aa   : > { %v2949_v43 = vadd.f32 %v2948_v19, %v2878_v18  ;;  %v3089_v63 = vsel %vm2564_vm9, %v3076_v7, 0.0  ;;  %v3148_v18 = vmul.f32 %v3666_v8, %v3139_v32 }
 0x7ab   : > { %v3068_v40 = vpop.permute.xlu1 %3067  ;;  %v3090_v52 = vadd.f32 %v3089_v63, %v3088_v29 }
 0x7ac   : > { %v3028_v31 = vadd.f32 %v3027_v12, %v2949_v43  ;;  %v3077_v25 = vmul.f32 %v3658_v33, %v3068_v40  ;;  %v3162_v50 = vsel %vm2564_vm9, %v3148_v18, 0.0 }
 0x7ae   : > { %v3091_v11 = vsel %vm2564_vm9, %v3077_v25, 0.0 }
 0x7af   : > { %v3092_v21 = vadd.f32 %v3091_v11, %v3090_v52 }
 0x7b0   : > { %v3135_v27 = vpop.permute.xlu1 %3134 }
 0x7b1   : > { %v3093_v35 = vrot.slane %v3092_v21, 4  ;;  %v3147_v34 = vmul.f32 %v3665_v10, %v3135_v27 }
 0x7b3   : > { %v3094_v20 = vadd.f32 %v3093_v35, %v3092_v21  ;;  %v3160_v58 = vsel %vm2564_vm9, %v3147_v34, 0.0 }
 0x7b4   : > { %v3161_v37 = vadd.f32 %v3160_v58, %v3159_v49 }
 0x7b5   : > { %v3095_v46 = vrot.slane %v3094_v20, 2 }
 0x7b6   : > { %v3163_v2 = vadd.f32 %v3162_v50, %v3161_v37 }
 0x7b7   : > { %v3096_v55 = vadd.f32 %v3095_v46, %v3094_v20 }
 0x7b8   : > { %v3164_v22 = vrot.slane %v3163_v2, 4 }
 0x7b9   : > { %v3097_v38 = vrot.slane %v3096_v55, 1 }
 0x7ba   : > { %v3165_v48 = vadd.f32 %v3164_v22, %v3163_v2 }
 0x7bb   : > { %v3098_v41 = vadd.f32 %v3097_v38, %v3096_v55 }
 0x7bc   : > { %v3166_v62 = vrot.slane %v3165_v48, 2 }
 0x7bd   : > { %v3099_v30 = vadd.f32 %v3098_v41, %v3028_v31 }
 0x7be   : > { %v3167_v15 = vadd.f32 %v3166_v62, %v3165_v48 }
 0x7c0   : > { %v3168_v44 = vrot.slane %v3167_v15, 1 }
 0x7c2   : > { %v3169_v39 = vadd.f32 %v3168_v44, %v3167_v15 }
 0x7c4   : > { %v3170_v28 = vadd.f32 %v3169_v39, %v3099_v30 }
 0x7c6   : > { %v3171_v36 = vmul.f32 2.7126736e-05, %v3170_v28 }
 0x7c8   : > { %v3173_v5 = vadd.f32 %v3172_v54, %v3171_v36 }
 0x7ca   : > { %3698 = vmatmul.mubr.msk.f32.vlgmr.msra.gmra.mxu0 %vm2564_vm9, %v3173_v5 }
 0x88a   : > { %v3252_v56 = vpop.f32.mrf.mxu0 }
 0x88b   : > { %v3253_v6 = vadd.f32 %v3252_v56, %v3178_v51 }
 0x88c   : > { %v3699_v57 = vpop.f32.mrf.mxu0 }
 0x88d   : > { %3709 = vmatmul.mubr.msk.f32.vlgmr.msra.gmra.mxu1 %vm2564_vm9, %v3253_v6 }
 0x94d   : > { %v3333_v26 = vpop.f32.mrf.mxu1 }
 0x94e   : > { %v3334_v1 = vadd.f32 %v3333_v26, %v3260_v0 }
 0x94f   : > { %v3710_v13 = vpop.f32.mrf.mxu1 }
 0x950   : > { %3338 = vst.msk [vmem:[%s4518_s15] sm:$0x1] %vm3337_vm12, %v3334_v1 }
 0x951   : > { %4103 = shalt.err (!%p4100_p13)
}
 0x952   : > { %s4104_s15 = scalar_lea.hbm %s6414_s17, 16  ;;  %s4108_s27 = scalar_lea.hbm %s6465_s13, 32 }
 0x953   : > { %p4105_p0 = scmp.ne.s32.totalorder %s6414_s17, %s4104_s15  ;;  %p4109_p3 = scmp.lt.s32.totalorder %s6414_s17, %s6465_s13 }
 0x954   : > { %p4110_p4 = scmp.lt.s32.totalorder %s4108_s27, %s4104_s15 }
 0x955   : > { %p4106_p1 = pnand %p4105_p0, %p4498_p5 }
 0x956   : > { %p4111_p7 = por %p4110_p4, %p4109_p3 }
 0x957   : > { %p4107_p2 = pneg %p4106_p1 }
 0x959   : > { %p4112_p8 = pnand %p4111_p7, %p4107_p2 }
 0x95b   : > { %4115 = shalt.err (!%p4112_p8)
}
 0x95c   : > { %3766 = dma.vmem_to_hbm [thread:$0]  (%p4498_p5), %s3353_s0, 16, %s6414_s17, %s3340_s22  }
 0x95d PF: > { %p3772_p9 = scmp.ge.s32.totalorder %s4258_s28, 2  ;;  %s3364_s23 = sand.u32 1, %s4246_s25  }
 0x95e   : > { %s3365_s24 = scalar_lea.sflag [#allocation5], %s3364_s23 }
 0x95f   : > { %p3769_p10 = pnand %p3772_p9, %p4502_p6 }
 0x961   : > { %p3770_p11 = pneg %p3769_p10 }
 0x963   : > { %4241 = dma.done.wait (%p3770_p11), %s3365_s24, 16  }
 0x964   : > { %4243 = vsyncadd (%p3770_p11), %s3365_s24, 4294967280  ;;  %s6559_s20 = sld [smem:[#allocation7_spill]]  ;;  %p23_p12 = scmp.ge.s32.totalorder %s4485_s14, 4  }
 0x965   : > { %s6560_s27 = sld [smem:[#allocation8_spill]]  ;;  %s6561_s25 = smov %s4250_s26 }
 0x966   : > { %s6563_s28 = smov %s4485_s14  ;;  %25 = sbr.rel (!%p23_p12) target bundleno = 5 (0x5), region = 180 }
 0x96a   : > { %s6562_s26 = smov %s6559_s20 }
 0x96b   :  { %3369 = vsyncpa [#allocation5], 1 }
 0x96c   :  { %3371 = vsyncpa [#allocation5 + $0x1], 1 }

</bundles_post_ra>
